<compile_context>
chip_gen: v7x
topology: tpu7x:2x2x1
jax: 0.10.0
libtpu: 0.0.40
codegen_flags: <defaults>
</compile_context>

<pallas_src>
import functools

import jax
import jax.numpy as jnp
from jax.experimental import pallas as pl
from jax.experimental.pallas import tpu as pltpu


_VMEM = pl.BlockSpec(memory_space=pltpu.MemorySpace.VMEM)


# ----------------------------------------------------------------------------
# Pallas kernel: lane-dense conv matmul   out = relu(W @ patches^T + b)
# ----------------------------------------------------------------------------
def _conv_mm_relu_kernel(w_ref, p_ref, b_ref, o_ref):
    acc = jnp.dot(w_ref[...], p_ref[...], preferred_element_type=jnp.float32)
    acc = acc + b_ref[...]                              # (OC, tn) + (OC, 1)
    o_ref[...] = jnp.maximum(acc, 0.0).astype(o_ref.dtype)


def conv_matmul_relu(wm, patches_t, b_col, *, tn=512):
    """relu(wm @ patches_t + b_col); wm:(OC,K), patches_t:(K,M), b_col:(OC,1).

    The output last dim is M (lane-dense); M is tiled with a 'parallel' grid so
    the HBM<->VMEM pipeline double-buffers and v7x can split tiles across its
    two TensorCores.  Weights/bias stay VMEM-resident (block index constant).
    """
    OC, K = wm.shape
    K2, M = patches_t.shape
    assert K == K2
    tn = min(tn, M)                                     # tiny inputs: one block
    grid = (pl.cdiv(M, tn),)
    return pl.pallas_call(
        _conv_mm_relu_kernel,
        out_shape=jax.ShapeDtypeStruct((OC, M), jnp.float32),
        grid=grid,
        in_specs=[
            pl.BlockSpec((OC, K), lambda i: (0, 0)),    # weights resident
            pl.BlockSpec((K, tn), lambda i: (0, i)),    # stream M tiles
            pl.BlockSpec((OC, 1), lambda i: (0, 0)),
        ],
        out_specs=pl.BlockSpec((OC, tn), lambda i: (0, i)),
        compiler_params=pltpu.CompilerParams(dimension_semantics=("parallel",)),
    )(wm, patches_t, b_col)


# ----------------------------------------------------------------------------
# Pallas kernel: fused-gate GRU (PyTorch r/z/n semantics), last hidden only
# ----------------------------------------------------------------------------
def _gru_kernel(f_ref, r_ref, wif_ref, wir_ref, whh_ref, bih_ref, bhh_ref,
                h_ref, *, num_steps, batch):
    Hd = h_ref.shape[1]

    # Hoisted input projection: one (T*B, F) x (F, 3H) MXU call (+ reward term)
    # instead of 3*T tiny matmuls on the serialized recurrent path.
    xp = jnp.dot(f_ref[...], wif_ref[...], preferred_element_type=jnp.float32)
    if wir_ref.shape[0] == 1:                           # num_rewards == 1
        xp = xp + r_ref[...] * wir_ref[...]             # outer-product broadcast
    else:
        xp = xp + jnp.dot(r_ref[...], wir_ref[...],
                          preferred_element_type=jnp.float32)
    xp = xp + bih_ref[...]                              # (T*B, 3H): [r | z | n]

    w_hh = whh_ref[...]                                 # (H, 3H)
    b_hh = bhh_ref[...]                                 # (1, 3H)

    h = jnp.zeros((batch, Hd), jnp.float32)
    for t in range(num_steps):                          # unrolled: T static/small
        gx = xp[t * batch:(t + 1) * batch, :]           # (B, 3H), static slice
        gh = jnp.dot(h, w_hh, preferred_element_type=jnp.float32) + b_hh
        r = jax.nn.sigmoid(gx[:, :Hd] + gh[:, :Hd])
        z = jax.nn.sigmoid(gx[:, Hd:2 * Hd] + gh[:, Hd:2 * Hd])
        n = jnp.tanh(gx[:, 2 * Hd:] + r * gh[:, 2 * Hd:])   # b_hn inside r*(...)
        h = (1.0 - z) * n + z * h
    h_ref[...] = h.astype(h_ref.dtype)


def gru_last_hidden(f2d, r2d, g, *, batch, num_steps):
    """Single-layer GRU over (T*B, F) features + (T*B, R) rewards -> (B, H)."""
    Hd = g["w_hh"].shape[0]
    kernel = functools.partial(_gru_kernel, num_steps=num_steps, batch=batch)
    return pl.pallas_call(
        kernel,
        out_shape=jax.ShapeDtypeStruct((batch, Hd), jnp.float32),
        in_specs=[_VMEM] * 7,
        out_specs=_VMEM,
    )(f2d, r2d, g["w_ih_f"], g["w_ih_r"], g["w_hh"], g["b_ih"], g["b_hh"])


# ----------------------------------------------------------------------------
# Pallas kernel: fused fc(+ReLU) -> [actor | critic] head
# ----------------------------------------------------------------------------
def _head_kernel(sf_ref, hid_ref, wf_ref, wh_ref, fcb_ref, hw_ref, hb_ref,
                 logit_ref, value_ref, *, num_actions):
    h = (jnp.dot(sf_ref[...], wf_ref[...], preferred_element_type=jnp.float32)
         + jnp.dot(hid_ref[...], wh_ref[...], preferred_element_type=jnp.float32)
         + fcb_ref[...])
    h = jnp.maximum(h, 0.0)                             # fc + ReLU (stays in VMEM)
    out = jnp.dot(h, hw_ref[...], preferred_element_type=jnp.float32) + hb_ref[...]
    logit_ref[...] = out[:, :num_actions].astype(logit_ref.dtype)
    value_ref[...] = out[:, num_actions:num_actions + 1].astype(value_ref.dtype)


def policy_value_head(sf, hidden, params, num_actions):
    B = sf.shape[0]
    kernel = functools.partial(_head_kernel, num_actions=num_actions)
    return pl.pallas_call(
        kernel,
        out_shape=(jax.ShapeDtypeStruct((B, num_actions), jnp.float32),
                   jax.ShapeDtypeStruct((B, 1), jnp.float32)),
        in_specs=[_VMEM] * 7,
        out_specs=(_VMEM, _VMEM),
    )(sf, hidden, params["fc"]["w_f"], params["fc"]["w_h"], params["fc"]["b"],
      params["head"]["w"], params["head"]["b"])


# ----------------------------------------------------------------------------
# Conv feature extractor: im2col glue in XLA, lane-dense matmul in Pallas
# ----------------------------------------------------------------------------
def _im2col_t(x_cnhw, kh, kw, stride):
    """CNHW -> patches^T (C*kh*kw, N*OH*OW); row order (c, i, j) matches torch
    weight.view(OC, -1) column order, column order is (n, oh, ow)."""
    C, N, H, W = x_cnhw.shape
    OH = (H - kh) // stride + 1
    OW = (W - kw) // stride + 1
    cols = []
    for i in range(kh):
        for j in range(kw):
            cols.append(x_cnhw[:, :, i:i + stride * OH:stride,
                               j:j + stride * OW:stride])
    p = jnp.stack(cols, axis=1)                         # (C, kh*kw, N, OH, OW)
    return p.reshape(C * kh * kw, N * OH * OW), OH, OW


def _conv2d_relu_cnhw(x_cnhw, wm, b_col, stride):
    OC = wm.shape[0]
    N = x_cnhw.shape[1]
    pt, OH, OW = _im2col_t(x_cnhw, 3, 3, stride)
    out = conv_matmul_relu(wm, pt, b_col)               # (OC, N*OH*OW)
    return out.reshape(OC, N, OH, OW)


def features(x_nchw, p):
    """Conv2d(C,16,3,1)+ReLU ; Conv2d(16,16,3,2)+ReLU ; flatten == torch .view(N,-1)."""
    x = jnp.transpose(x_nchw, (1, 0, 2, 3))             # NCHW -> CNHW (once)
    x = _conv2d_relu_cnhw(x, p["w1m"], p["b1c"], stride=1)
    x = _conv2d_relu_cnhw(x, p["w2m"], p["b2c"], stride=2)
    C2, N, OH, OW = x.shape
    # per-sample (c, oh, ow) flatten order == torch NCHW .view(N, -1)
    return jnp.transpose(x, (1, 0, 2, 3)).reshape(N, C2 * OH * OW)


# ----------------------------------------------------------------------------
# Synthetic "imagination" (external injected module in the original code)
# ----------------------------------------------------------------------------
def imagination_fn(state, num_steps, num_actions):
    # TODO(synk): `self.imagination` is an external environment-model module;
    # replaced here by a deterministic synthetic full rollout (per-action).
    B = state.shape[0]
    rep = jnp.repeat(state, num_actions, axis=0)                 # (B*A, C, H, W)
    act = jnp.tile(jnp.arange(num_actions, dtype=jnp.float32), B)
    act = act.reshape(B * num_actions, 1, 1, 1)
    steps = jnp.arange(num_steps, dtype=jnp.float32).reshape(num_steps, 1, 1, 1, 1)
    imagined_state = rep[None] * (0.9 ** steps) + 0.01 * act[None]
    imagined_reward = jnp.mean(imagined_state, axis=(2, 3, 4))[..., None]  # (T,B*A,1)
    return imagined_state, imagined_reward


# ----------------------------------------------------------------------------
# I2A forward (full_rollout=True)
# ----------------------------------------------------------------------------
def i2a_forward(state, params, *, num_steps, num_actions):
    batch_size = state.shape[0]
    C, H, W = state.shape[1:]

    imagined_state, imagined_reward = imagination_fn(state, num_steps, num_actions)
    T, NB = imagined_state.shape[:2]

    # --- RolloutEncoder ---
    s = imagined_state.reshape(T * NB, C, H, W)
    f = features(s, params["enc_feat"])                   # (T*NB, F), torch order
    r = imagined_reward.reshape(T * NB, -1)                # (T*NB, num_rewards)
    hidden = gru_last_hidden(f, r, params["gru"], batch=NB, num_steps=T)  # (NB, Hd)
    hidden = hidden.reshape(batch_size, -1)                # (B, A*Hd)

    # --- main branch + fused fc/actor/critic head ---
    sf = features(state, params["feat"])                   # (B, F)
    logit, value = policy_value_head(sf, hidden, params, num_actions)
    return logit, value


# ----------------------------------------------------------------------------
# Deterministic parameter init (torch-like layout) + kernel-layout preparation
# ----------------------------------------------------------------------------
def init_params(key, in_shape, num_actions, num_rewards, hidden_size):
    C, H, W = in_shape
    oh1, ow1 = H - 2, W - 2
    oh2, ow2 = (oh1 - 3) // 2 + 1, (ow1 - 3) // 2 + 1
    feature_size = 16 * oh2 * ow2
    gru_in = feature_size + num_rewards
    fc_in = feature_size + num_actions * hidden_size

    keys = iter(jax.random.split(key, 32))

    def p(shape, scale=0.05):
        return scale * jax.random.normal(next(keys), shape, jnp.float32)

    def conv_params():
        return {"w1": p((16, C, 3, 3)), "b1": p((16,)),
                "w2": p((16, 16, 3, 3)), "b2": p((16,))}

    params = {
        "feat": conv_params(),
        "enc_feat": conv_params(),
        "gru": {"w_ih": p((3, gru_in, hidden_size)),     # gate order r, z, n
                "w_hh": p((3, hidden_size, hidden_size)),
                "b_ih": p((3, 1, hidden_size)),
                "b_hh": p((3, 1, hidden_size))},
        "fc": {"w": p((fc_in, 256)), "b": p((1, 256))},
        "actor": {"w": p((256, num_actions)), "b": p((1, num_actions))},
        "critic": {"w": p((256, 1)), "b": p((1, 1))},
    }
    return params, feature_size


def prepare_params(p, feature_size):
    """One-time conversion of torch-layout params into fused kernel layouts."""
    def conv(cp):
        return {"w1m": cp["w1"].reshape(cp["w1"].shape[0], -1),  # (OC, C*3*3)
                "b1c": cp["b1"].reshape(-1, 1),
                "w2m": cp["w2"].reshape(cp["w2"].shape[0], -1),
                "b2c": cp["b2"].reshape(-1, 1)}

    g = p["gru"]
    w_ih = jnp.concatenate([g["w_ih"][0], g["w_ih"][1], g["w_ih"][2]], axis=1)  # (I,3H)
    w_hh = jnp.concatenate([g["w_hh"][0], g["w_hh"][1], g["w_hh"][2]], axis=1)  # (H,3H)
    b_ih = jnp.concatenate([g["b_ih"][0], g["b_ih"][1], g["b_ih"][2]], axis=1)  # (1,3H)
    b_hh = jnp.concatenate([g["b_hh"][0], g["b_hh"][1], g["b_hh"][2]], axis=1)  # (1,3H)

    return {
        "feat": conv(p["feat"]),
        "enc_feat": conv(p["enc_feat"]),
        "gru": {"w_ih_f": w_ih[:feature_size],           # feature rows
                "w_ih_r": w_ih[feature_size:],           # reward rows
                "w_hh": w_hh, "b_ih": b_ih, "b_hh": b_hh},
        "fc": {"w_f": p["fc"]["w"][:feature_size],
               "w_h": p["fc"]["w"][feature_size:],
               "b": p["fc"]["b"]},
        "head": {"w": jnp.concatenate([p["actor"]["w"], p["critic"]["w"]], axis=1),
                 "b": jnp.concatenate([p["actor"]["b"], p["critic"]["b"]], axis=1)},
    }


# ----------------------------------------------------------------------------
if __name__ == "__main__":
    key = jax.random.PRNGKey(0)

    batch = 2
    in_shape = (4, 16, 16)          # (C, H, W)
    num_actions = 4
    num_rewards = 1
    hidden_size = 32
    num_steps = 3                   # imagination rollout length

    torch_layout_params, feature_size = init_params(key, in_shape, num_actions,
                                                    num_rewards, hidden_size)
    params = prepare_params(torch_layout_params, feature_size)

    state = jax.random.normal(jax.random.fold_in(key, 1234),
                              (batch,) + in_shape, jnp.float32)

    fwd = jax.jit(functools.partial(i2a_forward, num_steps=num_steps,
                                    num_actions=num_actions))
    logit, value = fwd(state, params)
    jax.block_until_ready((logit, value))

    assert logit.shape == (batch, num_actions), logit.shape
    assert value.shape == (batch, 1), value.shape
    assert bool(jnp.all(jnp.isfinite(logit))) and bool(jnp.all(jnp.isfinite(value)))
    print("KERNEL_OK")
</pallas_src>

<mosaic_0001>
module attributes {stable_mosaic.version = 11 : i64} {
  func.func @_conv_mm_relu_kernel(%arg0: i32, %arg1: memref<16x36xf32, #tpu.memory_space<vmem>>, %arg2: memref<36x512xf32, #tpu.memory_space<vmem>>, %arg3: memref<16x1xf32, #tpu.memory_space<vmem>>, %arg4: memref<16x512xf32, #tpu.memory_space<vmem>>) attributes {dimension_semantics = [#tpu.dimension_semantics<parallel>], iteration_bounds = array<i64: 10>, scalar_prefetch = 0 : i64, scratch_operands = 0 : i64, tpu.core_type = #tpu.core_type<tc>, window_params = [{pipeline_mode = #tpu.pipeline_mode<synchronous>, transform_indices = @transform_0, window_bounds = array<i64: 16, 36>}, {transform_indices = @transform_1, window_bounds = array<i64: 36, 512>}, {pipeline_mode = #tpu.pipeline_mode<synchronous>, transform_indices = @transform_2, window_bounds = array<i64: 16, 1>}, {transform_indices = @transform_3, window_bounds = array<i64: 16, 512>}]} {
    %c0 = arith.constant 0 : index
    %c0_0 = arith.constant 0 : index
    %0 = vector.load %arg1[%c0, %c0_0] : memref<16x36xf32, #tpu.memory_space<vmem>>, vector<16x36xf32>
    %c0_1 = arith.constant 0 : index
    %c0_2 = arith.constant 0 : index
    %1 = vector.load %arg2[%c0_1, %c0_2] : memref<36x512xf32, #tpu.memory_space<vmem>>, vector<36x512xf32>
    %cst = arith.constant dense<0.000000e+00> : vector<16x512xf32>
    %2 = tpu.matmul %0, %1, %cst {dimension_numbers = #tpu.dot_dimension_numbers<[1], [0], [0], [1], [0, 0, 1, 1], [], []>} : vector<16x36xf32>, vector<36x512xf32>, vector<16x512xf32> -> vector<16x512xf32>
    %c0_3 = arith.constant 0 : index
    %c0_4 = arith.constant 0 : index
    %3 = vector.load %arg3[%c0_3, %c0_4] : memref<16x1xf32, #tpu.memory_space<vmem>>, vector<16x1xf32>
    %4 = vector.broadcast %3 : vector<16x1xf32> to vector<16x512xf32>
    %5 = arith.addf %2, %4 : vector<16x512xf32>
    %cst_5 = arith.constant 0.000000e+00 : f32
    %6 = vector.broadcast %cst_5 : f32 to vector<16x512xf32>
    %7 = arith.maximumf %5, %6 : vector<16x512xf32>
    %c0_6 = arith.constant 0 : index
    %c0_7 = arith.constant 0 : index
    %8 = vector.load %arg4[%c0_6, %c0_7] : memref<16x512xf32, #tpu.memory_space<vmem>>, vector<16x512xf32>
    tpu.vector_store %arg4[%c0_6, %c0_7], %7 {strides = array<i32>} : memref<16x512xf32, #tpu.memory_space<vmem>>, vector<16x512xf32>,
    return
  }
  func.func @transform_0(%arg0: i32) -> (i32, i32) {
    %c0_i32 = arith.constant 0 : i32
    %c0_i32_0 = arith.constant 0 : i32
    %c0_i32_1 = arith.constant 0 : i32
    return %c0_i32, %c0_i32_0 : i32, i32
  }
  func.func @transform_1(%arg0: i32) -> (i32, i32) {
    %c0_i32 = arith.constant 0 : i32
    %c0_i32_0 = arith.constant 0 : i32
    return %c0_i32, %arg0 : i32, i32
  }
  func.func @transform_2(%arg0: i32) -> (i32, i32) {
    %c0_i32 = arith.constant 0 : i32
    %c0_i32_0 = arith.constant 0 : i32
    %c0_i32_1 = arith.constant 0 : i32
    return %c0_i32, %c0_i32_0 : i32, i32
  }
  func.func @transform_3(%arg0: i32) -> (i32, i32) {
    %c0_i32 = arith.constant 0 : i32
    %c0_i32_0 = arith.constant 0 : i32
    return %c0_i32, %arg0 : i32, i32
  }
}

module attributes {stable_mosaic.version = 11 : i64} {
  func.func @_conv_mm_relu_kernel(%arg0: i32, %arg1: memref<16x144xf32, #tpu.memory_space<vmem>>, %arg2: memref<144x512xf32, #tpu.memory_space<vmem>>, %arg3: memref<16x1xf32, #tpu.memory_space<vmem>>, %arg4: memref<16x512xf32, #tpu.memory_space<vmem>>) attributes {dimension_semantics = [#tpu.dimension_semantics<parallel>], iteration_bounds = array<i64: 2>, scalar_prefetch = 0 : i64, scratch_operands = 0 : i64, tpu.core_type = #tpu.core_type<tc>, window_params = [{pipeline_mode = #tpu.pipeline_mode<synchronous>, transform_indices = @transform_0, window_bounds = array<i64: 16, 144>}, {transform_indices = @transform_1, window_bounds = array<i64: 144, 512>}, {pipeline_mode = #tpu.pipeline_mode<synchronous>, transform_indices = @transform_2, window_bounds = array<i64: 16, 1>}, {transform_indices = @transform_3, window_bounds = array<i64: 16, 512>}]} {
    %c0 = arith.constant 0 : index
    %c0_0 = arith.constant 0 : index
    %0 = vector.load %arg1[%c0, %c0_0] : memref<16x144xf32, #tpu.memory_space<vmem>>, vector<16x144xf32>
    %c0_1 = arith.constant 0 : index
    %c0_2 = arith.constant 0 : index
    %1 = vector.load %arg2[%c0_1, %c0_2] : memref<144x512xf32, #tpu.memory_space<vmem>>, vector<144x512xf32>
    %cst = arith.constant dense<0.000000e+00> : vector<16x512xf32>
    %2 = tpu.matmul %0, %1, %cst {dimension_numbers = #tpu.dot_dimension_numbers<[1], [0], [0], [1], [0, 0, 1, 1], [], []>} : vector<16x144xf32>, vector<144x512xf32>, vector<16x512xf32> -> vector<16x512xf32>
    %c0_3 = arith.constant 0 : index
    %c0_4 = arith.constant 0 : index
    %3 = vector.load %arg3[%c0_3, %c0_4] : memref<16x1xf32, #tpu.memory_space<vmem>>, vector<16x1xf32>
    %4 = vector.broadcast %3 : vector<16x1xf32> to vector<16x512xf32>
    %5 = arith.addf %2, %4 : vector<16x512xf32>
    %cst_5 = arith.constant 0.000000e+00 : f32
    %6 = vector.broadcast %cst_5 : f32 to vector<16x512xf32>
    %7 = arith.maximumf %5, %6 : vector<16x512xf32>
    %c0_6 = arith.constant 0 : index
    %c0_7 = arith.constant 0 : index
    %8 = vector.load %arg4[%c0_6, %c0_7] : memref<16x512xf32, #tpu.memory_space<vmem>>, vector<16x512xf32>
    tpu.vector_store %arg4[%c0_6, %c0_7], %7 {strides = array<i32>} : memref<16x512xf32, #tpu.memory_space<vmem>>, vector<16x512xf32>,
    return
  }
  func.func @transform_0(%arg0: i32) -> (i32, i32) {
    %c0_i32 = arith.constant 0 : i32
    %c0_i32_0 = arith.constant 0 : i32
    %c0_i32_1 = arith.constant 0 : i32
    return %c0_i32, %c0_i32_0 : i32, i32
  }
  func.func @transform_1(%arg0: i32) -> (i32, i32) {
    %c0_i32 = arith.constant 0 : i32
    %c0_i32_0 = arith.constant 0 : i32
    return %c0_i32, %arg0 : i32, i32
  }
  func.func @transform_2(%arg0: i32) -> (i32, i32) {
    %c0_i32 = arith.constant 0 : i32
    %c0_i32_0 = arith.constant 0 : i32
    %c0_i32_1 = arith.constant 0 : i32
    return %c0_i32, %c0_i32_0 : i32, i32
  }
  func.func @transform_3(%arg0: i32) -> (i32, i32) {
    %c0_i32 = arith.constant 0 : i32
    %c0_i32_0 = arith.constant 0 : i32
    return %c0_i32, %arg0 : i32, i32
  }
}

module attributes {stable_mosaic.version = 11 : i64} {
  func.func @_gru_kernel(%arg0: memref<24x576xf32, #tpu.memory_space<vmem>>, %arg1: memref<24x1xf32, #tpu.memory_space<vmem>>, %arg2: memref<576x96xf32, #tpu.memory_space<vmem>>, %arg3: memref<1x96xf32, #tpu.memory_space<vmem>>, %arg4: memref<32x96xf32, #tpu.memory_space<vmem>>, %arg5: memref<1x96xf32, #tpu.memory_space<vmem>>, %arg6: memref<1x96xf32, #tpu.memory_space<vmem>>, %arg7: memref<8x32xf32, #tpu.memory_space<vmem>>) attributes {dimension_semantics = [], scalar_prefetch = 0 : i64, scratch_operands = 0 : i64, tpu.core_type = #tpu.core_type<tc>} {
    %c0 = arith.constant 0 : index
    %c0_0 = arith.constant 0 : index
    %0 = vector.load %arg0[%c0, %c0_0] : memref<24x576xf32, #tpu.memory_space<vmem>>, vector<24x576xf32>
    %c0_1 = arith.constant 0 : index
    %c0_2 = arith.constant 0 : index
    %1 = vector.load %arg2[%c0_1, %c0_2] : memref<576x96xf32, #tpu.memory_space<vmem>>, vector<576x96xf32>
    %cst = arith.constant dense<0.000000e+00> : vector<24x96xf32>
    %2 = tpu.matmul %0, %1, %cst {dimension_numbers = #tpu.dot_dimension_numbers<[1], [0], [0], [1], [0, 0, 1, 1], [], []>} : vector<24x576xf32>, vector<576x96xf32>, vector<24x96xf32> -> vector<24x96xf32>
    %c0_3 = arith.constant 0 : index
    %c0_4 = arith.constant 0 : index
    %3 = vector.load %arg1[%c0_3, %c0_4] : memref<24x1xf32, #tpu.memory_space<vmem>>, vector<24x1xf32>
    %c0_5 = arith.constant 0 : index
    %c0_6 = arith.constant 0 : index
    %4 = vector.load %arg3[%c0_5, %c0_6] : memref<1x96xf32, #tpu.memory_space<vmem>>, vector<1x96xf32>
    %5 = vector.broadcast %3 : vector<24x1xf32> to vector<24x96xf32>
    %6 = vector.broadcast %4 : vector<1x96xf32> to vector<24x96xf32>
    %7 = arith.mulf %5, %6 : vector<24x96xf32>
    %8 = arith.addf %2, %7 : vector<24x96xf32>
    %c0_7 = arith.constant 0 : index
    %c0_8 = arith.constant 0 : index
    %9 = vector.load %arg5[%c0_7, %c0_8] : memref<1x96xf32, #tpu.memory_space<vmem>>, vector<1x96xf32>
    %10 = vector.broadcast %9 : vector<1x96xf32> to vector<24x96xf32>
    %11 = arith.addf %8, %10 : vector<24x96xf32>
    %c0_9 = arith.constant 0 : index
    %c0_10 = arith.constant 0 : index
    %12 = vector.load %arg4[%c0_9, %c0_10] : memref<32x96xf32, #tpu.memory_space<vmem>>, vector<32x96xf32>
    %c0_11 = arith.constant 0 : index
    %c0_12 = arith.constant 0 : index
    %13 = vector.load %arg6[%c0_11, %c0_12] : memref<1x96xf32, #tpu.memory_space<vmem>>, vector<1x96xf32>
    %cst_13 = arith.constant 0.000000e+00 : f32
    %14 = vector.broadcast %cst_13 : f32 to vector<8x32xf32>
    %15 = vector.extract_strided_slice %11 {offsets = [0, 0], sizes = [8, 96], strides = [1, 1]} : vector<24x96xf32> to vector<8x96xf32>
    %cst_14 = arith.constant dense<0.000000e+00> : vector<8x96xf32>
    %16 = tpu.matmul %14, %12, %cst_14 {dimension_numbers = #tpu.dot_dimension_numbers<[1], [0], [0], [1], [0, 0, 1, 1], [], []>} : vector<8x32xf32>, vector<32x96xf32>, vector<8x96xf32> -> vector<8x96xf32>
    %17 = vector.broadcast %13 : vector<1x96xf32> to vector<8x96xf32>
    %18 = arith.addf %16, %17 : vector<8x96xf32>
    %19 = vector.extract_strided_slice %15 {offsets = [0, 0], sizes = [8, 32], strides = [1, 1]} : vector<8x96xf32> to vector<8x32xf32>
    %20 = vector.extract_strided_slice %18 {offsets = [0, 0], sizes = [8, 32], strides = [1, 1]} : vector<8x96xf32> to vector<8x32xf32>
    %21 = arith.addf %19, %20 : vector<8x32xf32>
    %22 = arith.negf %21 : vector<8x32xf32>
    %23 = math.exp %22 : vector<8x32xf32>
    %cst_15 = arith.constant 1.000000e+00 : f32
    %24 = vector.broadcast %cst_15 : f32 to vector<8x32xf32>
    %25 = arith.addf %24, %23 : vector<8x32xf32>
    %26 = arith.divf %24, %25 : vector<8x32xf32>
    %27 = vector.extract_strided_slice %15 {offsets = [0, 32], sizes = [8, 32], strides = [1, 1]} : vector<8x96xf32> to vector<8x32xf32>
    %28 = vector.extract_strided_slice %18 {offsets = [0, 32], sizes = [8, 32], strides = [1, 1]} : vector<8x96xf32> to vector<8x32xf32>
    %29 = arith.addf %27, %28 : vector<8x32xf32>
    %30 = arith.negf %29 : vector<8x32xf32>
    %31 = math.exp %30 : vector<8x32xf32>
    %cst_16 = arith.constant 1.000000e+00 : f32
    %32 = vector.broadcast %cst_16 : f32 to vector<8x32xf32>
    %33 = arith.addf %32, %31 : vector<8x32xf32>
    %34 = arith.divf %32, %33 : vector<8x32xf32>
    %35 = vector.extract_strided_slice %15 {offsets = [0, 64], sizes = [8, 32], strides = [1, 1]} : vector<8x96xf32> to vector<8x32xf32>
    %36 = vector.extract_strided_slice %18 {offsets = [0, 64], sizes = [8, 32], strides = [1, 1]} : vector<8x96xf32> to vector<8x32xf32>
    %37 = arith.mulf %26, %36 : vector<8x32xf32>
    %38 = arith.addf %35, %37 : vector<8x32xf32>
    %39 = math.tanh %38 : vector<8x32xf32>
    %cst_17 = arith.constant 1.000000e+00 : f32
    %40 = vector.broadcast %cst_17 : f32 to vector<8x32xf32>
    %41 = arith.subf %40, %34 : vector<8x32xf32>
    %42 = arith.mulf %41, %39 : vector<8x32xf32>
    %43 = arith.mulf %34, %14 : vector<8x32xf32>
    %44 = arith.addf %42, %43 : vector<8x32xf32>
    %45 = vector.extract_strided_slice %11 {offsets = [8, 0], sizes = [8, 96], strides = [1, 1]} : vector<24x96xf32> to vector<8x96xf32>
    %cst_18 = arith.constant dense<0.000000e+00> : vector<8x96xf32>
    %46 = tpu.matmul %44, %12, %cst_18 {dimension_numbers = #tpu.dot_dimension_numbers<[1], [0], [0], [1], [0, 0, 1, 1], [], []>} : vector<8x32xf32>, vector<32x96xf32>, vector<8x96xf32> -> vector<8x96xf32>
    %47 = vector.broadcast %13 : vector<1x96xf32> to vector<8x96xf32>
    %48 = arith.addf %46, %47 : vector<8x96xf32>
    %49 = vector.extract_strided_slice %45 {offsets = [0, 0], sizes = [8, 32], strides = [1, 1]} : vector<8x96xf32> to vector<8x32xf32>
    %50 = vector.extract_strided_slice %48 {offsets = [0, 0], sizes = [8, 32], strides = [1, 1]} : vector<8x96xf32> to vector<8x32xf32>
    %51 = arith.addf %49, %50 : vector<8x32xf32>
    %52 = arith.negf %51 : vector<8x32xf32>
    %53 = math.exp %52 : vector<8x32xf32>
    %cst_19 = arith.constant 1.000000e+00 : f32
    %54 = vector.broadcast %cst_19 : f32 to vector<8x32xf32>
    %55 = arith.addf %54, %53 : vector<8x32xf32>
    %56 = arith.divf %54, %55 : vector<8x32xf32>
    %57 = vector.extract_strided_slice %45 {offsets = [0, 32], sizes = [8, 32], strides = [1, 1]} : vector<8x96xf32> to vector<8x32xf32>
    %58 = vector.extract_strided_slice %48 {offsets = [0, 32], sizes = [8, 32], strides = [1, 1]} : vector<8x96xf32> to vector<8x32xf32>
    %59 = arith.addf %57, %58 : vector<8x32xf32>
    %60 = arith.negf %59 : vector<8x32xf32>
    %61 = math.exp %60 : vector<8x32xf32>
    %cst_20 = arith.constant 1.000000e+00 : f32
    %62 = vector.broadcast %cst_20 : f32 to vector<8x32xf32>
    %63 = arith.addf %62, %61 : vector<8x32xf32>
    %64 = arith.divf %62, %63 : vector<8x32xf32>
    %65 = vector.extract_strided_slice %45 {offsets = [0, 64], sizes = [8, 32], strides = [1, 1]} : vector<8x96xf32> to vector<8x32xf32>
    %66 = vector.extract_strided_slice %48 {offsets = [0, 64], sizes = [8, 32], strides = [1, 1]} : vector<8x96xf32> to vector<8x32xf32>
    %67 = arith.mulf %56, %66 : vector<8x32xf32>
    %68 = arith.addf %65, %67 : vector<8x32xf32>
    %69 = math.tanh %68 : vector<8x32xf32>
    %cst_21 = arith.constant 1.000000e+00 : f32
    %70 = vector.broadcast %cst_21 : f32 to vector<8x32xf32>
    %71 = arith.subf %70, %64 : vector<8x32xf32>
    %72 = arith.mulf %71, %69 : vector<8x32xf32>
    %73 = arith.mulf %64, %44 : vector<8x32xf32>
    %74 = arith.addf %72, %73 : vector<8x32xf32>
    %75 = vector.extract_strided_slice %11 {offsets = [16, 0], sizes = [8, 96], strides = [1, 1]} : vector<24x96xf32> to vector<8x96xf32>
    %cst_22 = arith.constant dense<0.000000e+00> : vector<8x96xf32>
    %76 = tpu.matmul %74, %12, %cst_22 {dimension_numbers = #tpu.dot_dimension_numbers<[1], [0], [0], [1], [0, 0, 1, 1], [], []>} : vector<8x32xf32>, vector<32x96xf32>, vector<8x96xf32> -> vector<8x96xf32>
    %77 = vector.broadcast %13 : vector<1x96xf32> to vector<8x96xf32>
    %78 = arith.addf %76, %77 : vector<8x96xf32>
    %79 = vector.extract_strided_slice %75 {offsets = [0, 0], sizes = [8, 32], strides = [1, 1]} : vector<8x96xf32> to vector<8x32xf32>
    %80 = vector.extract_strided_slice %78 {offsets = [0, 0], sizes = [8, 32], strides = [1, 1]} : vector<8x96xf32> to vector<8x32xf32>
    %81 = arith.addf %79, %80 : vector<8x32xf32>
    %82 = arith.negf %81 : vector<8x32xf32>
    %83 = math.exp %82 : vector<8x32xf32>
    %cst_23 = arith.constant 1.000000e+00 : f32
    %84 = vector.broadcast %cst_23 : f32 to vector<8x32xf32>
    %85 = arith.addf %84, %83 : vector<8x32xf32>
    %86 = arith.divf %84, %85 : vector<8x32xf32>
    %87 = vector.extract_strided_slice %75 {offsets = [0, 32], sizes = [8, 32], strides = [1, 1]} : vector<8x96xf32> to vector<8x32xf32>
    %88 = vector.extract_strided_slice %78 {offsets = [0, 32], sizes = [8, 32], strides = [1, 1]} : vector<8x96xf32> to vector<8x32xf32>
    %89 = arith.addf %87, %88 : vector<8x32xf32>
    %90 = arith.negf %89 : vector<8x32xf32>
    %91 = math.exp %90 : vector<8x32xf32>
    %cst_24 = arith.constant 1.000000e+00 : f32
    %92 = vector.broadcast %cst_24 : f32 to vector<8x32xf32>
    %93 = arith.addf %92, %91 : vector<8x32xf32>
    %94 = arith.divf %92, %93 : vector<8x32xf32>
    %95 = vector.extract_strided_slice %75 {offsets = [0, 64], sizes = [8, 32], strides = [1, 1]} : vector<8x96xf32> to vector<8x32xf32>
    %96 = vector.extract_strided_slice %78 {offsets = [0, 64], sizes = [8, 32], strides = [1, 1]} : vector<8x96xf32> to vector<8x32xf32>
    %97 = arith.mulf %86, %96 : vector<8x32xf32>
    %98 = arith.addf %95, %97 : vector<8x32xf32>
    %99 = math.tanh %98 : vector<8x32xf32>
    %cst_25 = arith.constant 1.000000e+00 : f32
    %100 = vector.broadcast %cst_25 : f32 to vector<8x32xf32>
    %101 = arith.subf %100, %94 : vector<8x32xf32>
    %102 = arith.mulf %101, %99 : vector<8x32xf32>
    %103 = arith.mulf %94, %74 : vector<8x32xf32>
    %104 = arith.addf %102, %103 : vector<8x32xf32>
    %c0_26 = arith.constant 0 : index
    %c0_27 = arith.constant 0 : index
    %105 = vector.load %arg7[%c0_26, %c0_27] : memref<8x32xf32, #tpu.memory_space<vmem>>, vector<8x32xf32>
    tpu.vector_store %arg7[%c0_26, %c0_27], %104 {strides = array<i32>} : memref<8x32xf32, #tpu.memory_space<vmem>>, vector<8x32xf32>,
    return
  }
}

module attributes {stable_mosaic.version = 11 : i64} {
  func.func @_conv_mm_relu_kernel(%arg0: i32, %arg1: memref<16x36xf32, #tpu.memory_space<vmem>>, %arg2: memref<36x392xf32, #tpu.memory_space<vmem>>, %arg3: memref<16x1xf32, #tpu.memory_space<vmem>>, %arg4: memref<16x392xf32, #tpu.memory_space<vmem>>) attributes {dimension_semantics = [#tpu.dimension_semantics<parallel>], iteration_bounds = array<i64: 1>, scalar_prefetch = 0 : i64, scratch_operands = 0 : i64, tpu.core_type = #tpu.core_type<tc>, window_params = [{pipeline_mode = #tpu.pipeline_mode<synchronous>, transform_indices = @transform_0, window_bounds = array<i64: 16, 36>}, {transform_indices = @transform_1, window_bounds = array<i64: 36, 392>}, {pipeline_mode = #tpu.pipeline_mode<synchronous>, transform_indices = @transform_2, window_bounds = array<i64: 16, 1>}, {transform_indices = @transform_3, window_bounds = array<i64: 16, 392>}]} {
    %c0 = arith.constant 0 : index
    %c0_0 = arith.constant 0 : index
    %0 = vector.load %arg1[%c0, %c0_0] : memref<16x36xf32, #tpu.memory_space<vmem>>, vector<16x36xf32>
    %c0_1 = arith.constant 0 : index
    %c0_2 = arith.constant 0 : index
    %1 = vector.load %arg2[%c0_1, %c0_2] : memref<36x392xf32, #tpu.memory_space<vmem>>, vector<36x392xf32>
    %cst = arith.constant dense<0.000000e+00> : vector<16x392xf32>
    %2 = tpu.matmul %0, %1, %cst {dimension_numbers = #tpu.dot_dimension_numbers<[1], [0], [0], [1], [0, 0, 1, 1], [], []>} : vector<16x36xf32>, vector<36x392xf32>, vector<16x392xf32> -> vector<16x392xf32>
    %c0_3 = arith.constant 0 : index
    %c0_4 = arith.constant 0 : index
    %3 = vector.load %arg3[%c0_3, %c0_4] : memref<16x1xf32, #tpu.memory_space<vmem>>, vector<16x1xf32>
    %4 = vector.broadcast %3 : vector<16x1xf32> to vector<16x392xf32>
    %5 = arith.addf %2, %4 : vector<16x392xf32>
    %cst_5 = arith.constant 0.000000e+00 : f32
    %6 = vector.broadcast %cst_5 : f32 to vector<16x392xf32>
    %7 = arith.maximumf %5, %6 : vector<16x392xf32>
    %c0_6 = arith.constant 0 : index
    %c0_7 = arith.constant 0 : index
    %8 = vector.load %arg4[%c0_6, %c0_7] : memref<16x392xf32, #tpu.memory_space<vmem>>, vector<16x392xf32>
    tpu.vector_store %arg4[%c0_6, %c0_7], %7 {strides = array<i32>} : memref<16x392xf32, #tpu.memory_space<vmem>>, vector<16x392xf32>,
    return
  }
  func.func @transform_0(%arg0: i32) -> (i32, i32) {
    %c0_i32 = arith.constant 0 : i32
    %c0_i32_0 = arith.constant 0 : i32
    %c0_i32_1 = arith.constant 0 : i32
    return %c0_i32, %c0_i32_0 : i32, i32
  }
  func.func @transform_1(%arg0: i32) -> (i32, i32) {
    %c0_i32 = arith.constant 0 : i32
    %c0_i32_0 = arith.constant 0 : i32
    return %c0_i32, %arg0 : i32, i32
  }
  func.func @transform_2(%arg0: i32) -> (i32, i32) {
    %c0_i32 = arith.constant 0 : i32
    %c0_i32_0 = arith.constant 0 : i32
    %c0_i32_1 = arith.constant 0 : i32
    return %c0_i32, %c0_i32_0 : i32, i32
  }
  func.func @transform_3(%arg0: i32) -> (i32, i32) {
    %c0_i32 = arith.constant 0 : i32
    %c0_i32_0 = arith.constant 0 : i32
    return %c0_i32, %arg0 : i32, i32
  }
}

module attributes {stable_mosaic.version = 11 : i64} {
  func.func @_conv_mm_relu_kernel(%arg0: i32, %arg1: memref<16x144xf32, #tpu.memory_space<vmem>>, %arg2: memref<144x72xf32, #tpu.memory_space<vmem>>, %arg3: memref<16x1xf32, #tpu.memory_space<vmem>>, %arg4: memref<16x72xf32, #tpu.memory_space<vmem>>) attributes {dimension_semantics = [#tpu.dimension_semantics<parallel>], iteration_bounds = array<i64: 1>, scalar_prefetch = 0 : i64, scratch_operands = 0 : i64, tpu.core_type = #tpu.core_type<tc>, window_params = [{pipeline_mode = #tpu.pipeline_mode<synchronous>, transform_indices = @transform_0, window_bounds = array<i64: 16, 144>}, {transform_indices = @transform_1, window_bounds = array<i64: 144, 72>}, {pipeline_mode = #tpu.pipeline_mode<synchronous>, transform_indices = @transform_2, window_bounds = array<i64: 16, 1>}, {transform_indices = @transform_3, window_bounds = array<i64: 16, 72>}]} {
    %c0 = arith.constant 0 : index
    %c0_0 = arith.constant 0 : index
    %0 = vector.load %arg1[%c0, %c0_0] : memref<16x144xf32, #tpu.memory_space<vmem>>, vector<16x144xf32>
    %c0_1 = arith.constant 0 : index
    %c0_2 = arith.constant 0 : index
    %1 = vector.load %arg2[%c0_1, %c0_2] : memref<144x72xf32, #tpu.memory_space<vmem>>, vector<144x72xf32>
    %cst = arith.constant dense<0.000000e+00> : vector<16x72xf32>
    %2 = tpu.matmul %0, %1, %cst {dimension_numbers = #tpu.dot_dimension_numbers<[1], [0], [0], [1], [0, 0, 1, 1], [], []>} : vector<16x144xf32>, vector<144x72xf32>, vector<16x72xf32> -> vector<16x72xf32>
    %c0_3 = arith.constant 0 : index
    %c0_4 = arith.constant 0 : index
    %3 = vector.load %arg3[%c0_3, %c0_4] : memref<16x1xf32, #tpu.memory_space<vmem>>, vector<16x1xf32>
    %4 = vector.broadcast %3 : vector<16x1xf32> to vector<16x72xf32>
    %5 = arith.addf %2, %4 : vector<16x72xf32>
    %cst_5 = arith.constant 0.000000e+00 : f32
    %6 = vector.broadcast %cst_5 : f32 to vector<16x72xf32>
    %7 = arith.maximumf %5, %6 : vector<16x72xf32>
    %c0_6 = arith.constant 0 : index
    %c0_7 = arith.constant 0 : index
    %8 = vector.load %arg4[%c0_6, %c0_7] : memref<16x72xf32, #tpu.memory_space<vmem>>, vector<16x72xf32>
    tpu.vector_store %arg4[%c0_6, %c0_7], %7 {strides = array<i32>} : memref<16x72xf32, #tpu.memory_space<vmem>>, vector<16x72xf32>,
    return
  }
  func.func @transform_0(%arg0: i32) -> (i32, i32) {
    %c0_i32 = arith.constant 0 : i32
    %c0_i32_0 = arith.constant 0 : i32
    %c0_i32_1 = arith.constant 0 : i32
    return %c0_i32, %c0_i32_0 : i32, i32
  }
  func.func @transform_1(%arg0: i32) -> (i32, i32) {
    %c0_i32 = arith.constant 0 : i32
    %c0_i32_0 = arith.constant 0 : i32
    return %c0_i32, %arg0 : i32, i32
  }
  func.func @transform_2(%arg0: i32) -> (i32, i32) {
    %c0_i32 = arith.constant 0 : i32
    %c0_i32_0 = arith.constant 0 : i32
    %c0_i32_1 = arith.constant 0 : i32
    return %c0_i32, %c0_i32_0 : i32, i32
  }
  func.func @transform_3(%arg0: i32) -> (i32, i32) {
    %c0_i32 = arith.constant 0 : i32
    %c0_i32_0 = arith.constant 0 : i32
    return %c0_i32, %arg0 : i32, i32
  }
}

module attributes {stable_mosaic.version = 11 : i64} {
  func.func @_head_kernel(%arg0: memref<2x576xf32, #tpu.memory_space<vmem>>, %arg1: memref<2x128xf32, #tpu.memory_space<vmem>>, %arg2: memref<576x256xf32, #tpu.memory_space<vmem>>, %arg3: memref<128x256xf32, #tpu.memory_space<vmem>>, %arg4: memref<1x256xf32, #tpu.memory_space<vmem>>, %arg5: memref<256x5xf32, #tpu.memory_space<vmem>>, %arg6: memref<1x5xf32, #tpu.memory_space<vmem>>, %arg7: memref<2x4xf32, #tpu.memory_space<vmem>>, %arg8: memref<2x1xf32, #tpu.memory_space<vmem>>) attributes {dimension_semantics = [], scalar_prefetch = 0 : i64, scratch_operands = 0 : i64, tpu.core_type = #tpu.core_type<tc>} {
    %c0 = arith.constant 0 : index
    %c0_0 = arith.constant 0 : index
    %0 = vector.load %arg0[%c0, %c0_0] : memref<2x576xf32, #tpu.memory_space<vmem>>, vector<2x576xf32>
    %c0_1 = arith.constant 0 : index
    %c0_2 = arith.constant 0 : index
    %1 = vector.load %arg2[%c0_1, %c0_2] : memref<576x256xf32, #tpu.memory_space<vmem>>, vector<576x256xf32>
    %cst = arith.constant dense<0.000000e+00> : vector<2x256xf32>
    %2 = tpu.matmul %0, %1, %cst {dimension_numbers = #tpu.dot_dimension_numbers<[1], [0], [0], [1], [0, 0, 1, 1], [], []>} : vector<2x576xf32>, vector<576x256xf32>, vector<2x256xf32> -> vector<2x256xf32>
    %c0_3 = arith.constant 0 : index
    %c0_4 = arith.constant 0 : index
    %3 = vector.load %arg1[%c0_3, %c0_4] : memref<2x128xf32, #tpu.memory_space<vmem>>, vector<2x128xf32>
    %c0_5 = arith.constant 0 : index
    %c0_6 = arith.constant 0 : index
    %4 = vector.load %arg3[%c0_5, %c0_6] : memref<128x256xf32, #tpu.memory_space<vmem>>, vector<128x256xf32>
    %cst_7 = arith.constant dense<0.000000e+00> : vector<2x256xf32>
    %5 = tpu.matmul %3, %4, %cst_7 {dimension_numbers = #tpu.dot_dimension_numbers<[1], [0], [0], [1], [0, 0, 1, 1], [], []>} : vector<2x128xf32>, vector<128x256xf32>, vector<2x256xf32> -> vector<2x256xf32>
    %6 = arith.addf %2, %5 : vector<2x256xf32>
    %c0_8 = arith.constant 0 : index
    %c0_9 = arith.constant 0 : index
    %7 = vector.load %arg4[%c0_8, %c0_9] : memref<1x256xf32, #tpu.memory_space<vmem>>, vector<1x256xf32>
    %8 = vector.broadcast %7 : vector<1x256xf32> to vector<2x256xf32>
    %9 = arith.addf %6, %8 : vector<2x256xf32>
    %cst_10 = arith.constant 0.000000e+00 : f32
    %10 = vector.broadcast %cst_10 : f32 to vector<2x256xf32>
    %11 = arith.maximumf %9, %10 : vector<2x256xf32>
    %c0_11 = arith.constant 0 : index
    %c0_12 = arith.constant 0 : index
    %12 = vector.load %arg5[%c0_11, %c0_12] : memref<256x5xf32, #tpu.memory_space<vmem>>, vector<256x5xf32>
    %cst_13 = arith.constant dense<0.000000e+00> : vector<2x5xf32>
    %13 = tpu.matmul %11, %12, %cst_13 {dimension_numbers = #tpu.dot_dimension_numbers<[1], [0], [0], [1], [0, 0, 1, 1], [], []>} : vector<2x256xf32>, vector<256x5xf32>, vector<2x5xf32> -> vector<2x5xf32>
    %c0_14 = arith.constant 0 : index
    %c0_15 = arith.constant 0 : index
    %14 = vector.load %arg6[%c0_14, %c0_15] : memref<1x5xf32, #tpu.memory_space<vmem>>, vector<1x5xf32>
    %15 = vector.broadcast %14 : vector<1x5xf32> to vector<2x5xf32>
    %16 = arith.addf %13, %15 : vector<2x5xf32>
    %17 = vector.extract_strided_slice %16 {offsets = [0, 0], sizes = [2, 4], strides = [1, 1]} : vector<2x5xf32> to vector<2x4xf32>
    %c0_16 = arith.constant 0 : index
    %c0_17 = arith.constant 0 : index
    %18 = vector.load %arg7[%c0_16, %c0_17] : memref<2x4xf32, #tpu.memory_space<vmem>>, vector<2x4xf32>
    tpu.vector_store %arg7[%c0_16, %c0_17], %17 {strides = array<i32>} : memref<2x4xf32, #tpu.memory_space<vmem>>, vector<2x4xf32>,
    %19 = vector.extract_strided_slice %16 {offsets = [0, 4], sizes = [2, 1], strides = [1, 1]} : vector<2x5xf32> to vector<2x1xf32>
    %c0_18 = arith.constant 0 : index
    %c0_19 = arith.constant 0 : index
    %20 = vector.load %arg8[%c0_18, %c0_19] : memref<2x1xf32, #tpu.memory_space<vmem>>, vector<2x1xf32>
    tpu.vector_store %arg8[%c0_18, %c0_19], %19 {strides = array<i32>} : memref<2x1xf32, #tpu.memory_space<vmem>>, vector<2x1xf32>,
    return
  }
}

</mosaic_0001>

<bundles_post_ra>
// kernel: i2a_forward.6
= control target key start
LH: loop header
LB: loop body
LE: loop exit
PB: predicated region body
PF: predicated region fallthrough
CT: control target
= control target key end

     0   :  { %s2237_s12 = smov 0   ;;  %s2239_s13 = smov 0   ;;  %s3063_s0 = inlined_call_operand.vmem [shape: f32[16,36], index: 0, kind: input, shape index: {}]   ;;  %s3064_s1 = inlined_call_operand.vmem [shape: f32[36,4704], index: 1, kind: input, shape index: {}]   ;;  %s3065_s2 = inlined_call_operand.vmem [shape: f32[16,1], index: 2, kind: input, shape index: {}]   ;;  %s3066_s3 = inlined_call_operand.vmem [shape: f32[16,4704], index: 3, kind: output, shape index: {}]  }
   0x1   :  { %s2241_s14 = smov 0  }
   0x2 LB: > { %s2253_s15 = sadd.s32 4294967295, %s2081_s14   ;;  %s2256_s16 = sadd.s32 1, %s2081_s14   ;;  %s2081_s14 = sphi %s2241_s14, %s3098_s14   ;;  %s2077_s13 = sphi %s2239_s13, %s3097_s13   ;;  %s2073_s12 = sphi %s2237_s12, %s3096_s12  }
   0x3   : > { %s38_s17 = ssub.s32 %s2081_s14, %s2256_s16  ;;  %s41_s18 = sadd.s32 1, %s2077_s13 }
   0x4   : > { %p39_p0 = scmp.eq.s32.totalorder %s38_s17, 0  ;;  %p48_p1 = scmp.ne.s32.totalorder %s2077_s13, %s2073_s12 }
   0x5   : > { %p49_p2 = scmp.eq.s32.totalorder %s2081_s14, 0  ;;  %p99_p3 = scmp.eq.s32.totalorder %s2253_s15, 9 }
   0x6   : > { %s2266_s19 = scalar_select %p39_p0, %s2077_s13, %s41_s18  }
   0x7   : > { %p50_p4 = por %p49_p2, %p48_p1  ;;  %p2268_p5 = por %p99_p3, %p48_p1 }
   0x8   : > { %p1551_p6 = scmp.ge.s32.totalorder %s2081_s14, 10 }
   0xa   : > { %127 = sbr.rel (%p1551_p6) target bundleno = 162 (0xa2), region = 24 }
  0x11   : > { %130 = sbr.rel (!%p50_p4) target bundleno = 162 (0xa2), region = 28  ;;  %s132_s21 = sand.u32 (%p50_p4), 1, %s2077_s13  }
  0x12   : > { %s1552_s22 = sshll.u32 (%p50_p4), %s2081_s14, 2  ;;  %s1642_s23 = smul.u32 (%p50_p4), 160, %s132_s21 }
  0x13   : > { %s136_s24 = ssub.s32 (%p50_p4), 37, %s1552_s22  ;;  %s1616_s25 = sshll.u32 (%p50_p4), %s2081_s14, 5 }
  0x14   : > { %p137_p7 = scmp.lt.s32.totalorder (%p50_p4), %s136_s24, 4  ;;  %s2279_s28 = scalar_lea.vmem (%p50_p4), %s3064_s1, %s1616_s25  }
  0x15   : > { %s2283_s4 = scalar_lea.vmem (%p50_p4), [#allocation2], %s1642_s23  }
  0x18   : > { %s3100_s24 = smov (!%p137_p7, %s136_s24), 4 }
  0x19   : > { %s139_s29 = smul.u32 640, %s3100_s24  ;;  %s2281_s30 = sshll.u32 %s3100_s24, 3 }
  0x1b   : > { %p1556_p8 = scmp.eq.s32.totalorder %s139_s29, 0 }
  0x1c   : > { %p147_p9 = scmp.lt.u32.totalorder (!%p1556_p8), %s2281_s30, 8 }
  0x1d   : > { %146 = sbr.rel (%p1556_p8) target bundleno = 162 (0xa2), region = 32 }
  0x24   : > { %150 = sbr.rel (%p147_p9) target bundleno = 153 (0x99), region = 36  ;;  %s2287_s5 = sand.u32 (!%p147_p9), 7, %s2281_s30  }
  0x25   : > { %p174_p10 = scmp.eq.s32.totalorder (!%p147_p9), %s2287_s5, 0  ;;  %p1557_p11 = scmp.ne.s32.totalorder (!%p147_p9), %s2287_s5, 0 }
  0x2b   : > { %177 = sbr.rel (%p1557_p11) target bundleno = 94 (0x5e), region = 51  ;;  %s178_s6 = sshrl.u32 (!%p1557_p11), %s2281_s30, 3 }
  0x2c   : > { %s2294_s7 = sshrl.u32 (!%p1557_p11), %s178_s6, 4 }
  0x2d   : > { %p1558_p12 = scmp.le.s32.totalorder (!%p1557_p11), %s2294_s7, 0 }
  0x32   : > { %1421 = sbr.rel (%p1558_p12) target bundleno = 74 (0x4a), region = 229  ;;  %s3068_s8 = smov (!%p1558_p12), %s2283_s4 }
  0x33   : > { %s3069_s9 = smov (!%p1558_p12), %s2279_s28  ;;  %s2303_s10 = smov (!%p1558_p12), 0  }
  0x34   : > { %s2305_s11 = smov (!%p1558_p12), 0  }
  0x39 LB: >> { %v191_v0 = vld [vmem:[%s2089_s9] sm:$0xff]  ;;  %v193_v1 = vld [vmem:[%s2089_s9 + $0x8] sm:$0xff]  ;;  %v195_v2 = vld [vmem:[%s2089_s9 + $0x10] sm:$0xff]  ;;  %s351_s17 = sadd.s32 1, %s2093_s10  ;;  %s185_s11 = sadd.s32 1, %s2097_s11   ;;  %s2097_s11 = sphi %s2305_s11, %s185_s11   ;;  %s2093_s10 = sphi %s2303_s10, %s3072_s10   ;;  %s2089_s9 = sphi %s3069_s9, %s3071_s9   ;;  %s2085_s8 = sphi %s3068_s8, %s3070_s8  }
  0x3a   : >> { %192 = vst [vmem:[%s2085_s8] sm:$0xff] %v191_v0  ;;  %194 = vst [vmem:[%s2085_s8 + $0x8] sm:$0xff] %v193_v1  ;;  %v197_v3 = vld [vmem:[%s2089_s9 + $0x18] sm:$0xff]  ;;  %v223_v4 = vld [vmem:[%s2089_s9 + $0x128] sm:$0xff]  ;;  %p352_p13 = scmp.ge.s32.totalorder %s351_s17, %s2294_s7  ;;  %p184_p0 = scmp.ge.s32.totalorder %s185_s11, %s2294_s7 }
  0x3b   : >> { %196 = vst [vmem:[%s2085_s8 + $0x10] sm:$0xff] %v195_v2  ;;  %v225_v5 = vld [vmem:[%s2089_s9 + $0x130] sm:$0xff]  ;;  %198 = vst [vmem:[%s2085_s8 + $0x18] sm:$0xff] %v197_v3  ;;  %v227_v6 = vld [vmem:[%s2089_s9 + $0x138] sm:$0xff] }
  0x3c   : >> { %224 = vst [vmem:[%s2085_s8 + $0x20] sm:$0xff] %v223_v4  ;;  %226 = vst [vmem:[%s2085_s8 + $0x28] sm:$0xff] %v225_v5  ;;  %v229_v7 = vld [vmem:[%s2089_s9 + $0x140] sm:$0xff]  ;;  %v255_v8 = vld [vmem:[%s2089_s9 + $0x250] sm:$0xff]  ;;  %s3102_s17 = smov (%p352_p13, %s351_s17), 0 }
  0x3d   : >> { %228 = vst [vmem:[%s2085_s8 + $0x30] sm:$0xff] %v227_v6  ;;  %230 = vst [vmem:[%s2085_s8 + $0x38] sm:$0xff] %v229_v7  ;;  %v257_v9 = vld [vmem:[%s2089_s9 + $0x258] sm:$0xff]  ;;  %v259_v10 = vld [vmem:[%s2089_s9 + $0x260] sm:$0xff]  ;;  %s1559_s18 = sshll.u32 %s3102_s17, 7  ;;  %s3072_s10 = smov %s3102_s17 }
  0x3e   : >> { %256 = vst [vmem:[%s2085_s8 + $0x40] sm:$0xff] %v255_v8  ;;  %v261_v11 = vld [vmem:[%s2089_s9 + $0x268] sm:$0xff]  ;;  %258 = vst [vmem:[%s2085_s8 + $0x48] sm:$0xff] %v257_v9  ;;  %v287_v12 = vld [vmem:[%s2089_s9 + $0x378] sm:$0xff]  ;;  %s356_s21 = scalar_lea.vmem %s2279_s28, %s1559_s18   ;;  %s357_s22 = scalar_lea.vmem %s2283_s4, %s1559_s18 [#allocation2]  }
  0x3f   : >> { %260 = vst [vmem:[%s2085_s8 + $0x50] sm:$0xff] %v259_v10  ;;  %262 = vst [vmem:[%s2085_s8 + $0x58] sm:$0xff] %v261_v11  ;;  %v289_v13 = vld [vmem:[%s2089_s9 + $0x380] sm:$0xff]  ;;  %v291_v14 = vld [vmem:[%s2089_s9 + $0x388] sm:$0xff] }
  0x40   : >> { %288 = vst [vmem:[%s2085_s8 + $0x60] sm:$0xff] %v287_v12  ;;  %290 = vst [vmem:[%s2085_s8 + $0x68] sm:$0xff] %v289_v13  ;;  %v293_v15 = vld [vmem:[%s2089_s9 + $0x390] sm:$0xff]  ;;  %v319_v16 = vld [vmem:[%s2089_s9 + $0x4a0] sm:$0xff] }
  0x41   : >> { %292 = vst [vmem:[%s2085_s8 + $0x70] sm:$0xff] %v291_v14  ;;  %v321_v17 = vld [vmem:[%s2089_s9 + $0x4a8] sm:$0xff]  ;;  %294 = vst [vmem:[%s2085_s8 + $0x78] sm:$0xff] %v293_v15  ;;  %v323_v18 = vld [vmem:[%s2089_s9 + $0x4b0] sm:$0xff] }
  0x42   : >> { %320 = vst [vmem:[%s2085_s8 + $0x80] sm:$0xff] %v319_v16  ;;  %322 = vst [vmem:[%s2085_s8 + $0x88] sm:$0xff] %v321_v17  ;;  %v325_v19 = vld [vmem:[%s2089_s9 + $0x4b8] sm:$0xff]  ;;  %v327_v20 = vld [vmem:[%s2089_s9 + $0x4c0] sm:$0xff] }
  0x43   : >> { %324 = vst [vmem:[%s2085_s8 + $0x90] sm:$0xff] %v323_v18  ;;  %326 = vst [vmem:[%s2085_s8 + $0x98] sm:$0xff] %v325_v19  ;;  %v329_v21 = vld [vmem:[%s2089_s9 + $0x4c8] sm:$0xff]  ;;  %v331_v22 = vld [vmem:[%s2089_s9 + $0x4d0] sm:$0xff]  ;;  %187 = sbr.rel (!%p184_p0) target bundleno = 57 (0x39), region = 235 }
  0x44   : >> { %328 = vst [vmem:[%s2085_s8 + $0xa0] sm:$0xff] %v327_v20  ;;  %v333_v23 = vld [vmem:[%s2089_s9 + $0x4d8] sm:$0xff]  ;;  %330 = vst [vmem:[%s2085_s8 + $0xa8] sm:$0xff] %v329_v21  ;;  %v335_v24 = vld [vmem:[%s2089_s9 + $0x4e0] sm:$0xff] }
  0x45   : >> { %332 = vst [vmem:[%s2085_s8 + $0xb0] sm:$0xff] %v331_v22  ;;  %334 = vst [vmem:[%s2085_s8 + $0xb8] sm:$0xff] %v333_v23  ;;  %v337_v25 = vld [vmem:[%s2089_s9 + $0x4e8] sm:$0xff]  ;;  %v339_v26 = vld [vmem:[%s2089_s9 + $0x4f0] sm:$0xff] }
  0x46   : >> { %336 = vst [vmem:[%s2085_s8 + $0xc0] sm:$0xff] %v335_v24  ;;  %338 = vst [vmem:[%s2085_s8 + $0xc8] sm:$0xff] %v337_v25  ;;  %v341_v27 = vld [vmem:[%s2089_s9 + $0x4f8] sm:$0xff]  ;;  %v343_v28 = vld [vmem:[%s2089_s9 + $0x500] sm:$0xff] }
  0x47   : >> { %340 = vst [vmem:[%s2085_s8 + $0xd0] sm:$0xff] %v339_v26  ;;  %v345_v29 = vld [vmem:[%s2089_s9 + $0x508] sm:$0xff]  ;;  %342 = vst [vmem:[%s2085_s8 + $0xd8] sm:$0xff] %v341_v27  ;;  %v347_v30 = vld [vmem:[%s2089_s9 + $0x510] sm:$0xff] }
  0x48   : >> { %344 = vst [vmem:[%s2085_s8 + $0xe0] sm:$0xff] %v343_v28  ;;  %346 = vst [vmem:[%s2085_s8 + $0xe8] sm:$0xff] %v345_v29  ;;  %v349_v31 = vld [vmem:[%s2089_s9 + $0x518] sm:$0xff]  ;;  %s3071_s9 = smov %s356_s21 }
  0x49   : >> { %348 = vst [vmem:[%s2085_s8 + $0xf0] sm:$0xff] %v347_v30  ;;  %350 = vst [vmem:[%s2085_s8 + $0xf8] sm:$0xff] %v349_v31  ;;  %s3070_s8 = smov %s357_s22 }
  0x4a PF: > { %s2403_s23 = sand.u32 15, %s178_s6   ;;  %s1617_s24 = sshll.u32 %s2294_s7, 11 }
  0x4b   : > { %s362_s25 = sshra.s32 %s1617_s24, 4  ;;  %p1564_p1 = scmp.le.s32.totalorder %s2403_s23, 0 }
  0x4c   : > { %s2407_s26 = scalar_lea.vmem %s2279_s28, %s362_s25   ;;  %s2410_s27 = scalar_lea.vmem %s2283_s4, %s362_s25 [#allocation2]  }
  0x4d   : > { %1435 = sbr.rel (%p1564_p1) target bundleno = 94 (0x5e), region = 240  ;;  %s3073_s29 = smov (!%p1564_p1), %s2410_s27 }
  0x4e   : > { %s3074_s8 = smov (!%p1564_p1), %s2407_s26  ;;  %s2419_s9 = smov (!%p1564_p1), 0  }
  0x4f   : > { %s2421_s10 = smov (!%p1564_p1), 0  }
  0x54 LB: >> { %v378_v32 = vld [vmem:[%s2105_s8] sm:$0xff]  ;;  %v380_v33 = vld [vmem:[%s2105_s8 + $0x128] sm:$0xff]  ;;  %v382_v34 = vld [vmem:[%s2105_s8 + $0x250] sm:$0xff]  ;;  %s388_s6 = sadd.s32 1, %s2109_s9  ;;  %s372_s10 = sadd.s32 1, %s2113_s10   ;;  %s2113_s10 = sphi %s2421_s10, %s372_s10   ;;  %s2109_s9 = sphi %s2419_s9, %s3075_s9   ;;  %s2105_s8 = sphi %s3074_s8, %s393_s8   ;;  %s2101_s29 = sphi %s3073_s29, %s394_s29  }
  0x55   : >> { %379 = vst [vmem:[%s2101_s29] sm:$0xff] %v378_v32  ;;  %381 = vst [vmem:[%s2101_s29 + $0x20] sm:$0xff] %v380_v33  ;;  %v384_v35 = vld [vmem:[%s2105_s8 + $0x378] sm:$0xff]  ;;  %v386_v36 = vld [vmem:[%s2105_s8 + $0x4a0] sm:$0xff]  ;;  %p389_p2 = scmp.ge.s32.totalorder %s388_s6, %s2403_s23  ;;  %p371_p3 = scmp.ge.s32.totalorder %s372_s10, %s2403_s23 }
  0x56   : >> { %383 = vst [vmem:[%s2101_s29 + $0x40] sm:$0xff] %v382_v34  ;;  %385 = vst [vmem:[%s2101_s29 + $0x60] sm:$0xff] %v384_v35 }
  0x57   : >> { %387 = vst [vmem:[%s2101_s29 + $0x80] sm:$0xff] %v386_v36  ;;  %s3104_s6 = smov (%p389_p2, %s388_s6), 0  ;;  %374 = sbr.rel (!%p371_p3) target bundleno = 84 (0x54), region = 246 }
  0x58   : >> { %s1565_s7 = sshll.u32 %s3104_s6, 3  ;;  %s3075_s9 = smov %s3104_s6 }
  0x59   : >> { %s393_s8 = scalar_lea.vmem %s2407_s26, %s1565_s7   ;;  %s394_s29 = scalar_lea.vmem %s2410_s27, %s1565_s7 [#allocation2]  }
  0x5e PF: > { %397 = sbr.rel (%p174_p10) target bundleno = 153 (0x99), region = 69  ;;  %s399_s11 = ssub.s32 (!%p174_p10), %s2281_s30, %s2287_s5 }
  0x5f   : > { %s403_s17 = sshrl.u32 (!%p174_p10), %s2281_s30, 3  ;;  %s2445_s18 = scalar_lea.vmem (!%p174_p10), %s2279_s28, %s399_s11 }
  0x60   : > { %s2448_s21 = scalar_lea.vmem (!%p174_p10), %s2283_s4, %s399_s11 [#allocation2]  ;;  %s2452_s22 = sshrl.u32 (!%p174_p10), %s403_s17, 4 }
  0x61   : > { %p1567_p4 = scmp.le.s32.totalorder (!%p174_p10), %s2452_s22, 0 }
  0x65   : > { %1449 = sbr.rel (%p1567_p4) target bundleno = 125 (0x7d), region = 251  ;;  %s3076_s23 = smov (!%p1567_p4), %s2283_s4 }
  0x66   : > { %s3077_s24 = smov (!%p1567_p4), %s2279_s28  ;;  %s2461_s25 = smov (!%p1567_p4), 0  }
  0x67   : > { %s2463_s26 = smov (!%p1567_p4), 0  }
  0x6c LB: >> { %v416_v37 = vld [vmem:[%s2121_s24] sm:$0xff]  ;;  %v418_v38 = vld [vmem:[%s2121_s24 + $0x8] sm:$0xff]  ;;  %v420_v39 = vld [vmem:[%s2121_s24 + $0x10] sm:$0xff]  ;;  %s576_s27 = sadd.s32 1, %s2125_s25  ;;  %s410_s26 = sadd.s32 1, %s2129_s26   ;;  %s2129_s26 = sphi %s2463_s26, %s410_s26   ;;  %s2125_s25 = sphi %s2461_s25, %s3080_s25   ;;  %s2121_s24 = sphi %s3077_s24, %s3079_s24   ;;  %s2117_s23 = sphi %s3076_s23, %s3078_s23  }
  0x6d   : >> { %417 = vst [vmem:[%s2117_s23] sm:$0xff] %v416_v37  ;;  %419 = vst [vmem:[%s2117_s23 + $0x8] sm:$0xff] %v418_v38  ;;  %v422_v40 = vld [vmem:[%s2121_s24 + $0x18] sm:$0xff]  ;;  %v448_v41 = vld [vmem:[%s2121_s24 + $0x128] sm:$0xff]  ;;  %p577_p6 = scmp.ge.s32.totalorder %s576_s27, %s2452_s22  ;;  %p409_p7 = scmp.ge.s32.totalorder %s410_s26, %s2452_s22 }
  0x6e   : >> { %421 = vst [vmem:[%s2117_s23 + $0x10] sm:$0xff] %v420_v39  ;;  %v450_v42 = vld [vmem:[%s2121_s24 + $0x130] sm:$0xff]  ;;  %423 = vst [vmem:[%s2117_s23 + $0x18] sm:$0xff] %v422_v40  ;;  %v452_v43 = vld [vmem:[%s2121_s24 + $0x138] sm:$0xff] }
  0x6f   : >> { %449 = vst [vmem:[%s2117_s23 + $0x20] sm:$0xff] %v448_v41  ;;  %451 = vst [vmem:[%s2117_s23 + $0x28] sm:$0xff] %v450_v42  ;;  %v454_v44 = vld [vmem:[%s2121_s24 + $0x140] sm:$0xff]  ;;  %v480_v45 = vld [vmem:[%s2121_s24 + $0x250] sm:$0xff]  ;;  %s3106_s27 = smov (%p577_p6, %s576_s27), 0 }
  0x70   : >> { %453 = vst [vmem:[%s2117_s23 + $0x30] sm:$0xff] %v452_v43  ;;  %455 = vst [vmem:[%s2117_s23 + $0x38] sm:$0xff] %v454_v44  ;;  %v482_v46 = vld [vmem:[%s2121_s24 + $0x258] sm:$0xff]  ;;  %v484_v47 = vld [vmem:[%s2121_s24 + $0x260] sm:$0xff]  ;;  %s1568_s29 = sshll.u32 %s3106_s27, 7  ;;  %s3080_s25 = smov %s3106_s27 }
  0x71   : >> { %481 = vst [vmem:[%s2117_s23 + $0x40] sm:$0xff] %v480_v45  ;;  %v486_v48 = vld [vmem:[%s2121_s24 + $0x268] sm:$0xff]  ;;  %483 = vst [vmem:[%s2117_s23 + $0x48] sm:$0xff] %v482_v46  ;;  %v512_v49 = vld [vmem:[%s2121_s24 + $0x378] sm:$0xff]  ;;  %s581_s8 = scalar_lea.vmem %s2279_s28, %s1568_s29   ;;  %s582_s9 = scalar_lea.vmem %s2283_s4, %s1568_s29 [#allocation2]  }
  0x72   : >> { %485 = vst [vmem:[%s2117_s23 + $0x50] sm:$0xff] %v484_v47  ;;  %487 = vst [vmem:[%s2117_s23 + $0x58] sm:$0xff] %v486_v48  ;;  %v514_v50 = vld [vmem:[%s2121_s24 + $0x380] sm:$0xff]  ;;  %v516_v51 = vld [vmem:[%s2121_s24 + $0x388] sm:$0xff] }
  0x73   : >> { %513 = vst [vmem:[%s2117_s23 + $0x60] sm:$0xff] %v512_v49  ;;  %515 = vst [vmem:[%s2117_s23 + $0x68] sm:$0xff] %v514_v50  ;;  %v518_v52 = vld [vmem:[%s2121_s24 + $0x390] sm:$0xff]  ;;  %v544_v53 = vld [vmem:[%s2121_s24 + $0x4a0] sm:$0xff] }
  0x74   : >> { %517 = vst [vmem:[%s2117_s23 + $0x70] sm:$0xff] %v516_v51  ;;  %v546_v54 = vld [vmem:[%s2121_s24 + $0x4a8] sm:$0xff]  ;;  %519 = vst [vmem:[%s2117_s23 + $0x78] sm:$0xff] %v518_v52  ;;  %v548_v55 = vld [vmem:[%s2121_s24 + $0x4b0] sm:$0xff] }
  0x75   : >> { %545 = vst [vmem:[%s2117_s23 + $0x80] sm:$0xff] %v544_v53  ;;  %547 = vst [vmem:[%s2117_s23 + $0x88] sm:$0xff] %v546_v54  ;;  %v550_v56 = vld [vmem:[%s2121_s24 + $0x4b8] sm:$0xff]  ;;  %v552_v57 = vld [vmem:[%s2121_s24 + $0x4c0] sm:$0xff] }
  0x76   : >> { %549 = vst [vmem:[%s2117_s23 + $0x90] sm:$0xff] %v548_v55  ;;  %551 = vst [vmem:[%s2117_s23 + $0x98] sm:$0xff] %v550_v56  ;;  %v554_v58 = vld [vmem:[%s2121_s24 + $0x4c8] sm:$0xff]  ;;  %v556_v59 = vld [vmem:[%s2121_s24 + $0x4d0] sm:$0xff]  ;;  %412 = sbr.rel (!%p409_p7) target bundleno = 108 (0x6c), region = 257 }
  0x77   : >> { %553 = vst [vmem:[%s2117_s23 + $0xa0] sm:$0xff] %v552_v57  ;;  %v558_v60 = vld [vmem:[%s2121_s24 + $0x4d8] sm:$0xff]  ;;  %555 = vst [vmem:[%s2117_s23 + $0xa8] sm:$0xff] %v554_v58  ;;  %v560_v61 = vld [vmem:[%s2121_s24 + $0x4e0] sm:$0xff] }
  0x78   : >> { %557 = vst [vmem:[%s2117_s23 + $0xb0] sm:$0xff] %v556_v59  ;;  %559 = vst [vmem:[%s2117_s23 + $0xb8] sm:$0xff] %v558_v60  ;;  %v562_v62 = vld [vmem:[%s2121_s24 + $0x4e8] sm:$0xff]  ;;  %v564_v63 = vld [vmem:[%s2121_s24 + $0x4f0] sm:$0xff] }
  0x79   : >> { %561 = vst [vmem:[%s2117_s23 + $0xc0] sm:$0xff] %v560_v61  ;;  %563 = vst [vmem:[%s2117_s23 + $0xc8] sm:$0xff] %v562_v62  ;;  %v566_v0 = vld [vmem:[%s2121_s24 + $0x4f8] sm:$0xff]  ;;  %v568_v1 = vld [vmem:[%s2121_s24 + $0x500] sm:$0xff] }
  0x7a   : >> { %565 = vst [vmem:[%s2117_s23 + $0xd0] sm:$0xff] %v564_v63  ;;  %v570_v2 = vld [vmem:[%s2121_s24 + $0x508] sm:$0xff]  ;;  %567 = vst [vmem:[%s2117_s23 + $0xd8] sm:$0xff] %v566_v0  ;;  %v572_v3 = vld [vmem:[%s2121_s24 + $0x510] sm:$0xff] }
  0x7b   : >> { %569 = vst [vmem:[%s2117_s23 + $0xe0] sm:$0xff] %v568_v1  ;;  %571 = vst [vmem:[%s2117_s23 + $0xe8] sm:$0xff] %v570_v2  ;;  %v574_v4 = vld [vmem:[%s2121_s24 + $0x518] sm:$0xff]  ;;  %s3079_s24 = smov %s581_s8 }
  0x7c   : >> { %573 = vst [vmem:[%s2117_s23 + $0xf0] sm:$0xff] %v572_v3  ;;  %575 = vst [vmem:[%s2117_s23 + $0xf8] sm:$0xff] %v574_v4  ;;  %s3078_s23 = smov %s582_s9 }
  0x7d PF: > { %s2561_s10 = sand.u32 15, %s403_s17   ;;  %s1619_s6 = sshll.u32 %s2452_s22, 11 }
  0x7e   : > { %s587_s7 = sshra.s32 %s1619_s6, 4  ;;  %p1573_p8 = scmp.le.s32.totalorder %s2561_s10, 0 }
  0x7f   : > { %s2565_s11 = scalar_lea.vmem %s2279_s28, %s587_s7   ;;  %s2568_s29 = scalar_lea.vmem %s2283_s4, %s587_s7 [#allocation2]  }
  0x80   : > { %1463 = sbr.rel (%p1573_p8) target bundleno = 145 (0x91), region = 262  ;;  %s3081_s23 = smov (!%p1573_p8), %s2568_s29 }
  0x81   : > { %s3082_s24 = smov (!%p1573_p8), %s2565_s11  ;;  %s2577_s25 = smov (!%p1573_p8), 0  }
  0x82   : > { %s2579_s26 = smov (!%p1573_p8), 0  }
  0x87 LB: >> { %v603_v5 = vld [vmem:[%s2137_s24] sm:$0xff]  ;;  %v605_v6 = vld [vmem:[%s2137_s24 + $0x128] sm:$0xff]  ;;  %v607_v7 = vld [vmem:[%s2137_s24 + $0x250] sm:$0xff]  ;;  %s613_s17 = sadd.s32 1, %s2141_s25  ;;  %s597_s26 = sadd.s32 1, %s2145_s26   ;;  %s2145_s26 = sphi %s2579_s26, %s597_s26   ;;  %s2141_s25 = sphi %s2577_s25, %s3083_s25   ;;  %s2137_s24 = sphi %s3082_s24, %s618_s24   ;;  %s2133_s23 = sphi %s3081_s23, %s619_s23  }
  0x88   : >> { %604 = vst [vmem:[%s2133_s23] sm:$0xff] %v603_v5  ;;  %606 = vst [vmem:[%s2133_s23 + $0x20] sm:$0xff] %v605_v6  ;;  %v609_v8 = vld [vmem:[%s2137_s24 + $0x378] sm:$0xff]  ;;  %v611_v9 = vld [vmem:[%s2137_s24 + $0x4a0] sm:$0xff]  ;;  %p614_p9 = scmp.ge.s32.totalorder %s613_s17, %s2561_s10  ;;  %p596_p10 = scmp.ge.s32.totalorder %s597_s26, %s2561_s10 }
  0x89   : >> { %608 = vst [vmem:[%s2133_s23 + $0x40] sm:$0xff] %v607_v7  ;;  %610 = vst [vmem:[%s2133_s23 + $0x60] sm:$0xff] %v609_v8 }
  0x8a   : >> { %612 = vst [vmem:[%s2133_s23 + $0x80] sm:$0xff] %v611_v9  ;;  %s3108_s17 = smov (%p614_p9, %s613_s17), 0  ;;  %599 = sbr.rel (!%p596_p10) target bundleno = 135 (0x87), region = 268 }
  0x8b   : >> { %s1574_s22 = sshll.u32 %s3108_s17, 3  ;;  %s3083_s25 = smov %s3108_s17 }
  0x8c   : >> { %s618_s24 = scalar_lea.vmem %s2565_s11, %s1574_s22   ;;  %s619_s23 = scalar_lea.vmem %s2568_s29, %s1574_s22 [#allocation2]  }
  0x91 PF: > { %s2211_s27 = smov 0  }
  0x92   : > { %s620_s8 = sshllo.u32 %s2211_s27, %s2287_s5 }
  0x93   : > { %v629_v10 = vld [vmem:[%s2445_s18] sm:%s620_s8]  ;;  %v631_v11 = vld [vmem:[%s2445_s18 + $0x128] sm:%s620_s8] }
  0x94   : > { %630 = vst [vmem:[%s2448_s21] sm:%s620_s8] %v629_v10  ;;  %632 = vst [vmem:[%s2448_s21 + $0x20] sm:%s620_s8] %v631_v11 }
  0x95   : > { %v633_v12 = vld [vmem:[%s2445_s18 + $0x250] sm:%s620_s8]  ;;  %v635_v13 = vld [vmem:[%s2445_s18 + $0x378] sm:%s620_s8] }
  0x96   : > { %634 = vst [vmem:[%s2448_s21 + $0x40] sm:%s620_s8] %v633_v12  ;;  %636 = vst [vmem:[%s2448_s21 + $0x60] sm:%s620_s8] %v635_v13 }
  0x97   : > { %v637_v14 = vld [vmem:[%s2445_s18 + $0x4a0] sm:%s620_s8] }
  0x98   : > { %638 = vst [vmem:[%s2448_s21 + $0x80] sm:%s620_s8] %v637_v14 }
  0x99 PF: > { %p1576_p11 = scmp.ge.u32.totalorder %s2281_s30, 8 }
  0x9a   : > { %s2212_s9 = smov (!%p1576_p11), 0  }
  0x9b   : > { %153 = sbr.rel (%p1576_p11) target bundleno = 162 (0xa2), region = 40  ;;  %s154_s5 = sshllo.u32 (!%p1576_p11), %s2212_s9, %s2281_s30 }
  0x9c   : > { %v163_v15 = vld [vmem:[%s2279_s28] sm:%s154_s5] (!%p1576_p11)  ;;  %v165_v16 = vld [vmem:[%s2279_s28 + $0x128] sm:%s154_s5] (!%p1576_p11) }
  0x9d   : > { %164 = vst [vmem:[%s2283_s4] sm:%s154_s5] (!%p1576_p11), %v163_v15  ;;  %166 = vst [vmem:[%s2283_s4 + $0x20] sm:%s154_s5] (!%p1576_p11), %v165_v16 }
  0x9e   : > { %v167_v17 = vld [vmem:[%s2279_s28 + $0x250] sm:%s154_s5] (!%p1576_p11)  ;;  %v169_v18 = vld [vmem:[%s2279_s28 + $0x378] sm:%s154_s5] (!%p1576_p11) }
  0x9f   : > { %168 = vst [vmem:[%s2283_s4 + $0x40] sm:%s154_s5] (!%p1576_p11), %v167_v17  ;;  %170 = vst [vmem:[%s2283_s4 + $0x60] sm:%s154_s5] (!%p1576_p11), %v169_v18 }
  0xa0   : > { %v171_v19 = vld [vmem:[%s2279_s28 + $0x4a0] sm:%s154_s5] (!%p1576_p11) }
  0xa1   : > { %172 = vst [vmem:[%s2283_s4 + $0x80] sm:%s154_s5] (!%p1576_p11), %v171_v19 }
  0xa2 PF: > { %p1577_p12 = scmp.ge.s32.totalorder %s2081_s14, 1  ;;  %p641_p13 = scmp.lt.s32.totalorder %s2081_s14, 11 }
  0xa4   : > { %p642_p0 = pnand %p1577_p12, %p641_p13 }
  0xa5   : > { %s648_s30 = sand.u32 (!%p642_p0), 1, %s2073_s12   ;;  %v2213_v20 = vmov (!%p642_p0), 0.0   ;;  %v702_v21 = vld [vmem:[%s3065_s2] sm:$0xff] (!%p642_p0)  ;;  %v2214_v22 = vmov (!%p642_p0), 0   ;;  %v703_v23 = vld [vmem:[%s3065_s2 + $0x8] sm:$0xff] (!%p642_p0)  ;;  %vm721_vm0 = vcmask (!%p642_p0), 1043456  }
  0xa6   : > { %645 = sbr.rel (%p642_p0) target bundleno = 573 (0x23d), region = 94  ;;  %798 = vmatprep.mubr.f32.mxu0 (!%p642_p0), %v2213_v20  ;;  %875 = vmatprep.mubr.f32.mxu1 (!%p642_p0), %v2213_v20  ;;  %v680_v52 = vld [vmem:[%s3063_s0] sm:$0xff] (!%p642_p0)  ;;  %vm714_vm1 = vcmask (!%p642_p0), 293888   ;;  %v681_v53 = vld [vmem:[%s3063_s0 + $0x8] sm:$0xff] (!%p642_p0)  ;;  %s1578_s23 = sshll.u32 (!%p642_p0), %s648_s30, 6 }
  0xa7   : > { %s1643_s18 = smul.u32 (!%p642_p0), 160, %s648_s30  ;;  %1930 = vset.pattern.permute.xlu0 (!%p642_p0), %v2214_v22  ;;  %s2661_s24 = scalar_lea.vmem (!%p642_p0), [#allocation3], %s1578_s23  }
  0xa8   : > { %706 = vperm.xlu0 (!%p642_p0), %1930, %v702_v21  }
  0xa9   : > { %s2631_s14 = scalar_lea.vmem (!%p642_p0), [#allocation2], %s1643_s18 }
  0xaa   : > { %v683_v24 = vld [vmem:[%s2631_s14 + $0x8] sm:$0xff] (!%p642_p0)  ;;  %v685_v26 = vld [vmem:[%s2631_s14 + $0x18] sm:$0xff] (!%p642_p0)  ;;  %v682_v29 = vld [vmem:[%s2631_s14] sm:$0xff] (!%p642_p0) }
  0xab   : > { %v687_v25 = vld [vmem:[%s2631_s14 + $0x28] sm:$0xff] (!%p642_p0)  ;;  %v689_v28 = vld [vmem:[%s2631_s14 + $0x38] sm:$0xff] (!%p642_p0)  ;;  %v686_v30 = vld [vmem:[%s2631_s14 + $0x20] sm:$0xff] (!%p642_p0) }
  0xac   : > { %v1626_v27 = vpack.c.bf16 (!%p642_p0), %v687_v25, %v683_v24  ;;  %v1634_v31 = vpack.c.bf16 (!%p642_p0), %v689_v28, %v685_v26  ;;  %v1628_v32 = vpack.c.bf16 (!%p642_p0), %v686_v30, %v682_v29  ;;  %v684_v33 = vld [vmem:[%s2631_s14 + $0x10] sm:$0xff] (!%p642_p0)  ;;  %v691_v35 = vld [vmem:[%s2631_s14 + $0x48] sm:$0xff] (!%p642_p0)  ;;  %v693_v38 = vld [vmem:[%s2631_s14 + $0x58] sm:$0xff] (!%p642_p0)  ;;  %711 = vperm.xlu0 (!%p642_p0), %1930, %v703_v23  }
  0xad   : > { %v688_v34 = vld [vmem:[%s2631_s14 + $0x30] sm:$0xff]  ;;  %v695_v37 = vld [vmem:[%s2631_s14 + $0x68] sm:$0xff]  ;;  %v697_v39 = vld [vmem:[%s2631_s14 + $0x78] sm:$0xff]  ;;  %s1588_s12 = sshll.u32 (%p2268_p5), %s2253_s15, 2  ;;  %s1621_s25 = sshll.u32 (%p2268_p5), %s2253_s15, 5 }
  0xae   : > { %1627 = vmatprep.subr.bf16.mxu0 %v1626_v27  ;;  %v1636_v36 = vpack.c.bf16 %v688_v34, %v684_v33  ;;  %1635 = vmatprep.subr.bf16.mxu1 %v1634_v31  ;;  %v1630_v40 = vpack.c.bf16 %v695_v37, %v691_v35  ;;  %v1638_v41 = vpack.c.bf16 %v697_v39, %v693_v38  ;;  %v690_v42 = vld [vmem:[%s2631_s14 + $0x40] sm:$0xff]  ;;  %v692_v44 = vld [vmem:[%s2631_s14 + $0x50] sm:$0xff]  ;;  %v699_v48 = vld [vmem:[%s2631_s14 + $0x88] sm:$0xf]  ;;  %s912_s26 = ssub.s32 (%p2268_p5), 37, %s1588_s12  ;;  %s2678_s27 = scalar_lea.vmem (%p2268_p5), %s3066_s3, %s1621_s25  }
  0xaf   : > { %1629 = vmatpush1.bf16.msra.mxu0 %v1628_v32  ;;  %v694_v43 = vld [vmem:[%s2631_s14 + $0x60] sm:$0xff]  ;;  %v696_v46 = vld [vmem:[%s2631_s14 + $0x70] sm:$0xff]  ;;  %v701_v49 = vld [vmem:[%s2631_s14 + $0x98] sm:$0xf]  ;;  %p913_p1 = scmp.lt.s32.totalorder (%p2268_p5), %s912_s26, 4 }
  0xb0   : > { %1637 = vmatpush1.bf16.msra.mxu1 %v1636_v36  ;;  %v1632_v45 = vpack.c.bf16 %v694_v43, %v690_v42  ;;  %1631 = vmatprep.subr.bf16.mxu0 %v1630_v40  ;;  %v1640_v47 = vpack.c.bf16 %v696_v46, %v692_v44  ;;  %v698_v50 = vld [vmem:[%s2631_s14 + $0x80] sm:$0xf]  ;;  %v700_v51 = vld [vmem:[%s2631_s14 + $0x90] sm:$0xf] }
  0xb1   : > { %1639 = vmatprep.subr.bf16.mxu1 %v1638_v41 }
  0xb3   : > { %1633 = vmatpush1.bf16.msra.mxu0 %v1632_v45 }
  0xb4   : > { %1641 = vmatpush1.bf16.msra.mxu1 %v1640_v47  ;;  %1579 = vmatprep.subr.msk.mxu0 %vm721_vm0, %v699_v48 }
  0xb5   : > { %1583 = vmatprep.subr.msk.mxu1 %vm721_vm0, %v701_v49 }
  0xb7   : > { %1580 = vmatpush1.msk.msra.mxu0 %vm721_vm0, %v698_v50 }
  0xb8   : > { %1584 = vmatpush1.msk.msra.mxu1 %vm721_vm0, %v700_v51  ;;  %1581 = vmatmul.mubr.msk.f32.vlgmr.msra.gmra.mrb[0].mxu0 %vm714_vm1, %v680_v52 }
  0xb9   : > { %1585 = vmatmul.mubr.msk.f32.vlgmr.msra.gmra.mrb[0].mxu1 %vm714_vm1, %v680_v52  ;;  %804 = vmatprep.mubr.f32.mxu0 %v2213_v20 }
  0xba   : > { %881 = vmatprep.mubr.f32.mxu1 %v2213_v20 }
  0xbc   : > { %1582 = vmatmul.mubr.msk.f32.gmra.mrb[2].mxu0 %vm714_vm1, %v681_v53 }
  0xbd   : > { %1586 = vmatmul.mubr.msk.f32.gmra.mrb[2].mxu1 %vm714_vm1, %v681_v53 }
 0x127   : > { %v707_v54 = vpop.permute.xlu0 %706 }
 0x12b   : > { %v712_v1 = vpop.permute.xlu0 %711 }
 0x18b   : > { %v800_v55 = vpop.f32.mrb[0].mxu0 }
 0x18c   : > { %v801_v56 = vadd.f32 %v800_v55, %v707_v54  ;;  %v877_v57 = vpop.f32.mrb[0].mxu1  ;;  %v802_v58 = vpop.f32.mrb[1].mxu0 }
 0x18d   : > { %v878_v59 = vadd.f32 %v877_v57, %v707_v54  ;;  %v803_v60 = vadd.f32 %v802_v58, %v707_v54  ;;  %v879_v61 = vpop.f32.mrb[1].mxu1 }
 0x18e   : > { %v888_v62 = vmax.f32 %v801_v56, 0.0  ;;  %v880_v63 = vadd.f32 %v879_v61, %v707_v54 }
 0x18f   : > { %v890_v0 = vmax.f32 %v878_v59, 0.0  ;;  %v889_v2 = vmax.f32 %v803_v60, 0.0  ;;  %v806_v3 = vpop.f32.mrb[2].mxu0 }
 0x190   : > { %896 = vst [vmem:[%s2661_s24] sm:$0xff] %v888_v62  ;;  %v891_v4 = vmax.f32 %v880_v63, 0.0  ;;  %v807_v5 = vadd.f32 %v806_v3, %v712_v1  ;;  %v883_v6 = vpop.f32.mrb[2].mxu1  ;;  %v808_v7 = vpop.f32.mrb[3].mxu0  ;;  %910 = sbr.rel (!%p2268_p5) target bundleno = 573 (0x23d), region = 102 }
 0x191   : > { %898 = vst [vmem:[%s2661_s24 + $0x10] sm:$0xff] %v890_v0  ;;  %897 = vst [vmem:[%s2661_s24 + $0x8] sm:$0xff] %v889_v2  ;;  %v884_v8 = vadd.f32 %v883_v6, %v712_v1  ;;  %v809_v9 = vadd.f32 %v808_v7, %v712_v1  ;;  %v885_v10 = vpop.f32.mrb[3].mxu1 }
 0x192   : > { %899 = vst [vmem:[%s2661_s24 + $0x18] sm:$0xff] %v891_v4  ;;  %v892_v11 = vmax.f32 %v807_v5, 0.0  ;;  %v886_v12 = vadd.f32 %v885_v10, %v712_v1 }
 0x193   : > { %v894_v13 = vmax.f32 %v884_v8, 0.0  ;;  %v893_v14 = vmax.f32 %v809_v9, 0.0 }
 0x194   : > { %900 = vst [vmem:[%s2661_s24 + $0x20] sm:$0xff] %v892_v11  ;;  %v895_v15 = vmax.f32 %v886_v12, 0.0 }
 0x195   : > { %902 = vst [vmem:[%s2661_s24 + $0x30] sm:$0xff] %v894_v13  ;;  %901 = vst [vmem:[%s2661_s24 + $0x28] sm:$0xff] %v893_v14 }
 0x196   : > { %903 = vst [vmem:[%s2661_s24 + $0x38] sm:$0xff] %v895_v15 }
 0x197   : > { %s3110_s26 = smov (!%p913_p1, %s912_s26), 4 }
 0x198   : > { %s1589_s8 = sshll.u32 %s3110_s26, 8  ;;  %s2680_s9 = sshll.u32 %s3110_s26, 3 }
 0x199   : > { %p1593_p2 = scmp.eq.s32.totalorder %s1589_s8, 0 }
 0x19a   : > { %p923_p3 = scmp.lt.u32.totalorder (!%p1593_p2), %s2680_s9, 8 }
 0x19b   : > { %922 = sbr.rel (%p1593_p2) target bundleno = 573 (0x23d), region = 106 }
 0x1a2   : > { %926 = sbr.rel (%p923_p3) target bundleno = 564 (0x234), region = 110  ;;  %s2684_s20 = sand.u32 (!%p923_p3), 7, %s2680_s9  }
 0x1a3   : > { %p944_p5 = scmp.eq.s32.totalorder (!%p923_p3), %s2684_s20, 0  ;;  %p1594_p4 = scmp.ne.s32.totalorder (!%p923_p3), %s2684_s20, 0 }
 0x1a9   : > { %947 = sbr.rel (%p1594_p4) target bundleno = 492 (0x1ec), region = 125  ;;  %s948_s15 = sshrl.u32 (!%p1594_p4), %s2680_s9, 3 }
 0x1aa   : > { %s2691_s5 = sshrl.u32 (!%p1594_p4), %s948_s15, 5 }
 0x1ab   : > { %p1595_p6 = scmp.le.s32.totalorder (!%p1594_p4), %s2691_s5, 0 }
 0x1b0   : > { %1477 = sbr.rel (%p1595_p6) target bundleno = 472 (0x1d8), region = 273  ;;  %s3084_s30 = smov (!%p1595_p6), %s2678_s27 }
 0x1b1   : > { %s3085_s18 = smov (!%p1595_p6), %s2661_s24  ;;  %s2700_s28 = smov (!%p1595_p6), 0  }
 0x1b2   : > { %s2702_s4 = smov (!%p1595_p6), 0  }
 0x1b7 LB: >> { %v961_v16 = vld [vmem:[%s2153_s18] sm:$0xff]  ;;  %v963_v17 = vld [vmem:[%s2153_s18 + $0x8] sm:$0xff]  ;;  %v965_v18 = vld [vmem:[%s2153_s18 + $0x10] sm:$0xff]  ;;  %s1089_s21 = sadd.s32 1, %s2157_s28  ;;  %s955_s4 = sadd.s32 1, %s2161_s4   ;;  %s2161_s4 = sphi %s2702_s4, %s955_s4   ;;  %s2157_s28 = sphi %s2700_s28, %s3089_s28   ;;  %s2153_s18 = sphi %s3085_s18, %s3088_s18   ;;  %s2149_s30 = sphi %s3084_s30, %s3087_s30  }
 0x1b8   : >> { %962 = vst [vmem:[%s2149_s30] sm:$0xff] %v961_v16  ;;  %964 = vst [vmem:[%s2149_s30 + $0x8] sm:$0xff] %v963_v17  ;;  %v967_v19 = vld [vmem:[%s2153_s18 + $0x18] sm:$0xff]  ;;  %v969_v20 = vld [vmem:[%s2153_s18 + $0x20] sm:$0xff]  ;;  %p2727_p7 = scmp.ge.s32.totalorder %s1089_s21, %s2691_s5  ;;  %p954_p8 = scmp.ge.s32.totalorder %s955_s4, %s2691_s5 }
 0x1b9   : >> { %966 = vst [vmem:[%s2149_s30 + $0x10] sm:$0xff] %v965_v18  ;;  %v971_v21 = vld [vmem:[%s2153_s18 + $0x28] sm:$0xff]  ;;  %968 = vst [vmem:[%s2149_s30 + $0x18] sm:$0xff] %v967_v19  ;;  %v973_v22 = vld [vmem:[%s2153_s18 + $0x30] sm:$0xff] }
 0x1ba   : >> { %970 = vst [vmem:[%s2149_s30 + $0x20] sm:$0xff] %v969_v20  ;;  %972 = vst [vmem:[%s2149_s30 + $0x28] sm:$0xff] %v971_v21  ;;  %v975_v23 = vld [vmem:[%s2153_s18 + $0x38] sm:$0xff]  ;;  %v977_v24 = vld [vmem:[%s2153_s18 + $0x40] sm:$0xff]  ;;  %s3112_s21 = smov (%p2727_p7, %s1089_s21), 0 }
 0x1bb   : >> { %1026 = vst [vmem:[%s2149_s30 + $0x128] sm:$0xff] %v969_v20  ;;  %1028 = vst [vmem:[%s2149_s30 + $0x130] sm:$0xff] %v971_v21  ;;  %v979_v25 = vld [vmem:[%s2153_s18 + $0x48] sm:$0xff]  ;;  %v981_v26 = vld [vmem:[%s2153_s18 + $0x50] sm:$0xff]  ;;  %s1596_s14 = sshll.u32 %s3112_s21, 8  ;;  %s3089_s28 = smov %s3112_s21 }
 0x1bc   : >> { %974 = vst [vmem:[%s2149_s30 + $0x30] sm:$0xff] %v973_v22  ;;  %976 = vst [vmem:[%s2149_s30 + $0x38] sm:$0xff] %v975_v23  ;;  %v983_v27 = vld [vmem:[%s2153_s18 + $0x58] sm:$0xff]  ;;  %v985_v28 = vld [vmem:[%s2153_s18 + $0x60] sm:$0xff]  ;;  %s2781_s6 = scalar_lea.vmem %s2661_s24, %s1596_s14 [#allocation3]   ;;  %s2784_s7 = scalar_lea.vmem %s2678_s27, %s1596_s14  }
 0x1bd   : >> { %978 = vst [vmem:[%s2149_s30 + $0x40] sm:$0xff] %v977_v24  ;;  %1030 = vst [vmem:[%s2149_s30 + $0x138] sm:$0xff] %v973_v22  ;;  %v987_v29 = vld [vmem:[%s2153_s18 + $0x68] sm:$0xff]  ;;  %v989_v30 = vld [vmem:[%s2153_s18 + $0x70] sm:$0xff] }
 0x1be   : >> { %1032 = vst [vmem:[%s2149_s30 + $0x140] sm:$0xff] %v975_v23  ;;  %1034 = vst [vmem:[%s2149_s30 + $0x148] sm:$0xff] %v977_v24  ;;  %v991_v31 = vld [vmem:[%s2153_s18 + $0x78] sm:$0xff]  ;;  %v993_v32 = vld [vmem:[%s2153_s18 + $0x80] sm:$0xff] }
 0x1bf   : >> { %980 = vst [vmem:[%s2149_s30 + $0x48] sm:$0xff] %v979_v25  ;;  %982 = vst [vmem:[%s2149_s30 + $0x50] sm:$0xff] %v981_v26  ;;  %v995_v33 = vld [vmem:[%s2153_s18 + $0x88] sm:$0xff]  ;;  %v997_v34 = vld [vmem:[%s2153_s18 + $0x90] sm:$0xff] }
 0x1c0   : >> { %984 = vst [vmem:[%s2149_s30 + $0x58] sm:$0xff] %v983_v27  ;;  %1036 = vst [vmem:[%s2149_s30 + $0x150] sm:$0xff] %v979_v25  ;;  %v999_v35 = vld [vmem:[%s2153_s18 + $0x98] sm:$0xff]  ;;  %v1001_v36 = vld [vmem:[%s2153_s18 + $0xa0] sm:$0xff] }
 0x1c1   : >> { %1038 = vst [vmem:[%s2149_s30 + $0x158] sm:$0xff] %v981_v26  ;;  %1040 = vst [vmem:[%s2149_s30 + $0x160] sm:$0xff] %v983_v27  ;;  %v1003_v37 = vld [vmem:[%s2153_s18 + $0xa8] sm:$0xff]  ;;  %v1005_v38 = vld [vmem:[%s2153_s18 + $0xb0] sm:$0xff] }
 0x1c2   : >> { %986 = vst [vmem:[%s2149_s30 + $0x60] sm:$0xff] %v985_v28  ;;  %988 = vst [vmem:[%s2149_s30 + $0x68] sm:$0xff] %v987_v29  ;;  %v1007_v39 = vld [vmem:[%s2153_s18 + $0xb8] sm:$0xff]  ;;  %v1009_v40 = vld [vmem:[%s2153_s18 + $0xc0] sm:$0xff] }
 0x1c3   : >> { %990 = vst [vmem:[%s2149_s30 + $0x70] sm:$0xff] %v989_v30  ;;  %1042 = vst [vmem:[%s2149_s30 + $0x168] sm:$0xff] %v985_v28  ;;  %v1011_v41 = vld [vmem:[%s2153_s18 + $0xc8] sm:$0xff]  ;;  %v1013_v42 = vld [vmem:[%s2153_s18 + $0xd0] sm:$0xff] }
 0x1c4   : >> { %1044 = vst [vmem:[%s2149_s30 + $0x170] sm:$0xff] %v987_v29  ;;  %1046 = vst [vmem:[%s2149_s30 + $0x178] sm:$0xff] %v989_v30  ;;  %v1015_v43 = vld [vmem:[%s2153_s18 + $0xd8] sm:$0xff]  ;;  %v1017_v44 = vld [vmem:[%s2153_s18 + $0xe0] sm:$0xff] }
 0x1c5   : >> { %992 = vst [vmem:[%s2149_s30 + $0x78] sm:$0xff] %v991_v31  ;;  %994 = vst [vmem:[%s2149_s30 + $0x80] sm:$0xff] %v993_v32  ;;  %v1019_v45 = vld [vmem:[%s2153_s18 + $0xe8] sm:$0xff]  ;;  %v1021_v46 = vld [vmem:[%s2153_s18 + $0xf0] sm:$0xff] }
 0x1c6   : >> { %996 = vst [vmem:[%s2149_s30 + $0x88] sm:$0xff] %v995_v33  ;;  %1048 = vst [vmem:[%s2149_s30 + $0x180] sm:$0xff] %v991_v31  ;;  %v1023_v47 = vld [vmem:[%s2153_s18 + $0xf8] sm:$0xff]  ;;  %v1081_v48 = vld [vmem:[%s2153_s18 + $0x100] sm:$0xff] }
 0x1c7   : >> { %1050 = vst [vmem:[%s2149_s30 + $0x188] sm:$0xff] %v993_v32  ;;  %1052 = vst [vmem:[%s2149_s30 + $0x190] sm:$0xff] %v995_v33  ;;  %v1083_v49 = vld [vmem:[%s2153_s18 + $0x108] sm:$0xff]  ;;  %v1085_v50 = vld [vmem:[%s2153_s18 + $0x110] sm:$0xff] }
 0x1c8   : >> { %998 = vst [vmem:[%s2149_s30 + $0x90] sm:$0xff] %v997_v34  ;;  %1000 = vst [vmem:[%s2149_s30 + $0x98] sm:$0xff] %v999_v35  ;;  %v1087_v51 = vld [vmem:[%s2153_s18 + $0x118] sm:$0xff]  ;;  %s3088_s18 = smov %s2781_s6 }
 0x1c9   : >> { %1002 = vst [vmem:[%s2149_s30 + $0xa0] sm:$0xff] %v1001_v36  ;;  %1054 = vst [vmem:[%s2149_s30 + $0x198] sm:$0xff] %v997_v34 }
 0x1ca   : >> { %1056 = vst [vmem:[%s2149_s30 + $0x1a0] sm:$0xff] %v999_v35  ;;  %1058 = vst [vmem:[%s2149_s30 + $0x1a8] sm:$0xff] %v1001_v36 }
 0x1cb   : >> { %1004 = vst [vmem:[%s2149_s30 + $0xa8] sm:$0xff] %v1003_v37  ;;  %1006 = vst [vmem:[%s2149_s30 + $0xb0] sm:$0xff] %v1005_v38 }
 0x1cc   : >> { %1008 = vst [vmem:[%s2149_s30 + $0xb8] sm:$0xff] %v1007_v39  ;;  %1060 = vst [vmem:[%s2149_s30 + $0x1b0] sm:$0xff] %v1003_v37 }
 0x1cd   : >> { %1062 = vst [vmem:[%s2149_s30 + $0x1b8] sm:$0xff] %v1005_v38  ;;  %1064 = vst [vmem:[%s2149_s30 + $0x1c0] sm:$0xff] %v1007_v39 }
 0x1ce   : >> { %1010 = vst [vmem:[%s2149_s30 + $0xc0] sm:$0xff] %v1009_v40  ;;  %1012 = vst [vmem:[%s2149_s30 + $0xc8] sm:$0xff] %v1011_v41 }
 0x1cf   : >> { %1014 = vst [vmem:[%s2149_s30 + $0xd0] sm:$0xff] %v1013_v42  ;;  %1066 = vst [vmem:[%s2149_s30 + $0x1c8] sm:$0xff] %v1009_v40 }
 0x1d0   : >> { %1068 = vst [vmem:[%s2149_s30 + $0x1d0] sm:$0xff] %v1011_v41  ;;  %1070 = vst [vmem:[%s2149_s30 + $0x1d8] sm:$0xff] %v1013_v42 }
 0x1d1   : >> { %1016 = vst [vmem:[%s2149_s30 + $0xd8] sm:$0xff] %v1015_v43  ;;  %1018 = vst [vmem:[%s2149_s30 + $0xe0] sm:$0xff] %v1017_v44  ;;  %957 = sbr.rel (!%p954_p8) target bundleno = 439 (0x1b7), region = 279 }
 0x1d2   : >> { %1020 = vst [vmem:[%s2149_s30 + $0xe8] sm:$0xff] %v1019_v45  ;;  %1072 = vst [vmem:[%s2149_s30 + $0x1e0] sm:$0xff] %v1015_v43 }
 0x1d3   : >> { %1074 = vst [vmem:[%s2149_s30 + $0x1e8] sm:$0xff] %v1017_v44  ;;  %1076 = vst [vmem:[%s2149_s30 + $0x1f0] sm:$0xff] %v1019_v45 }
 0x1d4   : >> { %1022 = vst [vmem:[%s2149_s30 + $0xf0] sm:$0xff] %v1021_v46  ;;  %1024 = vst [vmem:[%s2149_s30 + $0xf8] sm:$0xff] %v1023_v47 }
 0x1d5   : >> { %1078 = vst [vmem:[%s2149_s30 + $0x1f8] sm:$0xff] %v1021_v46  ;;  %1080 = vst [vmem:[%s2149_s30 + $0x200] sm:$0xff] %v1023_v47 }
 0x1d6   : >> { %1082 = vst [vmem:[%s2149_s30 + $0x208] sm:$0xff] %v1081_v48  ;;  %1084 = vst [vmem:[%s2149_s30 + $0x210] sm:$0xff] %v1083_v49 }
 0x1d7   : >> { %1086 = vst [vmem:[%s2149_s30 + $0x218] sm:$0xff] %v1085_v50  ;;  %1088 = vst [vmem:[%s2149_s30 + $0x220] sm:$0xff] %v1087_v51  ;;  %s3087_s30 = smov %s2784_s7 }
 0x1d8 PF: > { %s2848_s11 = sand.u32 31, %s948_s15   ;;  %s1622_s29 = sshll.u32 %s2691_s5, 12 }
 0x1d9   : > { %s1100_s23 = sshra.s32 %s1622_s29, 4  ;;  %p1601_p9 = scmp.le.s32.totalorder %s2848_s11, 0 }
 0x1da   : > { %s2852_s12 = scalar_lea.vmem %s2661_s24, %s1100_s23 [#allocation3]   ;;  %s1104_s25 = scalar_lea.vmem %s2678_s27, %s1100_s23  }
 0x1db   : > { %1491 = sbr.rel (%p1601_p9) target bundleno = 492 (0x1ec), region = 284  ;;  %s2163_s26 = smov (!%p1601_p9), %s1104_s25  }
 0x1dc   : > { %s2167_s17 = smov (!%p1601_p9), %s2852_s12   ;;  %s2171_s22 = smov (!%p1601_p9), 0  }
 0x1dd   : > { %s2175_s8 = smov (!%p1601_p9), 0  }
 0x1e2 LB: >> { %v1116_v52 = vld [vmem:[%s2169_s17] sm:$0xff]  ;;  %s1120_s15 = sadd.s32 1, %s2173_s22  ;;  %s1110_s8 = sadd.s32 1, %s2177_s8   ;;  %s2177_s8 = sphi %s2175_s8, %s1110_s8   ;;  %s2173_s22 = sphi %s2171_s22, %s2172_s22   ;;  %s2169_s17 = sphi %s2167_s17, %s1125_s17   ;;  %s2165_s26 = sphi %s2163_s26, %s1126_s26  }
 0x1e3   : >> { %v1118_v53 = vld [vmem:[%s2169_s17 + $0x20] sm:$0xff]  ;;  %1117 = vst [vmem:[%s2165_s26] sm:$0xff] %v1116_v52  ;;  %p1121_p10 = scmp.ge.s32.totalorder %s1120_s15, %s2848_s11  ;;  %p1109_p11 = scmp.ge.s32.totalorder %s1110_s8, %s2848_s11 }
 0x1e4   : >> { %1119 = vst [vmem:[%s2165_s26 + $0x128] sm:$0xff] %v1118_v53 }
 0x1e5   : >> { %s3114_s15 = smov (%p1121_p10, %s1120_s15), 0  ;;  %1112 = sbr.rel (!%p1109_p11) target bundleno = 482 (0x1e2), region = 290 }
 0x1e6   : >> { %s1602_s5 = sshll.u32 %s3114_s15, 3  ;;  %s2172_s22 = smov %s3114_s15  }
 0x1e7   : >> { %s1125_s17 = scalar_lea.vmem %s2852_s12, %s1602_s5 [#allocation3]   ;;  %s1126_s26 = scalar_lea.vmem %s1104_s25, %s1602_s5  }
 0x1ec PF: > { %1129 = sbr.rel (%p944_p5) target bundleno = 564 (0x234), region = 143  ;;  %s1131_s30 = ssub.s32 (!%p944_p5), %s2680_s9, %s2684_s20 }
 0x1ed   : > { %s1135_s18 = sshrl.u32 (!%p944_p5), %s2680_s9, 3  ;;  %s2866_s28 = scalar_lea.vmem (!%p944_p5), %s2661_s24, %s1131_s30 [#allocation3] }
 0x1ee   : > { %s2869_s4 = scalar_lea.vmem (!%p944_p5), %s2678_s27, %s1131_s30  ;;  %s2873_s21 = sshrl.u32 (!%p944_p5), %s1135_s18, 5 }
 0x1ef   : > { %p1604_p12 = scmp.le.s32.totalorder (!%p944_p5), %s2873_s21, 0 }
 0x1f3   : > { %1505 = sbr.rel (%p1604_p12) target bundleno = 539 (0x21b), region = 295  ;;  %s3090_s10 = smov (!%p1604_p12), %s2678_s27 }
 0x1f4   : > { %s3091_s14 = smov (!%p1604_p12), %s2661_s24  ;;  %s2882_s6 = smov (!%p1604_p12), 0  }
 0x1f5   : > { %s2884_s7 = smov (!%p1604_p12), 0  }
 0x1fa LB: >> { %v1148_v54 = vld [vmem:[%s2185_s14] sm:$0xff]  ;;  %v1150_v55 = vld [vmem:[%s2185_s14 + $0x8] sm:$0xff]  ;;  %v1152_v56 = vld [vmem:[%s2185_s14 + $0x10] sm:$0xff]  ;;  %s1276_s11 = sadd.s32 1, %s2189_s6  ;;  %s1142_s7 = sadd.s32 1, %s2193_s7   ;;  %s2193_s7 = sphi %s2884_s7, %s1142_s7   ;;  %s2189_s6 = sphi %s2882_s6, %s3095_s6   ;;  %s2185_s14 = sphi %s3091_s14, %s3094_s14   ;;  %s2181_s10 = sphi %s3090_s10, %s3093_s10  }
 0x1fb   : >> { %1149 = vst [vmem:[%s2181_s10] sm:$0xff] %v1148_v54  ;;  %1151 = vst [vmem:[%s2181_s10 + $0x8] sm:$0xff] %v1150_v55  ;;  %v1154_v57 = vld [vmem:[%s2185_s14 + $0x18] sm:$0xff]  ;;  %v1156_v58 = vld [vmem:[%s2185_s14 + $0x20] sm:$0xff]  ;;  %p2909_p13 = scmp.ge.s32.totalorder %s1276_s11, %s2873_s21  ;;  %p1141_p0 = scmp.ge.s32.totalorder %s1142_s7, %s2873_s21 }
 0x1fc   : >> { %1153 = vst [vmem:[%s2181_s10 + $0x10] sm:$0xff] %v1152_v56  ;;  %v1158_v59 = vld [vmem:[%s2185_s14 + $0x28] sm:$0xff]  ;;  %1155 = vst [vmem:[%s2181_s10 + $0x18] sm:$0xff] %v1154_v57  ;;  %v1160_v60 = vld [vmem:[%s2185_s14 + $0x30] sm:$0xff] }
 0x1fd   : >> { %1157 = vst [vmem:[%s2181_s10 + $0x20] sm:$0xff] %v1156_v58  ;;  %1159 = vst [vmem:[%s2181_s10 + $0x28] sm:$0xff] %v1158_v59  ;;  %v1162_v61 = vld [vmem:[%s2185_s14 + $0x38] sm:$0xff]  ;;  %v1164_v62 = vld [vmem:[%s2185_s14 + $0x40] sm:$0xff]  ;;  %s3116_s11 = smov (%p2909_p13, %s1276_s11), 0 }
 0x1fe   : >> { %1213 = vst [vmem:[%s2181_s10 + $0x128] sm:$0xff] %v1156_v58  ;;  %1215 = vst [vmem:[%s2181_s10 + $0x130] sm:$0xff] %v1158_v59  ;;  %v1166_v63 = vld [vmem:[%s2185_s14 + $0x48] sm:$0xff]  ;;  %v1168_v0 = vld [vmem:[%s2185_s14 + $0x50] sm:$0xff]  ;;  %s1605_s23 = sshll.u32 %s3116_s11, 8  ;;  %s3095_s6 = smov %s3116_s11 }
 0x1ff   : >> { %1161 = vst [vmem:[%s2181_s10 + $0x30] sm:$0xff] %v1160_v60  ;;  %1163 = vst [vmem:[%s2181_s10 + $0x38] sm:$0xff] %v1162_v61  ;;  %v1170_v1 = vld [vmem:[%s2185_s14 + $0x58] sm:$0xff]  ;;  %v1172_v2 = vld [vmem:[%s2185_s14 + $0x60] sm:$0xff]  ;;  %s2963_s12 = scalar_lea.vmem %s2661_s24, %s1605_s23 [#allocation3]   ;;  %s2966_s25 = scalar_lea.vmem %s2678_s27, %s1605_s23  }
 0x200   : >> { %1165 = vst [vmem:[%s2181_s10 + $0x40] sm:$0xff] %v1164_v62  ;;  %1217 = vst [vmem:[%s2181_s10 + $0x138] sm:$0xff] %v1160_v60  ;;  %v1174_v3 = vld [vmem:[%s2185_s14 + $0x68] sm:$0xff]  ;;  %v1176_v4 = vld [vmem:[%s2185_s14 + $0x70] sm:$0xff] }
 0x201   : >> { %1219 = vst [vmem:[%s2181_s10 + $0x140] sm:$0xff] %v1162_v61  ;;  %1221 = vst [vmem:[%s2181_s10 + $0x148] sm:$0xff] %v1164_v62  ;;  %v1178_v5 = vld [vmem:[%s2185_s14 + $0x78] sm:$0xff]  ;;  %v1180_v6 = vld [vmem:[%s2185_s14 + $0x80] sm:$0xff] }
 0x202   : >> { %1167 = vst [vmem:[%s2181_s10 + $0x48] sm:$0xff] %v1166_v63  ;;  %1169 = vst [vmem:[%s2181_s10 + $0x50] sm:$0xff] %v1168_v0  ;;  %v1182_v7 = vld [vmem:[%s2185_s14 + $0x88] sm:$0xff]  ;;  %v1184_v8 = vld [vmem:[%s2185_s14 + $0x90] sm:$0xff] }
 0x203   : >> { %1171 = vst [vmem:[%s2181_s10 + $0x58] sm:$0xff] %v1170_v1  ;;  %1223 = vst [vmem:[%s2181_s10 + $0x150] sm:$0xff] %v1166_v63  ;;  %v1186_v9 = vld [vmem:[%s2185_s14 + $0x98] sm:$0xff]  ;;  %v1188_v10 = vld [vmem:[%s2185_s14 + $0xa0] sm:$0xff] }
 0x204   : >> { %1225 = vst [vmem:[%s2181_s10 + $0x158] sm:$0xff] %v1168_v0  ;;  %1227 = vst [vmem:[%s2181_s10 + $0x160] sm:$0xff] %v1170_v1  ;;  %v1190_v11 = vld [vmem:[%s2185_s14 + $0xa8] sm:$0xff]  ;;  %v1192_v12 = vld [vmem:[%s2185_s14 + $0xb0] sm:$0xff] }
 0x205   : >> { %1173 = vst [vmem:[%s2181_s10 + $0x60] sm:$0xff] %v1172_v2  ;;  %1175 = vst [vmem:[%s2181_s10 + $0x68] sm:$0xff] %v1174_v3  ;;  %v1194_v13 = vld [vmem:[%s2185_s14 + $0xb8] sm:$0xff]  ;;  %v1196_v14 = vld [vmem:[%s2185_s14 + $0xc0] sm:$0xff] }
 0x206   : >> { %1177 = vst [vmem:[%s2181_s10 + $0x70] sm:$0xff] %v1176_v4  ;;  %1229 = vst [vmem:[%s2181_s10 + $0x168] sm:$0xff] %v1172_v2  ;;  %v1198_v15 = vld [vmem:[%s2185_s14 + $0xc8] sm:$0xff]  ;;  %v1200_v16 = vld [vmem:[%s2185_s14 + $0xd0] sm:$0xff] }
 0x207   : >> { %1231 = vst [vmem:[%s2181_s10 + $0x170] sm:$0xff] %v1174_v3  ;;  %1233 = vst [vmem:[%s2181_s10 + $0x178] sm:$0xff] %v1176_v4  ;;  %v1202_v17 = vld [vmem:[%s2185_s14 + $0xd8] sm:$0xff]  ;;  %v1204_v18 = vld [vmem:[%s2185_s14 + $0xe0] sm:$0xff] }
 0x208   : >> { %1179 = vst [vmem:[%s2181_s10 + $0x78] sm:$0xff] %v1178_v5  ;;  %1181 = vst [vmem:[%s2181_s10 + $0x80] sm:$0xff] %v1180_v6  ;;  %v1206_v19 = vld [vmem:[%s2185_s14 + $0xe8] sm:$0xff]  ;;  %v1208_v20 = vld [vmem:[%s2185_s14 + $0xf0] sm:$0xff] }
 0x209   : >> { %1183 = vst [vmem:[%s2181_s10 + $0x88] sm:$0xff] %v1182_v7  ;;  %1235 = vst [vmem:[%s2181_s10 + $0x180] sm:$0xff] %v1178_v5  ;;  %v1210_v21 = vld [vmem:[%s2185_s14 + $0xf8] sm:$0xff]  ;;  %v1268_v22 = vld [vmem:[%s2185_s14 + $0x100] sm:$0xff] }
 0x20a   : >> { %1237 = vst [vmem:[%s2181_s10 + $0x188] sm:$0xff] %v1180_v6  ;;  %1239 = vst [vmem:[%s2181_s10 + $0x190] sm:$0xff] %v1182_v7  ;;  %v1270_v23 = vld [vmem:[%s2185_s14 + $0x108] sm:$0xff]  ;;  %v1272_v24 = vld [vmem:[%s2185_s14 + $0x110] sm:$0xff] }
 0x20b   : >> { %1185 = vst [vmem:[%s2181_s10 + $0x90] sm:$0xff] %v1184_v8  ;;  %1187 = vst [vmem:[%s2181_s10 + $0x98] sm:$0xff] %v1186_v9  ;;  %v1274_v25 = vld [vmem:[%s2185_s14 + $0x118] sm:$0xff]  ;;  %s3094_s14 = smov %s2963_s12 }
 0x20c   : >> { %1189 = vst [vmem:[%s2181_s10 + $0xa0] sm:$0xff] %v1188_v10  ;;  %1241 = vst [vmem:[%s2181_s10 + $0x198] sm:$0xff] %v1184_v8 }
 0x20d   : >> { %1243 = vst [vmem:[%s2181_s10 + $0x1a0] sm:$0xff] %v1186_v9  ;;  %1245 = vst [vmem:[%s2181_s10 + $0x1a8] sm:$0xff] %v1188_v10 }
 0x20e   : >> { %1191 = vst [vmem:[%s2181_s10 + $0xa8] sm:$0xff] %v1190_v11  ;;  %1193 = vst [vmem:[%s2181_s10 + $0xb0] sm:$0xff] %v1192_v12 }
 0x20f   : >> { %1195 = vst [vmem:[%s2181_s10 + $0xb8] sm:$0xff] %v1194_v13  ;;  %1247 = vst [vmem:[%s2181_s10 + $0x1b0] sm:$0xff] %v1190_v11 }
 0x210   : >> { %1249 = vst [vmem:[%s2181_s10 + $0x1b8] sm:$0xff] %v1192_v12  ;;  %1251 = vst [vmem:[%s2181_s10 + $0x1c0] sm:$0xff] %v1194_v13 }
 0x211   : >> { %1197 = vst [vmem:[%s2181_s10 + $0xc0] sm:$0xff] %v1196_v14  ;;  %1199 = vst [vmem:[%s2181_s10 + $0xc8] sm:$0xff] %v1198_v15 }
 0x212   : >> { %1201 = vst [vmem:[%s2181_s10 + $0xd0] sm:$0xff] %v1200_v16  ;;  %1253 = vst [vmem:[%s2181_s10 + $0x1c8] sm:$0xff] %v1196_v14 }
 0x213   : >> { %1255 = vst [vmem:[%s2181_s10 + $0x1d0] sm:$0xff] %v1198_v15  ;;  %1257 = vst [vmem:[%s2181_s10 + $0x1d8] sm:$0xff] %v1200_v16 }
 0x214   : >> { %1203 = vst [vmem:[%s2181_s10 + $0xd8] sm:$0xff] %v1202_v17  ;;  %1205 = vst [vmem:[%s2181_s10 + $0xe0] sm:$0xff] %v1204_v18  ;;  %1144 = sbr.rel (!%p1141_p0) target bundleno = 506 (0x1fa), region = 301 }
 0x215   : >> { %1207 = vst [vmem:[%s2181_s10 + $0xe8] sm:$0xff] %v1206_v19  ;;  %1259 = vst [vmem:[%s2181_s10 + $0x1e0] sm:$0xff] %v1202_v17 }
 0x216   : >> { %1261 = vst [vmem:[%s2181_s10 + $0x1e8] sm:$0xff] %v1204_v18  ;;  %1263 = vst [vmem:[%s2181_s10 + $0x1f0] sm:$0xff] %v1206_v19 }
 0x217   : >> { %1209 = vst [vmem:[%s2181_s10 + $0xf0] sm:$0xff] %v1208_v20  ;;  %1211 = vst [vmem:[%s2181_s10 + $0xf8] sm:$0xff] %v1210_v21 }
 0x218   : >> { %1265 = vst [vmem:[%s2181_s10 + $0x1f8] sm:$0xff] %v1208_v20  ;;  %1267 = vst [vmem:[%s2181_s10 + $0x200] sm:$0xff] %v1210_v21 }
 0x219   : >> { %1269 = vst [vmem:[%s2181_s10 + $0x208] sm:$0xff] %v1268_v22  ;;  %1271 = vst [vmem:[%s2181_s10 + $0x210] sm:$0xff] %v1270_v23 }
 0x21a   : >> { %1273 = vst [vmem:[%s2181_s10 + $0x218] sm:$0xff] %v1272_v24  ;;  %1275 = vst [vmem:[%s2181_s10 + $0x220] sm:$0xff] %v1274_v25  ;;  %s3093_s10 = smov %s2966_s25 }
 0x21b PF: > { %s3030_s26 = sand.u32 31, %s1135_s18   ;;  %s1624_s17 = sshll.u32 %s2873_s21, 12 }
 0x21c   : > { %s1287_s22 = sshra.s32 %s1624_s17, 4  ;;  %p1610_p1 = scmp.le.s32.totalorder %s3030_s26, 0 }
 0x21d   : > { %s3034_s8 = scalar_lea.vmem %s2661_s24, %s1287_s22 [#allocation3]   ;;  %s1291_s15 = scalar_lea.vmem %s2678_s27, %s1287_s22  }
 0x21e   : > { %1519 = sbr.rel (%p1610_p1) target bundleno = 559 (0x22f), region = 306  ;;  %s2195_s5 = smov (!%p1610_p1), %s1291_s15  }
 0x21f   : > { %s2199_s30 = smov (!%p1610_p1), %s3034_s8   ;;  %s2203_s7 = smov (!%p1610_p1), 0  }
 0x220   : > { %s2207_s10 = smov (!%p1610_p1), 0  }
 0x225 LB: >> { %v1303_v26 = vld [vmem:[%s2201_s30] sm:$0xff]  ;;  %s1307_s18 = sadd.s32 1, %s2205_s7  ;;  %s1297_s10 = sadd.s32 1, %s2209_s10   ;;  %s2209_s10 = sphi %s2207_s10, %s1297_s10   ;;  %s2205_s7 = sphi %s2203_s7, %s2204_s7   ;;  %s2201_s30 = sphi %s2199_s30, %s1312_s30   ;;  %s2197_s5 = sphi %s2195_s5, %s1313_s5  }
 0x226   : >> { %v1305_v27 = vld [vmem:[%s2201_s30 + $0x20] sm:$0xff]  ;;  %1304 = vst [vmem:[%s2197_s5] sm:$0xff] %v1303_v26  ;;  %p1308_p2 = scmp.ge.s32.totalorder %s1307_s18, %s3030_s26  ;;  %p1296_p3 = scmp.ge.s32.totalorder %s1297_s10, %s3030_s26 }
 0x227   : >> { %1306 = vst [vmem:[%s2197_s5 + $0x128] sm:$0xff] %v1305_v27 }
 0x228   : >> { %s3118_s18 = smov (%p1308_p2, %s1307_s18), 0  ;;  %1299 = sbr.rel (!%p1296_p3) target bundleno = 549 (0x225), region = 312 }
 0x229   : >> { %s1611_s21 = sshll.u32 %s3118_s18, 3  ;;  %s2204_s7 = smov %s3118_s18  }
 0x22a   : >> { %s1312_s30 = scalar_lea.vmem %s3034_s8, %s1611_s21 [#allocation3]   ;;  %s1313_s5 = scalar_lea.vmem %s1291_s15, %s1611_s21  }
 0x22f PF: > { %s2215_s14 = smov 0  }
 0x230   : > { %s1314_s6 = sshllo.u32 %s2215_s14, %s2684_s20 }
 0x231   : > { %v1323_v28 = vld [vmem:[%s2866_s28] sm:%s1314_s6] }
 0x232   : > { %v1325_v29 = vld [vmem:[%s2866_s28 + $0x20] sm:%s1314_s6]  ;;  %1324 = vst [vmem:[%s2869_s4] sm:%s1314_s6] %v1323_v28 }
 0x233   : > { %1326 = vst [vmem:[%s2869_s4 + $0x128] sm:%s1314_s6] %v1325_v29 }
 0x234 PF: > { %p1613_p5 = scmp.ge.u32.totalorder %s2680_s9, 8 }
 0x235   : > { %s2216_s11 = smov (!%p1613_p5), 0  }
 0x236   : > { %929 = sbr.rel (%p1613_p5) target bundleno = 573 (0x23d), region = 114  ;;  %s930_s29 = sshllo.u32 (!%p1613_p5), %s2216_s11, %s2680_s9 }
 0x237   : > { %v939_v30 = vld [vmem:[%s2661_s24] sm:%s930_s29] (!%p1613_p5) }
 0x238   : > { %v941_v31 = vld [vmem:[%s2661_s24 + $0x20] sm:%s930_s29] (!%p1613_p5)  ;;  %940 = vst [vmem:[%s2678_s27] sm:%s930_s29] (!%p1613_p5), %v939_v30 }
 0x239   : > { %942 = vst [vmem:[%s2678_s27 + $0x128] sm:%s930_s29] (!%p1613_p5), %v941_v31 }
 0x23d PF: > { %p10_p4 = scmp.ge.s32.totalorder %s2256_s16, 12   ;;  %s3096_s12 = smov %s2077_s13 }
 0x23e   : > { %s3097_s13 = smov %s2266_s19  ;;  %s3098_s14 = smov %s2256_s16 }
 0x23f   :  { %12 = sbr.rel (!%p10_p4) target bundleno = 2 (0x2), region = 323 }

// kernel: i2a_forward.7
= control target key start
LH: loop header
LB: loop body
LE: loop exit
PB: predicated region body
PF: predicated region fallthrough
CT: control target
= control target key end

     0   :  { %s2400_s12 = smov 0   ;;  %s2402_s13 = smov 0   ;;  %s3594_s0 = inlined_call_operand.vmem [shape: f32[16,144], index: 0, kind: input, shape index: {}]   ;;  %s3595_s1 = inlined_call_operand.vmem [shape: f32[144,864], index: 1, kind: input, shape index: {}]   ;;  %s3596_s2 = inlined_call_operand.vmem [shape: f32[16,1], index: 2, kind: input, shape index: {}]   ;;  %s3597_s3 = inlined_call_operand.vmem [shape: f32[16,864], index: 3, kind: output, shape index: {}]  }
   0x1   :  { %s2404_s14 = smov 0  }
   0x2 LB: > { %s2416_s15 = sadd.s32 4294967295, %s2245_s14   ;;  %s2419_s16 = sadd.s32 1, %s2245_s14   ;;  %s2245_s14 = sphi %s2404_s14, %s3627_s14   ;;  %s2241_s13 = sphi %s2402_s13, %s3626_s13   ;;  %s2237_s12 = sphi %s2400_s12, %s3625_s12  }
   0x3   : > { %s38_s17 = ssub.s32 %s2245_s14, %s2419_s16  ;;  %s41_s18 = sadd.s32 1, %s2241_s13 }
   0x4   : > { %p39_p0 = scmp.eq.s32.totalorder %s38_s17, 0  ;;  %p48_p1 = scmp.ne.s32.totalorder %s2241_s13, %s2237_s12 }
   0x5   : > { %p49_p2 = scmp.eq.s32.totalorder %s2245_s14, 0  ;;  %p99_p3 = scmp.eq.s32.totalorder %s2416_s15, 1 }
   0x6   : > { %s2429_s19 = scalar_select %p39_p0, %s2241_s13, %s41_s18  }
   0x7   : > { %p50_p4 = por %p49_p2, %p48_p1  ;;  %p2431_p5 = por %p99_p3, %p48_p1 }
   0x8   : > { %p1664_p6 = scmp.ge.s32.totalorder %s2245_s14, 2 }
   0xa   : > { %127 = sbr.rel (%p1664_p6) target bundleno = 226 (0xe2), region = 24 }
  0x11   : > { %130 = sbr.rel (!%p50_p4) target bundleno = 226 (0xe2), region = 28  ;;  %s132_s21 = sand.u32 (%p50_p4), 1, %s2241_s13  }
  0x12   : > { %s1665_s22 = sshll.u32 (%p50_p4), %s2245_s14, 2  ;;  %s1807_s23 = smul.u32 (%p50_p4), 576, %s132_s21 }
  0x13   : > { %s136_s24 = ssub.s32 (%p50_p4), 7, %s1665_s22  ;;  %s1725_s25 = sshll.u32 (%p50_p4), %s2245_s14, 5 }
  0x14   : > { %p137_p7 = scmp.lt.s32.totalorder (%p50_p4), %s136_s24, 4  ;;  %s2442_s28 = scalar_lea.vmem (%p50_p4), %s3595_s1, %s1725_s25  }
  0x15   : > { %s2446_s4 = scalar_lea.vmem (%p50_p4), [#allocation2], %s1807_s23  }
  0x18   : > { %s3629_s24 = smov (!%p137_p7, %s136_s24), 4 }
  0x19   : > { %s139_s29 = smul.u32 2304, %s3629_s24  ;;  %s2444_s30 = sshll.u32 %s3629_s24, 3 }
  0x1b   : > { %p1669_p8 = scmp.eq.s32.totalorder %s139_s29, 0 }
  0x1c   : > { %p147_p9 = scmp.lt.u32.totalorder (!%p1669_p8), %s2444_s30, 8 }
  0x1d   : > { %146 = sbr.rel (%p1669_p8) target bundleno = 226 (0xe2), region = 32 }
  0x24   : > { %150 = sbr.rel (%p147_p9) target bundleno = 205 (0xcd), region = 36  ;;  %s2450_s5 = sand.u32 (!%p147_p9), 7, %s2444_s30  }
  0x25   : > { %p200_p10 = scmp.eq.s32.totalorder (!%p147_p9), %s2450_s5, 0  ;;  %p1670_p11 = scmp.ne.s32.totalorder (!%p147_p9), %s2450_s5, 0 }
  0x2b   : > { %203 = sbr.rel (%p1670_p11) target bundleno = 114 (0x72), region = 51  ;;  %s204_s6 = sshrl.u32 (!%p1670_p11), %s2444_s30, 3 }
  0x2c   : > { %s2457_s7 = sshrl.u32 (!%p1670_p11), %s204_s6, 2 }
  0x2d   : > { %p1671_p12 = scmp.le.s32.totalorder (!%p1670_p11), %s2457_s7, 0 }
  0x32   : > { %1534 = sbr.rel (%p1671_p12) target bundleno = 94 (0x5e), region = 229  ;;  %s3599_s8 = smov (!%p1671_p12), %s2446_s4 }
  0x33   : > { %s3600_s9 = smov (!%p1671_p12), %s2442_s28  ;;  %s2466_s10 = smov (!%p1671_p12), 0  }
  0x34   : > { %s2468_s11 = smov (!%p1671_p12), 0  }
  0x39 LB: >> { %v217_v0 = vld [vmem:[%s2253_s9] sm:$0xff]  ;;  %v219_v1 = vld [vmem:[%s2253_s9 + $0x8] sm:$0xff]  ;;  %v221_v2 = vld [vmem:[%s2253_s9 + $0x10] sm:$0xff]  ;;  %s361_s17 = sadd.s32 1, %s2257_s10  ;;  %s211_s11 = sadd.s32 1, %s2261_s11   ;;  %s2261_s11 = sphi %s2468_s11, %s211_s11   ;;  %s2257_s10 = sphi %s2466_s10, %s3603_s10   ;;  %s2253_s9 = sphi %s3600_s9, %s3602_s9   ;;  %s2249_s8 = sphi %s3599_s8, %s3601_s8  }
  0x3a   : >> { %218 = vst [vmem:[%s2249_s8] sm:$0xff] %v217_v0  ;;  %220 = vst [vmem:[%s2249_s8 + $0x8] sm:$0xff] %v219_v1  ;;  %v223_v3 = vld [vmem:[%s2253_s9 + $0x18] sm:$0xff]  ;;  %v227_v5 = vld [vmem:[%s2253_s9 + $0x40] sm:$0xff]  ;;  %p362_p13 = scmp.ge.s32.totalorder %s361_s17, %s2457_s7  ;;  %p210_p0 = scmp.ge.s32.totalorder %s211_s11, %s2457_s7 }
  0x3b   : >> { %222 = vst [vmem:[%s2249_s8 + $0x10] sm:$0xff] %v221_v2  ;;  %v225_v4 = vld [vmem:[%s2253_s9 + $0x38] sm:$0xff]  ;;  %224 = vst [vmem:[%s2249_s8 + $0x18] sm:$0xff] %v223_v3  ;;  %v229_v6 = vld [vmem:[%s2253_s9 + $0x48] sm:$0xff] }
  0x3c   : >> { %226 = vst [vmem:[%s2249_s8 + $0x20] sm:$0xff] %v225_v4  ;;  %228 = vst [vmem:[%s2249_s8 + $0x28] sm:$0xff] %v227_v5  ;;  %v231_v7 = vld [vmem:[%s2253_s9 + $0x50] sm:$0xff]  ;;  %v235_v9 = vld [vmem:[%s2253_s9 + $0x78] sm:$0xff]  ;;  %s3631_s17 = smov (%p362_p13, %s361_s17), 0 }
  0x3d   : >> { %v233_v8 = vld [vmem:[%s2253_s9 + $0x70] sm:$0xff]  ;;  %230 = vst [vmem:[%s2249_s8 + $0x30] sm:$0xff] %v229_v6  ;;  %232 = vst [vmem:[%s2249_s8 + $0x38] sm:$0xff] %v231_v7  ;;  %v237_v10 = vld [vmem:[%s2253_s9 + $0x80] sm:$0xff]  ;;  %s1672_s18 = sshll.u32 %s3631_s17, 5  ;;  %s3603_s10 = smov %s3631_s17 }
  0x3e   : >> { %234 = vst [vmem:[%s2249_s8 + $0x40] sm:$0xff] %v233_v8  ;;  %v239_v11 = vld [vmem:[%s2253_s9 + $0x88] sm:$0xff]  ;;  %236 = vst [vmem:[%s2249_s8 + $0x48] sm:$0xff] %v235_v9  ;;  %v243_v13 = vld [vmem:[%s2253_s9 + $0xb0] sm:$0xff]  ;;  %s2524_s21 = scalar_lea.vmem %s2442_s28, %s1672_s18   ;;  %s2527_s22 = scalar_lea.vmem %s2446_s4, %s1672_s18 [#allocation2]  }
  0x3f   : >> { %238 = vst [vmem:[%s2249_s8 + $0x50] sm:$0xff] %v237_v10  ;;  %240 = vst [vmem:[%s2249_s8 + $0x58] sm:$0xff] %v239_v11  ;;  %v241_v12 = vld [vmem:[%s2253_s9 + $0xa8] sm:$0xff]  ;;  %v245_v14 = vld [vmem:[%s2253_s9 + $0xb8] sm:$0xff] }
  0x40   : >> { %242 = vst [vmem:[%s2249_s8 + $0x60] sm:$0xff] %v241_v12  ;;  %244 = vst [vmem:[%s2249_s8 + $0x68] sm:$0xff] %v243_v13  ;;  %v247_v15 = vld [vmem:[%s2253_s9 + $0xc0] sm:$0xff]  ;;  %v251_v17 = vld [vmem:[%s2253_s9 + $0xe8] sm:$0xff] }
  0x41   : >> { %246 = vst [vmem:[%s2249_s8 + $0x70] sm:$0xff] %v245_v14  ;;  %v249_v16 = vld [vmem:[%s2253_s9 + $0xe0] sm:$0xff]  ;;  %248 = vst [vmem:[%s2249_s8 + $0x78] sm:$0xff] %v247_v15  ;;  %v253_v18 = vld [vmem:[%s2253_s9 + $0xf0] sm:$0xff] }
  0x42   : >> { %250 = vst [vmem:[%s2249_s8 + $0x80] sm:$0xff] %v249_v16  ;;  %252 = vst [vmem:[%s2249_s8 + $0x88] sm:$0xff] %v251_v17  ;;  %v255_v19 = vld [vmem:[%s2253_s9 + $0xf8] sm:$0xff]  ;;  %v259_v21 = vld [vmem:[%s2253_s9 + $0x120] sm:$0xff] }
  0x43   : >> { %v257_v20 = vld [vmem:[%s2253_s9 + $0x118] sm:$0xff]  ;;  %254 = vst [vmem:[%s2249_s8 + $0x90] sm:$0xff] %v253_v18  ;;  %256 = vst [vmem:[%s2249_s8 + $0x98] sm:$0xff] %v255_v19  ;;  %v261_v22 = vld [vmem:[%s2253_s9 + $0x128] sm:$0xff] }
  0x44   : >> { %258 = vst [vmem:[%s2249_s8 + $0xa0] sm:$0xff] %v257_v20  ;;  %v263_v23 = vld [vmem:[%s2253_s9 + $0x130] sm:$0xff]  ;;  %260 = vst [vmem:[%s2249_s8 + $0xa8] sm:$0xff] %v259_v21  ;;  %v267_v25 = vld [vmem:[%s2253_s9 + $0x158] sm:$0xff] }
  0x45   : >> { %262 = vst [vmem:[%s2249_s8 + $0xb0] sm:$0xff] %v261_v22  ;;  %264 = vst [vmem:[%s2249_s8 + $0xb8] sm:$0xff] %v263_v23  ;;  %v265_v24 = vld [vmem:[%s2253_s9 + $0x150] sm:$0xff]  ;;  %v269_v26 = vld [vmem:[%s2253_s9 + $0x160] sm:$0xff] }
  0x46   : >> { %266 = vst [vmem:[%s2249_s8 + $0xc0] sm:$0xff] %v265_v24  ;;  %268 = vst [vmem:[%s2249_s8 + $0xc8] sm:$0xff] %v267_v25  ;;  %v271_v27 = vld [vmem:[%s2253_s9 + $0x168] sm:$0xff]  ;;  %v275_v29 = vld [vmem:[%s2253_s9 + $0x190] sm:$0xff] }
  0x47   : >> { %270 = vst [vmem:[%s2249_s8 + $0xd0] sm:$0xff] %v269_v26  ;;  %v273_v28 = vld [vmem:[%s2253_s9 + $0x188] sm:$0xff]  ;;  %272 = vst [vmem:[%s2249_s8 + $0xd8] sm:$0xff] %v271_v27  ;;  %v277_v30 = vld [vmem:[%s2253_s9 + $0x198] sm:$0xff] }
  0x48   : >> { %274 = vst [vmem:[%s2249_s8 + $0xe0] sm:$0xff] %v273_v28  ;;  %276 = vst [vmem:[%s2249_s8 + $0xe8] sm:$0xff] %v275_v29  ;;  %v279_v31 = vld [vmem:[%s2253_s9 + $0x1a0] sm:$0xff]  ;;  %v283_v33 = vld [vmem:[%s2253_s9 + $0x1c8] sm:$0xff] }
  0x49   : >> { %v281_v32 = vld [vmem:[%s2253_s9 + $0x1c0] sm:$0xff]  ;;  %278 = vst [vmem:[%s2249_s8 + $0xf0] sm:$0xff] %v277_v30  ;;  %280 = vst [vmem:[%s2249_s8 + $0xf8] sm:$0xff] %v279_v31  ;;  %v285_v34 = vld [vmem:[%s2253_s9 + $0x1d0] sm:$0xff] }
  0x4a   : >> { %282 = vst [vmem:[%s2249_s8 + $0x100] sm:$0xff] %v281_v32  ;;  %v287_v35 = vld [vmem:[%s2253_s9 + $0x1d8] sm:$0xff]  ;;  %284 = vst [vmem:[%s2249_s8 + $0x108] sm:$0xff] %v283_v33  ;;  %v291_v37 = vld [vmem:[%s2253_s9 + $0x200] sm:$0xff] }
  0x4b   : >> { %286 = vst [vmem:[%s2249_s8 + $0x110] sm:$0xff] %v285_v34  ;;  %288 = vst [vmem:[%s2249_s8 + $0x118] sm:$0xff] %v287_v35  ;;  %v289_v36 = vld [vmem:[%s2253_s9 + $0x1f8] sm:$0xff]  ;;  %v293_v38 = vld [vmem:[%s2253_s9 + $0x208] sm:$0xff] }
  0x4c   : >> { %290 = vst [vmem:[%s2249_s8 + $0x120] sm:$0xff] %v289_v36  ;;  %292 = vst [vmem:[%s2249_s8 + $0x128] sm:$0xff] %v291_v37  ;;  %v295_v39 = vld [vmem:[%s2253_s9 + $0x210] sm:$0xff]  ;;  %v299_v41 = vld [vmem:[%s2253_s9 + $0x238] sm:$0xff] }
  0x4d   : >> { %294 = vst [vmem:[%s2249_s8 + $0x130] sm:$0xff] %v293_v38  ;;  %v297_v40 = vld [vmem:[%s2253_s9 + $0x230] sm:$0xff]  ;;  %296 = vst [vmem:[%s2249_s8 + $0x138] sm:$0xff] %v295_v39  ;;  %v301_v42 = vld [vmem:[%s2253_s9 + $0x240] sm:$0xff] }
  0x4e   : >> { %298 = vst [vmem:[%s2249_s8 + $0x140] sm:$0xff] %v297_v40  ;;  %300 = vst [vmem:[%s2249_s8 + $0x148] sm:$0xff] %v299_v41  ;;  %v303_v43 = vld [vmem:[%s2253_s9 + $0x248] sm:$0xff]  ;;  %v307_v45 = vld [vmem:[%s2253_s9 + $0x270] sm:$0xff] }
  0x4f   : >> { %v305_v44 = vld [vmem:[%s2253_s9 + $0x268] sm:$0xff]  ;;  %302 = vst [vmem:[%s2249_s8 + $0x150] sm:$0xff] %v301_v42  ;;  %304 = vst [vmem:[%s2249_s8 + $0x158] sm:$0xff] %v303_v43  ;;  %v309_v46 = vld [vmem:[%s2253_s9 + $0x278] sm:$0xff] }
  0x50   : >> { %306 = vst [vmem:[%s2249_s8 + $0x160] sm:$0xff] %v305_v44  ;;  %v311_v47 = vld [vmem:[%s2253_s9 + $0x280] sm:$0xff]  ;;  %308 = vst [vmem:[%s2249_s8 + $0x168] sm:$0xff] %v307_v45  ;;  %v315_v49 = vld [vmem:[%s2253_s9 + $0x2a8] sm:$0xff] }
  0x51   : >> { %310 = vst [vmem:[%s2249_s8 + $0x170] sm:$0xff] %v309_v46  ;;  %312 = vst [vmem:[%s2249_s8 + $0x178] sm:$0xff] %v311_v47  ;;  %v313_v48 = vld [vmem:[%s2253_s9 + $0x2a0] sm:$0xff]  ;;  %v317_v50 = vld [vmem:[%s2253_s9 + $0x2b0] sm:$0xff] }
  0x52   : >> { %314 = vst [vmem:[%s2249_s8 + $0x180] sm:$0xff] %v313_v48  ;;  %316 = vst [vmem:[%s2249_s8 + $0x188] sm:$0xff] %v315_v49  ;;  %v319_v51 = vld [vmem:[%s2253_s9 + $0x2b8] sm:$0xff]  ;;  %v323_v53 = vld [vmem:[%s2253_s9 + $0x2e0] sm:$0xff] }
  0x53   : >> { %318 = vst [vmem:[%s2249_s8 + $0x190] sm:$0xff] %v317_v50  ;;  %v321_v52 = vld [vmem:[%s2253_s9 + $0x2d8] sm:$0xff]  ;;  %320 = vst [vmem:[%s2249_s8 + $0x198] sm:$0xff] %v319_v51  ;;  %v325_v54 = vld [vmem:[%s2253_s9 + $0x2e8] sm:$0xff] }
  0x54   : >> { %322 = vst [vmem:[%s2249_s8 + $0x1a0] sm:$0xff] %v321_v52  ;;  %324 = vst [vmem:[%s2249_s8 + $0x1a8] sm:$0xff] %v323_v53  ;;  %v327_v55 = vld [vmem:[%s2253_s9 + $0x2f0] sm:$0xff]  ;;  %v331_v57 = vld [vmem:[%s2253_s9 + $0x318] sm:$0xff] }
  0x55   : >> { %v329_v56 = vld [vmem:[%s2253_s9 + $0x310] sm:$0xff]  ;;  %326 = vst [vmem:[%s2249_s8 + $0x1b0] sm:$0xff] %v325_v54  ;;  %328 = vst [vmem:[%s2249_s8 + $0x1b8] sm:$0xff] %v327_v55  ;;  %v333_v58 = vld [vmem:[%s2253_s9 + $0x320] sm:$0xff] }
  0x56   : >> { %330 = vst [vmem:[%s2249_s8 + $0x1c0] sm:$0xff] %v329_v56  ;;  %v335_v59 = vld [vmem:[%s2253_s9 + $0x328] sm:$0xff]  ;;  %332 = vst [vmem:[%s2249_s8 + $0x1c8] sm:$0xff] %v331_v57  ;;  %v339_v61 = vld [vmem:[%s2253_s9 + $0x350] sm:$0xff] }
  0x57   : >> { %334 = vst [vmem:[%s2249_s8 + $0x1d0] sm:$0xff] %v333_v58  ;;  %336 = vst [vmem:[%s2249_s8 + $0x1d8] sm:$0xff] %v335_v59  ;;  %v337_v60 = vld [vmem:[%s2253_s9 + $0x348] sm:$0xff]  ;;  %v341_v62 = vld [vmem:[%s2253_s9 + $0x358] sm:$0xff]  ;;  %213 = sbr.rel (!%p210_p0) target bundleno = 57 (0x39), region = 235 }
  0x58   : >> { %338 = vst [vmem:[%s2249_s8 + $0x1e0] sm:$0xff] %v337_v60  ;;  %340 = vst [vmem:[%s2249_s8 + $0x1e8] sm:$0xff] %v339_v61  ;;  %v343_v63 = vld [vmem:[%s2253_s9 + $0x360] sm:$0xff]  ;;  %v347_v1 = vld [vmem:[%s2253_s9 + $0x388] sm:$0xff] }
  0x59   : >> { %342 = vst [vmem:[%s2249_s8 + $0x1f0] sm:$0xff] %v341_v62  ;;  %v345_v0 = vld [vmem:[%s2253_s9 + $0x380] sm:$0xff]  ;;  %344 = vst [vmem:[%s2249_s8 + $0x1f8] sm:$0xff] %v343_v63  ;;  %v349_v2 = vld [vmem:[%s2253_s9 + $0x390] sm:$0xff] }
  0x5a   : >> { %346 = vst [vmem:[%s2249_s8 + $0x200] sm:$0xff] %v345_v0  ;;  %348 = vst [vmem:[%s2249_s8 + $0x208] sm:$0xff] %v347_v1  ;;  %v351_v3 = vld [vmem:[%s2253_s9 + $0x398] sm:$0xff]  ;;  %v355_v5 = vld [vmem:[%s2253_s9 + $0x3c0] sm:$0xff] }
  0x5b   : >> { %v353_v4 = vld [vmem:[%s2253_s9 + $0x3b8] sm:$0xff]  ;;  %350 = vst [vmem:[%s2249_s8 + $0x210] sm:$0xff] %v349_v2  ;;  %352 = vst [vmem:[%s2249_s8 + $0x218] sm:$0xff] %v351_v3  ;;  %v357_v6 = vld [vmem:[%s2253_s9 + $0x3c8] sm:$0xff] }
  0x5c   : >> { %354 = vst [vmem:[%s2249_s8 + $0x220] sm:$0xff] %v353_v4  ;;  %v359_v7 = vld [vmem:[%s2253_s9 + $0x3d0] sm:$0xff]  ;;  %356 = vst [vmem:[%s2249_s8 + $0x228] sm:$0xff] %v355_v5  ;;  %s3602_s9 = smov %s2524_s21 }
  0x5d   : >> { %358 = vst [vmem:[%s2249_s8 + $0x230] sm:$0xff] %v357_v6  ;;  %360 = vst [vmem:[%s2249_s8 + $0x238] sm:$0xff] %v359_v7  ;;  %s3601_s8 = smov %s2527_s22 }
  0x5e PF: > { %s2649_s23 = sand.u32 3, %s204_s6   ;;  %s1726_s24 = sshll.u32 %s2457_s7, 9 }
  0x5f   : > { %s372_s25 = sshra.s32 %s1726_s24, 4  ;;  %p1677_p1 = scmp.le.s32.totalorder %s2649_s23, 0 }
  0x60   : > { %s2653_s26 = scalar_lea.vmem %s2442_s28, %s372_s25   ;;  %s2656_s27 = scalar_lea.vmem %s2446_s4, %s372_s25 [#allocation2]  }
  0x61   : > { %1548 = sbr.rel (%p1677_p1) target bundleno = 114 (0x72), region = 240  ;;  %s3604_s29 = smov (!%p1677_p1), %s2656_s27 }
  0x62   : > { %s3605_s8 = smov (!%p1677_p1), %s2653_s26  ;;  %s2665_s9 = smov (!%p1677_p1), 0  }
  0x63   : > { %s2667_s10 = smov (!%p1677_p1), 0  }
  0x68 LB: >> { %v388_v8 = vld [vmem:[%s2269_s8] sm:$0xff]  ;;  %v390_v9 = vld [vmem:[%s2269_s8 + $0x38] sm:$0xff]  ;;  %v392_v10 = vld [vmem:[%s2269_s8 + $0x70] sm:$0xff]  ;;  %s424_s6 = sadd.s32 1, %s2273_s9  ;;  %s382_s10 = sadd.s32 1, %s2277_s10   ;;  %s2277_s10 = sphi %s2667_s10, %s382_s10   ;;  %s2273_s9 = sphi %s2665_s9, %s3606_s9   ;;  %s2269_s8 = sphi %s3605_s8, %s429_s8   ;;  %s2265_s29 = sphi %s3604_s29, %s430_s29  }
  0x69   : >> { %389 = vst [vmem:[%s2265_s29] sm:$0xff] %v388_v8  ;;  %391 = vst [vmem:[%s2265_s29 + $0x20] sm:$0xff] %v390_v9  ;;  %v394_v11 = vld [vmem:[%s2269_s8 + $0xa8] sm:$0xff]  ;;  %v396_v12 = vld [vmem:[%s2269_s8 + $0xe0] sm:$0xff]  ;;  %p425_p2 = scmp.ge.s32.totalorder %s424_s6, %s2649_s23  ;;  %p381_p3 = scmp.ge.s32.totalorder %s382_s10, %s2649_s23 }
  0x6a   : >> { %393 = vst [vmem:[%s2265_s29 + $0x40] sm:$0xff] %v392_v10  ;;  %v398_v13 = vld [vmem:[%s2269_s8 + $0x118] sm:$0xff]  ;;  %395 = vst [vmem:[%s2265_s29 + $0x60] sm:$0xff] %v394_v11  ;;  %v400_v14 = vld [vmem:[%s2269_s8 + $0x150] sm:$0xff] }
  0x6b   : >> { %397 = vst [vmem:[%s2265_s29 + $0x80] sm:$0xff] %v396_v12  ;;  %399 = vst [vmem:[%s2265_s29 + $0xa0] sm:$0xff] %v398_v13  ;;  %v402_v15 = vld [vmem:[%s2269_s8 + $0x188] sm:$0xff]  ;;  %v404_v16 = vld [vmem:[%s2269_s8 + $0x1c0] sm:$0xff]  ;;  %s3633_s6 = smov (%p425_p2, %s424_s6), 0  ;;  %384 = sbr.rel (!%p381_p3) target bundleno = 104 (0x68), region = 246 }
  0x6c   : >> { %401 = vst [vmem:[%s2265_s29 + $0xc0] sm:$0xff] %v400_v14  ;;  %403 = vst [vmem:[%s2265_s29 + $0xe0] sm:$0xff] %v402_v15  ;;  %v406_v17 = vld [vmem:[%s2269_s8 + $0x1f8] sm:$0xff]  ;;  %v408_v18 = vld [vmem:[%s2269_s8 + $0x230] sm:$0xff]  ;;  %s1678_s7 = sshll.u32 %s3633_s6, 3  ;;  %s3606_s9 = smov %s3633_s6 }
  0x6d   : >> { %405 = vst [vmem:[%s2265_s29 + $0x100] sm:$0xff] %v404_v16  ;;  %v410_v19 = vld [vmem:[%s2269_s8 + $0x268] sm:$0xff]  ;;  %407 = vst [vmem:[%s2265_s29 + $0x120] sm:$0xff] %v406_v17  ;;  %v412_v20 = vld [vmem:[%s2269_s8 + $0x2a0] sm:$0xff] }
  0x6e   : >> { %409 = vst [vmem:[%s2265_s29 + $0x140] sm:$0xff] %v408_v18  ;;  %411 = vst [vmem:[%s2265_s29 + $0x160] sm:$0xff] %v410_v19  ;;  %v414_v21 = vld [vmem:[%s2269_s8 + $0x2d8] sm:$0xff]  ;;  %v416_v22 = vld [vmem:[%s2269_s8 + $0x310] sm:$0xff] }
  0x6f   : >> { %413 = vst [vmem:[%s2265_s29 + $0x180] sm:$0xff] %v412_v20  ;;  %415 = vst [vmem:[%s2265_s29 + $0x1a0] sm:$0xff] %v414_v21  ;;  %v418_v23 = vld [vmem:[%s2269_s8 + $0x348] sm:$0xff]  ;;  %v420_v24 = vld [vmem:[%s2269_s8 + $0x380] sm:$0xff] }
  0x70   : >> { %417 = vst [vmem:[%s2265_s29 + $0x1c0] sm:$0xff] %v416_v22  ;;  %v422_v25 = vld [vmem:[%s2269_s8 + $0x3b8] sm:$0xff]  ;;  %419 = vst [vmem:[%s2265_s29 + $0x1e0] sm:$0xff] %v418_v23  ;;  %s429_s8 = scalar_lea.vmem %s2653_s26, %s1678_s7  }
  0x71   : >> { %421 = vst [vmem:[%s2265_s29 + $0x200] sm:$0xff] %v420_v24  ;;  %423 = vst [vmem:[%s2265_s29 + $0x220] sm:$0xff] %v422_v25  ;;  %s430_s29 = scalar_lea.vmem %s2656_s27, %s1678_s7 [#allocation2]  }
  0x72 PF: > { %433 = sbr.rel (%p200_p10) target bundleno = 205 (0xcd), region = 69  ;;  %s435_s11 = ssub.s32 (!%p200_p10), %s2444_s30, %s2450_s5 }
  0x73   : > { %s439_s17 = sshrl.u32 (!%p200_p10), %s2444_s30, 3  ;;  %s2734_s18 = scalar_lea.vmem (!%p200_p10), %s2442_s28, %s435_s11 }
  0x74   : > { %s2737_s21 = scalar_lea.vmem (!%p200_p10), %s2446_s4, %s435_s11 [#allocation2]  ;;  %s2741_s22 = sshrl.u32 (!%p200_p10), %s439_s17, 2 }
  0x75   : > { %p1680_p4 = scmp.le.s32.totalorder (!%p200_p10), %s2741_s22, 0 }
  0x79   : > { %1562 = sbr.rel (%p1680_p4) target bundleno = 165 (0xa5), region = 251  ;;  %s3607_s23 = smov (!%p1680_p4), %s2446_s4 }
  0x7a   : > { %s3608_s24 = smov (!%p1680_p4), %s2442_s28  ;;  %s2750_s25 = smov (!%p1680_p4), 0  }
  0x7b   : > { %s2752_s26 = smov (!%p1680_p4), 0  }
  0x80 LB: >> { %v452_v26 = vld [vmem:[%s2285_s24] sm:$0xff]  ;;  %v454_v27 = vld [vmem:[%s2285_s24 + $0x8] sm:$0xff]  ;;  %v456_v28 = vld [vmem:[%s2285_s24 + $0x10] sm:$0xff]  ;;  %s596_s27 = sadd.s32 1, %s2289_s25  ;;  %s446_s26 = sadd.s32 1, %s2293_s26   ;;  %s2293_s26 = sphi %s2752_s26, %s446_s26   ;;  %s2289_s25 = sphi %s2750_s25, %s3611_s25   ;;  %s2285_s24 = sphi %s3608_s24, %s3610_s24   ;;  %s2281_s23 = sphi %s3607_s23, %s3609_s23  }
  0x81   : >> { %453 = vst [vmem:[%s2281_s23] sm:$0xff] %v452_v26  ;;  %455 = vst [vmem:[%s2281_s23 + $0x8] sm:$0xff] %v454_v27  ;;  %v458_v29 = vld [vmem:[%s2285_s24 + $0x18] sm:$0xff]  ;;  %v462_v31 = vld [vmem:[%s2285_s24 + $0x40] sm:$0xff]  ;;  %p597_p6 = scmp.ge.s32.totalorder %s596_s27, %s2741_s22  ;;  %p445_p7 = scmp.ge.s32.totalorder %s446_s26, %s2741_s22 }
  0x82   : >> { %457 = vst [vmem:[%s2281_s23 + $0x10] sm:$0xff] %v456_v28  ;;  %v460_v30 = vld [vmem:[%s2285_s24 + $0x38] sm:$0xff]  ;;  %459 = vst [vmem:[%s2281_s23 + $0x18] sm:$0xff] %v458_v29  ;;  %v464_v32 = vld [vmem:[%s2285_s24 + $0x48] sm:$0xff] }
  0x83   : >> { %461 = vst [vmem:[%s2281_s23 + $0x20] sm:$0xff] %v460_v30  ;;  %463 = vst [vmem:[%s2281_s23 + $0x28] sm:$0xff] %v462_v31  ;;  %v466_v33 = vld [vmem:[%s2285_s24 + $0x50] sm:$0xff]  ;;  %v470_v35 = vld [vmem:[%s2285_s24 + $0x78] sm:$0xff]  ;;  %s3635_s27 = smov (%p597_p6, %s596_s27), 0 }
  0x84   : >> { %v468_v34 = vld [vmem:[%s2285_s24 + $0x70] sm:$0xff]  ;;  %465 = vst [vmem:[%s2281_s23 + $0x30] sm:$0xff] %v464_v32  ;;  %467 = vst [vmem:[%s2281_s23 + $0x38] sm:$0xff] %v466_v33  ;;  %v472_v36 = vld [vmem:[%s2285_s24 + $0x80] sm:$0xff]  ;;  %s1681_s29 = sshll.u32 %s3635_s27, 5  ;;  %s3611_s25 = smov %s3635_s27 }
  0x85   : >> { %469 = vst [vmem:[%s2281_s23 + $0x40] sm:$0xff] %v468_v34  ;;  %v474_v37 = vld [vmem:[%s2285_s24 + $0x88] sm:$0xff]  ;;  %471 = vst [vmem:[%s2281_s23 + $0x48] sm:$0xff] %v470_v35  ;;  %v478_v39 = vld [vmem:[%s2285_s24 + $0xb0] sm:$0xff]  ;;  %s2808_s8 = scalar_lea.vmem %s2442_s28, %s1681_s29   ;;  %s2811_s9 = scalar_lea.vmem %s2446_s4, %s1681_s29 [#allocation2]  }
  0x86   : >> { %473 = vst [vmem:[%s2281_s23 + $0x50] sm:$0xff] %v472_v36  ;;  %475 = vst [vmem:[%s2281_s23 + $0x58] sm:$0xff] %v474_v37  ;;  %v476_v38 = vld [vmem:[%s2285_s24 + $0xa8] sm:$0xff]  ;;  %v480_v40 = vld [vmem:[%s2285_s24 + $0xb8] sm:$0xff] }
  0x87   : >> { %477 = vst [vmem:[%s2281_s23 + $0x60] sm:$0xff] %v476_v38  ;;  %479 = vst [vmem:[%s2281_s23 + $0x68] sm:$0xff] %v478_v39  ;;  %v482_v41 = vld [vmem:[%s2285_s24 + $0xc0] sm:$0xff]  ;;  %v486_v43 = vld [vmem:[%s2285_s24 + $0xe8] sm:$0xff] }
  0x88   : >> { %481 = vst [vmem:[%s2281_s23 + $0x70] sm:$0xff] %v480_v40  ;;  %v484_v42 = vld [vmem:[%s2285_s24 + $0xe0] sm:$0xff]  ;;  %483 = vst [vmem:[%s2281_s23 + $0x78] sm:$0xff] %v482_v41  ;;  %v488_v44 = vld [vmem:[%s2285_s24 + $0xf0] sm:$0xff] }
  0x89   : >> { %485 = vst [vmem:[%s2281_s23 + $0x80] sm:$0xff] %v484_v42  ;;  %487 = vst [vmem:[%s2281_s23 + $0x88] sm:$0xff] %v486_v43  ;;  %v490_v45 = vld [vmem:[%s2285_s24 + $0xf8] sm:$0xff]  ;;  %v494_v47 = vld [vmem:[%s2285_s24 + $0x120] sm:$0xff] }
  0x8a   : >> { %v492_v46 = vld [vmem:[%s2285_s24 + $0x118] sm:$0xff]  ;;  %489 = vst [vmem:[%s2281_s23 + $0x90] sm:$0xff] %v488_v44  ;;  %491 = vst [vmem:[%s2281_s23 + $0x98] sm:$0xff] %v490_v45  ;;  %v496_v48 = vld [vmem:[%s2285_s24 + $0x128] sm:$0xff] }
  0x8b   : >> { %493 = vst [vmem:[%s2281_s23 + $0xa0] sm:$0xff] %v492_v46  ;;  %v498_v49 = vld [vmem:[%s2285_s24 + $0x130] sm:$0xff]  ;;  %495 = vst [vmem:[%s2281_s23 + $0xa8] sm:$0xff] %v494_v47  ;;  %v502_v51 = vld [vmem:[%s2285_s24 + $0x158] sm:$0xff] }
  0x8c   : >> { %497 = vst [vmem:[%s2281_s23 + $0xb0] sm:$0xff] %v496_v48  ;;  %499 = vst [vmem:[%s2281_s23 + $0xb8] sm:$0xff] %v498_v49  ;;  %v500_v50 = vld [vmem:[%s2285_s24 + $0x150] sm:$0xff]  ;;  %v504_v52 = vld [vmem:[%s2285_s24 + $0x160] sm:$0xff] }
  0x8d   : >> { %501 = vst [vmem:[%s2281_s23 + $0xc0] sm:$0xff] %v500_v50  ;;  %503 = vst [vmem:[%s2281_s23 + $0xc8] sm:$0xff] %v502_v51  ;;  %v506_v53 = vld [vmem:[%s2285_s24 + $0x168] sm:$0xff]  ;;  %v510_v55 = vld [vmem:[%s2285_s24 + $0x190] sm:$0xff] }
  0x8e   : >> { %505 = vst [vmem:[%s2281_s23 + $0xd0] sm:$0xff] %v504_v52  ;;  %v508_v54 = vld [vmem:[%s2285_s24 + $0x188] sm:$0xff]  ;;  %507 = vst [vmem:[%s2281_s23 + $0xd8] sm:$0xff] %v506_v53  ;;  %v512_v56 = vld [vmem:[%s2285_s24 + $0x198] sm:$0xff] }
  0x8f   : >> { %509 = vst [vmem:[%s2281_s23 + $0xe0] sm:$0xff] %v508_v54  ;;  %511 = vst [vmem:[%s2281_s23 + $0xe8] sm:$0xff] %v510_v55  ;;  %v514_v57 = vld [vmem:[%s2285_s24 + $0x1a0] sm:$0xff]  ;;  %v518_v59 = vld [vmem:[%s2285_s24 + $0x1c8] sm:$0xff] }
  0x90   : >> { %v516_v58 = vld [vmem:[%s2285_s24 + $0x1c0] sm:$0xff]  ;;  %513 = vst [vmem:[%s2281_s23 + $0xf0] sm:$0xff] %v512_v56  ;;  %515 = vst [vmem:[%s2281_s23 + $0xf8] sm:$0xff] %v514_v57  ;;  %v520_v60 = vld [vmem:[%s2285_s24 + $0x1d0] sm:$0xff] }
  0x91   : >> { %517 = vst [vmem:[%s2281_s23 + $0x100] sm:$0xff] %v516_v58  ;;  %v522_v61 = vld [vmem:[%s2285_s24 + $0x1d8] sm:$0xff]  ;;  %519 = vst [vmem:[%s2281_s23 + $0x108] sm:$0xff] %v518_v59  ;;  %v526_v63 = vld [vmem:[%s2285_s24 + $0x200] sm:$0xff] }
  0x92   : >> { %521 = vst [vmem:[%s2281_s23 + $0x110] sm:$0xff] %v520_v60  ;;  %523 = vst [vmem:[%s2281_s23 + $0x118] sm:$0xff] %v522_v61  ;;  %v524_v62 = vld [vmem:[%s2285_s24 + $0x1f8] sm:$0xff]  ;;  %v528_v0 = vld [vmem:[%s2285_s24 + $0x208] sm:$0xff] }
  0x93   : >> { %525 = vst [vmem:[%s2281_s23 + $0x120] sm:$0xff] %v524_v62  ;;  %527 = vst [vmem:[%s2281_s23 + $0x128] sm:$0xff] %v526_v63  ;;  %v530_v1 = vld [vmem:[%s2285_s24 + $0x210] sm:$0xff]  ;;  %v534_v3 = vld [vmem:[%s2285_s24 + $0x238] sm:$0xff] }
  0x94   : >> { %529 = vst [vmem:[%s2281_s23 + $0x130] sm:$0xff] %v528_v0  ;;  %v532_v2 = vld [vmem:[%s2285_s24 + $0x230] sm:$0xff]  ;;  %531 = vst [vmem:[%s2281_s23 + $0x138] sm:$0xff] %v530_v1  ;;  %v536_v4 = vld [vmem:[%s2285_s24 + $0x240] sm:$0xff] }
  0x95   : >> { %533 = vst [vmem:[%s2281_s23 + $0x140] sm:$0xff] %v532_v2  ;;  %535 = vst [vmem:[%s2281_s23 + $0x148] sm:$0xff] %v534_v3  ;;  %v538_v5 = vld [vmem:[%s2285_s24 + $0x248] sm:$0xff]  ;;  %v542_v7 = vld [vmem:[%s2285_s24 + $0x270] sm:$0xff] }
  0x96   : >> { %v540_v6 = vld [vmem:[%s2285_s24 + $0x268] sm:$0xff]  ;;  %537 = vst [vmem:[%s2281_s23 + $0x150] sm:$0xff] %v536_v4  ;;  %539 = vst [vmem:[%s2281_s23 + $0x158] sm:$0xff] %v538_v5  ;;  %v544_v8 = vld [vmem:[%s2285_s24 + $0x278] sm:$0xff] }
  0x97   : >> { %541 = vst [vmem:[%s2281_s23 + $0x160] sm:$0xff] %v540_v6  ;;  %v546_v9 = vld [vmem:[%s2285_s24 + $0x280] sm:$0xff]  ;;  %543 = vst [vmem:[%s2281_s23 + $0x168] sm:$0xff] %v542_v7  ;;  %v550_v11 = vld [vmem:[%s2285_s24 + $0x2a8] sm:$0xff] }
  0x98   : >> { %545 = vst [vmem:[%s2281_s23 + $0x170] sm:$0xff] %v544_v8  ;;  %547 = vst [vmem:[%s2281_s23 + $0x178] sm:$0xff] %v546_v9  ;;  %v548_v10 = vld [vmem:[%s2285_s24 + $0x2a0] sm:$0xff]  ;;  %v552_v12 = vld [vmem:[%s2285_s24 + $0x2b0] sm:$0xff] }
  0x99   : >> { %549 = vst [vmem:[%s2281_s23 + $0x180] sm:$0xff] %v548_v10  ;;  %551 = vst [vmem:[%s2281_s23 + $0x188] sm:$0xff] %v550_v11  ;;  %v554_v13 = vld [vmem:[%s2285_s24 + $0x2b8] sm:$0xff]  ;;  %v558_v15 = vld [vmem:[%s2285_s24 + $0x2e0] sm:$0xff] }
  0x9a   : >> { %553 = vst [vmem:[%s2281_s23 + $0x190] sm:$0xff] %v552_v12  ;;  %v556_v14 = vld [vmem:[%s2285_s24 + $0x2d8] sm:$0xff]  ;;  %555 = vst [vmem:[%s2281_s23 + $0x198] sm:$0xff] %v554_v13  ;;  %v560_v16 = vld [vmem:[%s2285_s24 + $0x2e8] sm:$0xff] }
  0x9b   : >> { %557 = vst [vmem:[%s2281_s23 + $0x1a0] sm:$0xff] %v556_v14  ;;  %559 = vst [vmem:[%s2281_s23 + $0x1a8] sm:$0xff] %v558_v15  ;;  %v562_v17 = vld [vmem:[%s2285_s24 + $0x2f0] sm:$0xff]  ;;  %v566_v19 = vld [vmem:[%s2285_s24 + $0x318] sm:$0xff] }
  0x9c   : >> { %v564_v18 = vld [vmem:[%s2285_s24 + $0x310] sm:$0xff]  ;;  %561 = vst [vmem:[%s2281_s23 + $0x1b0] sm:$0xff] %v560_v16  ;;  %563 = vst [vmem:[%s2281_s23 + $0x1b8] sm:$0xff] %v562_v17  ;;  %v568_v20 = vld [vmem:[%s2285_s24 + $0x320] sm:$0xff] }
  0x9d   : >> { %565 = vst [vmem:[%s2281_s23 + $0x1c0] sm:$0xff] %v564_v18  ;;  %v570_v21 = vld [vmem:[%s2285_s24 + $0x328] sm:$0xff]  ;;  %567 = vst [vmem:[%s2281_s23 + $0x1c8] sm:$0xff] %v566_v19  ;;  %v574_v23 = vld [vmem:[%s2285_s24 + $0x350] sm:$0xff] }
  0x9e   : >> { %569 = vst [vmem:[%s2281_s23 + $0x1d0] sm:$0xff] %v568_v20  ;;  %571 = vst [vmem:[%s2281_s23 + $0x1d8] sm:$0xff] %v570_v21  ;;  %v572_v22 = vld [vmem:[%s2285_s24 + $0x348] sm:$0xff]  ;;  %v576_v24 = vld [vmem:[%s2285_s24 + $0x358] sm:$0xff]  ;;  %448 = sbr.rel (!%p445_p7) target bundleno = 128 (0x80), region = 257 }
  0x9f   : >> { %573 = vst [vmem:[%s2281_s23 + $0x1e0] sm:$0xff] %v572_v22  ;;  %575 = vst [vmem:[%s2281_s23 + $0x1e8] sm:$0xff] %v574_v23  ;;  %v578_v25 = vld [vmem:[%s2285_s24 + $0x360] sm:$0xff]  ;;  %v582_v27 = vld [vmem:[%s2285_s24 + $0x388] sm:$0xff] }
  0xa0   : >> { %577 = vst [vmem:[%s2281_s23 + $0x1f0] sm:$0xff] %v576_v24  ;;  %v580_v26 = vld [vmem:[%s2285_s24 + $0x380] sm:$0xff]  ;;  %579 = vst [vmem:[%s2281_s23 + $0x1f8] sm:$0xff] %v578_v25  ;;  %v584_v28 = vld [vmem:[%s2285_s24 + $0x390] sm:$0xff] }
  0xa1   : >> { %581 = vst [vmem:[%s2281_s23 + $0x200] sm:$0xff] %v580_v26  ;;  %583 = vst [vmem:[%s2281_s23 + $0x208] sm:$0xff] %v582_v27  ;;  %v586_v29 = vld [vmem:[%s2285_s24 + $0x398] sm:$0xff]  ;;  %v590_v31 = vld [vmem:[%s2285_s24 + $0x3c0] sm:$0xff] }
  0xa2   : >> { %v588_v30 = vld [vmem:[%s2285_s24 + $0x3b8] sm:$0xff]  ;;  %585 = vst [vmem:[%s2281_s23 + $0x210] sm:$0xff] %v584_v28  ;;  %587 = vst [vmem:[%s2281_s23 + $0x218] sm:$0xff] %v586_v29  ;;  %v592_v32 = vld [vmem:[%s2285_s24 + $0x3c8] sm:$0xff] }
  0xa3   : >> { %589 = vst [vmem:[%s2281_s23 + $0x220] sm:$0xff] %v588_v30  ;;  %v594_v33 = vld [vmem:[%s2285_s24 + $0x3d0] sm:$0xff]  ;;  %591 = vst [vmem:[%s2281_s23 + $0x228] sm:$0xff] %v590_v31  ;;  %s3610_s24 = smov %s2808_s8 }
  0xa4   : >> { %593 = vst [vmem:[%s2281_s23 + $0x230] sm:$0xff] %v592_v32  ;;  %595 = vst [vmem:[%s2281_s23 + $0x238] sm:$0xff] %v594_v33  ;;  %s3609_s23 = smov %s2811_s9 }
  0xa5 PF: > { %s2933_s10 = sand.u32 3, %s439_s17   ;;  %s1728_s6 = sshll.u32 %s2741_s22, 9 }
  0xa6   : > { %s607_s7 = sshra.s32 %s1728_s6, 4  ;;  %p1686_p8 = scmp.le.s32.totalorder %s2933_s10, 0 }
  0xa7   : > { %s2937_s11 = scalar_lea.vmem %s2442_s28, %s607_s7   ;;  %s2940_s29 = scalar_lea.vmem %s2446_s4, %s607_s7 [#allocation2]  }
  0xa8   : > { %1576 = sbr.rel (%p1686_p8) target bundleno = 185 (0xb9), region = 262  ;;  %s3612_s23 = smov (!%p1686_p8), %s2940_s29 }
  0xa9   : > { %s3613_s24 = smov (!%p1686_p8), %s2937_s11  ;;  %s2949_s25 = smov (!%p1686_p8), 0  }
  0xaa   : > { %s2951_s26 = smov (!%p1686_p8), 0  }
  0xaf LB: >> { %v623_v34 = vld [vmem:[%s2301_s24] sm:$0xff]  ;;  %v625_v35 = vld [vmem:[%s2301_s24 + $0x38] sm:$0xff]  ;;  %v627_v36 = vld [vmem:[%s2301_s24 + $0x70] sm:$0xff]  ;;  %s659_s17 = sadd.s32 1, %s2305_s25  ;;  %s617_s26 = sadd.s32 1, %s2309_s26   ;;  %s2309_s26 = sphi %s2951_s26, %s617_s26   ;;  %s2305_s25 = sphi %s2949_s25, %s3614_s25   ;;  %s2301_s24 = sphi %s3613_s24, %s664_s24   ;;  %s2297_s23 = sphi %s3612_s23, %s665_s23  }
  0xb0   : >> { %624 = vst [vmem:[%s2297_s23] sm:$0xff] %v623_v34  ;;  %626 = vst [vmem:[%s2297_s23 + $0x20] sm:$0xff] %v625_v35  ;;  %v629_v37 = vld [vmem:[%s2301_s24 + $0xa8] sm:$0xff]  ;;  %v631_v38 = vld [vmem:[%s2301_s24 + $0xe0] sm:$0xff]  ;;  %p660_p9 = scmp.ge.s32.totalorder %s659_s17, %s2933_s10  ;;  %p616_p10 = scmp.ge.s32.totalorder %s617_s26, %s2933_s10 }
  0xb1   : >> { %628 = vst [vmem:[%s2297_s23 + $0x40] sm:$0xff] %v627_v36  ;;  %v633_v39 = vld [vmem:[%s2301_s24 + $0x118] sm:$0xff]  ;;  %630 = vst [vmem:[%s2297_s23 + $0x60] sm:$0xff] %v629_v37  ;;  %v635_v40 = vld [vmem:[%s2301_s24 + $0x150] sm:$0xff] }
  0xb2   : >> { %632 = vst [vmem:[%s2297_s23 + $0x80] sm:$0xff] %v631_v38  ;;  %634 = vst [vmem:[%s2297_s23 + $0xa0] sm:$0xff] %v633_v39  ;;  %v637_v41 = vld [vmem:[%s2301_s24 + $0x188] sm:$0xff]  ;;  %v639_v42 = vld [vmem:[%s2301_s24 + $0x1c0] sm:$0xff]  ;;  %s3637_s17 = smov (%p660_p9, %s659_s17), 0  ;;  %619 = sbr.rel (!%p616_p10) target bundleno = 175 (0xaf), region = 268 }
  0xb3   : >> { %636 = vst [vmem:[%s2297_s23 + $0xc0] sm:$0xff] %v635_v40  ;;  %638 = vst [vmem:[%s2297_s23 + $0xe0] sm:$0xff] %v637_v41  ;;  %v641_v43 = vld [vmem:[%s2301_s24 + $0x1f8] sm:$0xff]  ;;  %v643_v44 = vld [vmem:[%s2301_s24 + $0x230] sm:$0xff]  ;;  %s1687_s22 = sshll.u32 %s3637_s17, 3  ;;  %s3614_s25 = smov %s3637_s17 }
  0xb4   : >> { %640 = vst [vmem:[%s2297_s23 + $0x100] sm:$0xff] %v639_v42  ;;  %v645_v45 = vld [vmem:[%s2301_s24 + $0x268] sm:$0xff]  ;;  %642 = vst [vmem:[%s2297_s23 + $0x120] sm:$0xff] %v641_v43  ;;  %v647_v46 = vld [vmem:[%s2301_s24 + $0x2a0] sm:$0xff] }
  0xb5   : >> { %644 = vst [vmem:[%s2297_s23 + $0x140] sm:$0xff] %v643_v44  ;;  %646 = vst [vmem:[%s2297_s23 + $0x160] sm:$0xff] %v645_v45  ;;  %v649_v47 = vld [vmem:[%s2301_s24 + $0x2d8] sm:$0xff]  ;;  %v651_v48 = vld [vmem:[%s2301_s24 + $0x310] sm:$0xff] }
  0xb6   : >> { %648 = vst [vmem:[%s2297_s23 + $0x180] sm:$0xff] %v647_v46  ;;  %650 = vst [vmem:[%s2297_s23 + $0x1a0] sm:$0xff] %v649_v47  ;;  %v653_v49 = vld [vmem:[%s2301_s24 + $0x348] sm:$0xff]  ;;  %v655_v50 = vld [vmem:[%s2301_s24 + $0x380] sm:$0xff] }
  0xb7   : >> { %652 = vst [vmem:[%s2297_s23 + $0x1c0] sm:$0xff] %v651_v48  ;;  %v657_v51 = vld [vmem:[%s2301_s24 + $0x3b8] sm:$0xff]  ;;  %654 = vst [vmem:[%s2297_s23 + $0x1e0] sm:$0xff] %v653_v49  ;;  %s664_s24 = scalar_lea.vmem %s2937_s11, %s1687_s22  }
  0xb8   : >> { %656 = vst [vmem:[%s2297_s23 + $0x200] sm:$0xff] %v655_v50  ;;  %658 = vst [vmem:[%s2297_s23 + $0x220] sm:$0xff] %v657_v51  ;;  %s665_s23 = scalar_lea.vmem %s2940_s29, %s1687_s22 [#allocation2]  }
  0xb9 PF: > { %s2375_s27 = smov 0  }
  0xba   : > { %s3013_s8 = sshllo.u32 %s2375_s27, %s2450_s5 }
  0xbb   : > { %v675_v52 = vld [vmem:[%s2734_s18] sm:%s3013_s8]  ;;  %v677_v53 = vld [vmem:[%s2734_s18 + $0x38] sm:%s3013_s8] }
  0xbc   : > { %676 = vst [vmem:[%s2737_s21] sm:%s3013_s8] %v675_v52  ;;  %678 = vst [vmem:[%s2737_s21 + $0x20] sm:%s3013_s8] %v677_v53 }
  0xbd   : > { %v679_v54 = vld [vmem:[%s2734_s18 + $0x70] sm:%s3013_s8]  ;;  %v681_v55 = vld [vmem:[%s2734_s18 + $0xa8] sm:%s3013_s8] }
  0xbe   : > { %680 = vst [vmem:[%s2737_s21 + $0x40] sm:%s3013_s8] %v679_v54  ;;  %682 = vst [vmem:[%s2737_s21 + $0x60] sm:%s3013_s8] %v681_v55 }
  0xbf   : > { %v683_v56 = vld [vmem:[%s2734_s18 + $0xe0] sm:%s3013_s8]  ;;  %v685_v57 = vld [vmem:[%s2734_s18 + $0x118] sm:%s3013_s8] }
  0xc0   : > { %684 = vst [vmem:[%s2737_s21 + $0x80] sm:%s3013_s8] %v683_v56  ;;  %686 = vst [vmem:[%s2737_s21 + $0xa0] sm:%s3013_s8] %v685_v57 }
  0xc1   : > { %v687_v58 = vld [vmem:[%s2734_s18 + $0x150] sm:%s3013_s8]  ;;  %v689_v59 = vld [vmem:[%s2734_s18 + $0x188] sm:%s3013_s8] }
  0xc2   : > { %688 = vst [vmem:[%s2737_s21 + $0xc0] sm:%s3013_s8] %v687_v58  ;;  %690 = vst [vmem:[%s2737_s21 + $0xe0] sm:%s3013_s8] %v689_v59 }
  0xc3   : > { %v691_v60 = vld [vmem:[%s2734_s18 + $0x1c0] sm:%s3013_s8]  ;;  %v693_v61 = vld [vmem:[%s2734_s18 + $0x1f8] sm:%s3013_s8] }
  0xc4   : > { %692 = vst [vmem:[%s2737_s21 + $0x100] sm:%s3013_s8] %v691_v60  ;;  %694 = vst [vmem:[%s2737_s21 + $0x120] sm:%s3013_s8] %v693_v61 }
  0xc5   : > { %v695_v62 = vld [vmem:[%s2734_s18 + $0x230] sm:%s3013_s8]  ;;  %v697_v63 = vld [vmem:[%s2734_s18 + $0x268] sm:%s3013_s8] }
  0xc6   : > { %696 = vst [vmem:[%s2737_s21 + $0x140] sm:%s3013_s8] %v695_v62  ;;  %698 = vst [vmem:[%s2737_s21 + $0x160] sm:%s3013_s8] %v697_v63 }
  0xc7   : > { %v699_v0 = vld [vmem:[%s2734_s18 + $0x2a0] sm:%s3013_s8]  ;;  %v701_v1 = vld [vmem:[%s2734_s18 + $0x2d8] sm:%s3013_s8] }
  0xc8   : > { %700 = vst [vmem:[%s2737_s21 + $0x180] sm:%s3013_s8] %v699_v0  ;;  %702 = vst [vmem:[%s2737_s21 + $0x1a0] sm:%s3013_s8] %v701_v1 }
  0xc9   : > { %v703_v2 = vld [vmem:[%s2734_s18 + $0x310] sm:%s3013_s8]  ;;  %v705_v3 = vld [vmem:[%s2734_s18 + $0x348] sm:%s3013_s8] }
  0xca   : > { %704 = vst [vmem:[%s2737_s21 + $0x1c0] sm:%s3013_s8] %v703_v2  ;;  %706 = vst [vmem:[%s2737_s21 + $0x1e0] sm:%s3013_s8] %v705_v3 }
  0xcb   : > { %v707_v4 = vld [vmem:[%s2734_s18 + $0x380] sm:%s3013_s8]  ;;  %v709_v5 = vld [vmem:[%s2734_s18 + $0x3b8] sm:%s3013_s8] }
  0xcc   : > { %708 = vst [vmem:[%s2737_s21 + $0x200] sm:%s3013_s8] %v707_v4  ;;  %710 = vst [vmem:[%s2737_s21 + $0x220] sm:%s3013_s8] %v709_v5 }
  0xcd PF: > { %p1689_p11 = scmp.ge.u32.totalorder %s2444_s30, 8 }
  0xce   : > { %s2376_s5 = smov (!%p1689_p11), 0  }
  0xcf   : > { %153 = sbr.rel (%p1689_p11) target bundleno = 226 (0xe2), region = 40  ;;  %s3089_s18 = sshllo.u32 (!%p1689_p11), %s2376_s5, %s2444_s30 }
  0xd0   : > { %v163_v6 = vld [vmem:[%s2442_s28] sm:%s3089_s18] (!%p1689_p11)  ;;  %v165_v7 = vld [vmem:[%s2442_s28 + $0x38] sm:%s3089_s18] (!%p1689_p11) }
  0xd1   : > { %164 = vst [vmem:[%s2446_s4] sm:%s3089_s18] (!%p1689_p11), %v163_v6  ;;  %166 = vst [vmem:[%s2446_s4 + $0x20] sm:%s3089_s18] (!%p1689_p11), %v165_v7 }
  0xd2   : > { %v167_v8 = vld [vmem:[%s2442_s28 + $0x70] sm:%s3089_s18] (!%p1689_p11)  ;;  %v169_v9 = vld [vmem:[%s2442_s28 + $0xa8] sm:%s3089_s18] (!%p1689_p11) }
  0xd3   : > { %168 = vst [vmem:[%s2446_s4 + $0x40] sm:%s3089_s18] (!%p1689_p11), %v167_v8  ;;  %170 = vst [vmem:[%s2446_s4 + $0x60] sm:%s3089_s18] (!%p1689_p11), %v169_v9 }
  0xd4   : > { %v171_v10 = vld [vmem:[%s2442_s28 + $0xe0] sm:%s3089_s18] (!%p1689_p11)  ;;  %v173_v11 = vld [vmem:[%s2442_s28 + $0x118] sm:%s3089_s18] (!%p1689_p11) }
  0xd5   : > { %172 = vst [vmem:[%s2446_s4 + $0x80] sm:%s3089_s18] (!%p1689_p11), %v171_v10  ;;  %174 = vst [vmem:[%s2446_s4 + $0xa0] sm:%s3089_s18] (!%p1689_p11), %v173_v11 }
  0xd6   : > { %v175_v12 = vld [vmem:[%s2442_s28 + $0x150] sm:%s3089_s18]  ;;  %v177_v13 = vld [vmem:[%s2442_s28 + $0x188] sm:%s3089_s18] }
  0xd7   : > { %176 = vst [vmem:[%s2446_s4 + $0xc0] sm:%s3089_s18] %v175_v12  ;;  %178 = vst [vmem:[%s2446_s4 + $0xe0] sm:%s3089_s18] %v177_v13 }
  0xd8   : > { %v179_v14 = vld [vmem:[%s2442_s28 + $0x1c0] sm:%s3089_s18]  ;;  %v181_v15 = vld [vmem:[%s2442_s28 + $0x1f8] sm:%s3089_s18] }
  0xd9   : > { %180 = vst [vmem:[%s2446_s4 + $0x100] sm:%s3089_s18] %v179_v14  ;;  %182 = vst [vmem:[%s2446_s4 + $0x120] sm:%s3089_s18] %v181_v15 }
  0xda   : > { %v183_v16 = vld [vmem:[%s2442_s28 + $0x230] sm:%s3089_s18]  ;;  %v185_v17 = vld [vmem:[%s2442_s28 + $0x268] sm:%s3089_s18] }
  0xdb   : > { %184 = vst [vmem:[%s2446_s4 + $0x140] sm:%s3089_s18] %v183_v16  ;;  %186 = vst [vmem:[%s2446_s4 + $0x160] sm:%s3089_s18] %v185_v17 }
  0xdc   : > { %v187_v18 = vld [vmem:[%s2442_s28 + $0x2a0] sm:%s3089_s18]  ;;  %v189_v19 = vld [vmem:[%s2442_s28 + $0x2d8] sm:%s3089_s18] }
  0xdd   : > { %188 = vst [vmem:[%s2446_s4 + $0x180] sm:%s3089_s18] %v187_v18  ;;  %190 = vst [vmem:[%s2446_s4 + $0x1a0] sm:%s3089_s18] %v189_v19 }
  0xde   : > { %v191_v20 = vld [vmem:[%s2442_s28 + $0x310] sm:%s3089_s18]  ;;  %v193_v21 = vld [vmem:[%s2442_s28 + $0x348] sm:%s3089_s18] }
  0xdf   : > { %192 = vst [vmem:[%s2446_s4 + $0x1c0] sm:%s3089_s18] %v191_v20  ;;  %194 = vst [vmem:[%s2446_s4 + $0x1e0] sm:%s3089_s18] %v193_v21 }
  0xe0   : > { %v195_v22 = vld [vmem:[%s2442_s28 + $0x380] sm:%s3089_s18]  ;;  %v197_v23 = vld [vmem:[%s2442_s28 + $0x3b8] sm:%s3089_s18] }
  0xe1   : > { %196 = vst [vmem:[%s2446_s4 + $0x200] sm:%s3089_s18] %v195_v22  ;;  %198 = vst [vmem:[%s2446_s4 + $0x220] sm:%s3089_s18] %v197_v23 }
  0xe2 PF: > { %p1690_p12 = scmp.ge.s32.totalorder %s2245_s14, 1  ;;  %p713_p13 = scmp.lt.s32.totalorder %s2245_s14, 3 }
  0xe4   : > { %p714_p0 = pnand %p1690_p12, %p713_p13 }
  0xe5   : > { %s720_s30 = sand.u32 (!%p714_p0), 1, %s2237_s12   ;;  %v753_v24 = vld [vmem:[%s3594_s0 + $0x8] sm:$0xff] (!%p714_p0)  ;;  %vm840_vm0 = vcmask (!%p714_p0), 130048   ;;  %v828_v25 = vld [vmem:[%s3596_s2] sm:$0xff] (!%p714_p0)  ;;  %v2377_v26 = vmov (!%p714_p0), 0  }
  0xe6   : > { %717 = sbr.rel (%p714_p0) target bundleno = 639 (0x27f), region = 94  ;;  %1692 = vmatprep.mubr.msk.f32.mxu0 (!%p714_p0), %vm840_vm0, %v753_v24  ;;  %1694 = vmatprep.mubr.msk.f32.mxu1 (!%p714_p0), %vm840_vm0, %v753_v24  ;;  %v829_v27 = vld [vmem:[%s3596_s2 + $0x8] sm:$0xff] (!%p714_p0)  ;;  %s1691_s17 = sshll.u32 (!%p714_p0), %s720_s30, 6 }
  0xe7   : > { %s1808_s28 = smul.u32 (!%p714_p0), 576, %s720_s30  ;;  %2094 = vset.pattern.permute.xlu0 (!%p714_p0), %v2377_v26  ;;  %s3266_s22 = scalar_lea.vmem (!%p714_p0), [#allocation3], %s1691_s17  }
  0xe8   : > { %832 = vperm.xlu0 (!%p714_p0), %2094, %v828_v25  }
  0xe9   : > { %s3179_s7 = scalar_lea.vmem (!%p714_p0), [#allocation2], %s1808_s28 }
  0xea   : > { %v757_v28 = vld [vmem:[%s3179_s7 + $0x8] sm:$0xff] (!%p714_p0)  ;;  %v759_v30 = vld [vmem:[%s3179_s7 + $0x18] sm:$0xff] (!%p714_p0)  ;;  %v756_v33 = vld [vmem:[%s3179_s7] sm:$0xff] (!%p714_p0) }
  0xeb   : > { %v761_v29 = vld [vmem:[%s3179_s7 + $0x28] sm:$0xff] (!%p714_p0)  ;;  %v763_v32 = vld [vmem:[%s3179_s7 + $0x38] sm:$0xff] (!%p714_p0)  ;;  %v760_v34 = vld [vmem:[%s3179_s7 + $0x20] sm:$0xff] (!%p714_p0) }
  0xec   : > { %v1735_v31 = vpack.c.bf16 (!%p714_p0), %v761_v29, %v757_v28  ;;  %v1771_v35 = vpack.c.bf16 (!%p714_p0), %v763_v32, %v759_v30  ;;  %v1737_v36 = vpack.c.bf16 (!%p714_p0), %v760_v34, %v756_v33  ;;  %v758_v37 = vld [vmem:[%s3179_s7 + $0x10] sm:$0xff] (!%p714_p0)  ;;  %v765_v39 = vld [vmem:[%s3179_s7 + $0x48] sm:$0xff] (!%p714_p0)  ;;  %v767_v42 = vld [vmem:[%s3179_s7 + $0x58] sm:$0xff] (!%p714_p0)  ;;  %837 = vperm.xlu0 (!%p714_p0), %2094, %v829_v27  }
  0xed   : > { %v762_v38 = vld [vmem:[%s3179_s7 + $0x30] sm:$0xff]  ;;  %v769_v41 = vld [vmem:[%s3179_s7 + $0x68] sm:$0xff]  ;;  %v771_v43 = vld [vmem:[%s3179_s7 + $0x78] sm:$0xff]  ;;  %s1697_s12 = sshll.u32 (%p2431_p5), %s2416_s15, 2  ;;  %s1730_s27 = sshll.u32 (%p2431_p5), %s2416_s15, 5 }
  0xee   : > { %1736 = vmatprep.subr.bf16.mxu0 %v1735_v31  ;;  %v1773_v40 = vpack.c.bf16 %v762_v38, %v758_v37  ;;  %1772 = vmatprep.subr.bf16.mxu1 %v1771_v35  ;;  %v1739_v44 = vpack.c.bf16 %v769_v41, %v765_v39  ;;  %v1775_v45 = vpack.c.bf16 %v771_v43, %v767_v42  ;;  %v764_v46 = vld [vmem:[%s3179_s7 + $0x40] sm:$0xff]  ;;  %v766_v48 = vld [vmem:[%s3179_s7 + $0x50] sm:$0xff]  ;;  %v773_v51 = vld [vmem:[%s3179_s7 + $0x88] sm:$0xff]  ;;  %s1025_s8 = ssub.s32 (%p2431_p5), 7, %s1697_s12  ;;  %s3283_s30 = scalar_lea.vmem (%p2431_p5), %s3597_s3, %s1730_s27  }
  0xef   : > { %1738 = vmatpush1.bf16.msra.mxu0 %v1737_v36  ;;  %v768_v47 = vld [vmem:[%s3179_s7 + $0x60] sm:$0xff]  ;;  %v770_v50 = vld [vmem:[%s3179_s7 + $0x70] sm:$0xff]  ;;  %v777_v52 = vld [vmem:[%s3179_s7 + $0xa8] sm:$0xff]  ;;  %p1026_p1 = scmp.lt.s32.totalorder (%p2431_p5), %s1025_s8, 4 }
  0xf0   : > { %1774 = vmatpush1.bf16.msra.mxu1 %v1773_v40  ;;  %v1741_v49 = vpack.c.bf16 %v768_v47, %v764_v46  ;;  %1740 = vmatprep.subr.bf16.mxu0 %v1739_v44  ;;  %v1777_v53 = vpack.c.bf16 %v770_v50, %v766_v48  ;;  %v1743_v54 = vpack.c.bf16 %v777_v52, %v773_v51  ;;  %v775_v55 = vld [vmem:[%s3179_s7 + $0x98] sm:$0xff]  ;;  %v772_v57 = vld [vmem:[%s3179_s7 + $0x80] sm:$0xff]  ;;  %v774_v60 = vld [vmem:[%s3179_s7 + $0x90] sm:$0xff] }
  0xf1   : > { %1776 = vmatprep.subr.bf16.mxu1 %v1775_v45  ;;  %v779_v56 = vld [vmem:[%s3179_s7 + $0xb8] sm:$0xff]  ;;  %v776_v59 = vld [vmem:[%s3179_s7 + $0xa0] sm:$0xff]  ;;  %v778_v61 = vld [vmem:[%s3179_s7 + $0xb0] sm:$0xff] }
  0xf2   : > { %v1779_v58 = vpack.c.bf16 %v779_v56, %v775_v55  ;;  %v1745_v62 = vpack.c.bf16 %v776_v59, %v772_v57  ;;  %v781_v63 = vld [vmem:[%s3179_s7 + $0xc8] sm:$0xff]  ;;  %v783_v1 = vld [vmem:[%s3179_s7 + $0xd8] sm:$0xff]  ;;  %v1781_v2 = vpack.c.bf16 %v778_v61, %v774_v60  ;;  %v780_v5 = vld [vmem:[%s3179_s7 + $0xc0] sm:$0xff] }
  0xf3   : > { %1742 = vmatpush1.bf16.msra.mxu0 %v1741_v49  ;;  %v785_v0 = vld [vmem:[%s3179_s7 + $0xe8] sm:$0xff]  ;;  %v787_v4 = vld [vmem:[%s3179_s7 + $0xf8] sm:$0xff]  ;;  %v784_v6 = vld [vmem:[%s3179_s7 + $0xe0] sm:$0xff] }
  0xf4   : > { %1778 = vmatpush1.bf16.msra.mxu1 %v1777_v53  ;;  %1744 = vmatprep.subr.bf16.mxu0 %v1743_v54  ;;  %v1747_v3 = vpack.c.bf16 %v785_v0, %v781_v63  ;;  %v1783_v7 = vpack.c.bf16 %v787_v4, %v783_v1  ;;  %v782_v8 = vld [vmem:[%s3179_s7 + $0xd0] sm:$0xff]  ;;  %v789_v10 = vld [vmem:[%s3179_s7 + $0x108] sm:$0xff]  ;;  %v791_v12 = vld [vmem:[%s3179_s7 + $0x118] sm:$0xff]  ;;  %v1749_v14 = vpack.c.bf16 %v784_v6, %v780_v5 }
  0xf5   : > { %1780 = vmatprep.subr.bf16.mxu1 %v1779_v58  ;;  %v786_v9 = vld [vmem:[%s3179_s7 + $0xf0] sm:$0xff]  ;;  %v793_v11 = vld [vmem:[%s3179_s7 + $0x128] sm:$0xff]  ;;  %v795_v13 = vld [vmem:[%s3179_s7 + $0x138] sm:$0xff] }
  0xf6   : > { %v1785_v15 = vpack.c.bf16 %v786_v9, %v782_v8  ;;  %v1751_v16 = vpack.c.bf16 %v793_v11, %v789_v10  ;;  %v788_v17 = vld [vmem:[%s3179_s7 + $0x100] sm:$0xff]  ;;  %v790_v19 = vld [vmem:[%s3179_s7 + $0x110] sm:$0xff]  ;;  %v1787_v20 = vpack.c.bf16 %v795_v13, %v791_v12  ;;  %v797_v22 = vld [vmem:[%s3179_s7 + $0x148] sm:$0xff] }
  0xf7   : > { %1746 = vmatpush1.bf16.msra.mxu0 %v1745_v62  ;;  %v792_v18 = vld [vmem:[%s3179_s7 + $0x120] sm:$0xff]  ;;  %v794_v21 = vld [vmem:[%s3179_s7 + $0x130] sm:$0xff]  ;;  %v801_v23 = vld [vmem:[%s3179_s7 + $0x168] sm:$0xff] }
  0xf8   : > { %1782 = vmatpush1.bf16.msra.mxu1 %v1781_v2  ;;  %1748 = vmatprep.subr.bf16.mxu0 %v1747_v3  ;;  %v799_v24 = vld [vmem:[%s3179_s7 + $0x158] sm:$0xff]  ;;  %v1753_v26 = vpack.c.bf16 %v792_v18, %v788_v17  ;;  %v1789_v27 = vpack.c.bf16 %v794_v21, %v790_v19  ;;  %v1755_v28 = vpack.c.bf16 %v801_v23, %v797_v22  ;;  %v796_v29 = vld [vmem:[%s3179_s7 + $0x140] sm:$0xff]  ;;  %v798_v31 = vld [vmem:[%s3179_s7 + $0x150] sm:$0xff] }
  0xf9   : > { %1784 = vmatprep.subr.bf16.mxu1 %v1783_v7  ;;  %v803_v25 = vld [vmem:[%s3179_s7 + $0x178] sm:$0xff]  ;;  %v800_v30 = vld [vmem:[%s3179_s7 + $0x160] sm:$0xff]  ;;  %v802_v33 = vld [vmem:[%s3179_s7 + $0x170] sm:$0xff] }
  0xfa   : > { %v1791_v32 = vpack.c.bf16 %v803_v25, %v799_v24  ;;  %v805_v34 = vld [vmem:[%s3179_s7 + $0x188] sm:$0xff]  ;;  %v807_v36 = vld [vmem:[%s3179_s7 + $0x198] sm:$0xff]  ;;  %v1757_v38 = vpack.c.bf16 %v800_v30, %v796_v29  ;;  %v1793_v39 = vpack.c.bf16 %v802_v33, %v798_v31  ;;  %v804_v41 = vld [vmem:[%s3179_s7 + $0x180] sm:$0xff] }
  0xfb   : > { %1750 = vmatpush1.bf16.msra.mxu0 %v1749_v14  ;;  %v809_v35 = vld [vmem:[%s3179_s7 + $0x1a8] sm:$0xff]  ;;  %v811_v37 = vld [vmem:[%s3179_s7 + $0x1b8] sm:$0xff]  ;;  %v808_v42 = vld [vmem:[%s3179_s7 + $0x1a0] sm:$0xff] }
  0xfc   : > { %1786 = vmatpush1.bf16.msra.mxu1 %v1785_v15  ;;  %1752 = vmatprep.subr.bf16.mxu0 %v1751_v16  ;;  %v1759_v40 = vpack.c.bf16 %v809_v35, %v805_v34  ;;  %v806_v43 = vld [vmem:[%s3179_s7 + $0x190] sm:$0xff]  ;;  %v1795_v44 = vpack.c.bf16 %v811_v37, %v807_v36  ;;  %v813_v46 = vld [vmem:[%s3179_s7 + $0x1c8] sm:$0xff]  ;;  %v815_v48 = vld [vmem:[%s3179_s7 + $0x1d8] sm:$0xff]  ;;  %v1761_v50 = vpack.c.bf16 %v808_v42, %v804_v41 }
  0xfd   : > { %1788 = vmatprep.subr.bf16.mxu1 %v1787_v20  ;;  %v810_v45 = vld [vmem:[%s3179_s7 + $0x1b0] sm:$0xff]  ;;  %v817_v47 = vld [vmem:[%s3179_s7 + $0x1e8] sm:$0xff]  ;;  %v819_v49 = vld [vmem:[%s3179_s7 + $0x1f8] sm:$0xff] }
  0xfe   : > { %v1797_v51 = vpack.c.bf16 %v810_v45, %v806_v43  ;;  %v1763_v52 = vpack.c.bf16 %v817_v47, %v813_v46  ;;  %v812_v53 = vld [vmem:[%s3179_s7 + $0x1c0] sm:$0xff]  ;;  %v814_v55 = vld [vmem:[%s3179_s7 + $0x1d0] sm:$0xff]  ;;  %v1799_v56 = vpack.c.bf16 %v819_v49, %v815_v48  ;;  %v821_v58 = vld [vmem:[%s3179_s7 + $0x208] sm:$0xff] }
  0xff   : > { %1754 = vmatpush1.bf16.msra.mxu0 %v1753_v26  ;;  %v816_v54 = vld [vmem:[%s3179_s7 + $0x1e0] sm:$0xff]  ;;  %v818_v57 = vld [vmem:[%s3179_s7 + $0x1f0] sm:$0xff]  ;;  %v825_v59 = vld [vmem:[%s3179_s7 + $0x228] sm:$0xff] }
 0x100   : > { %1790 = vmatpush1.bf16.msra.mxu1 %v1789_v27  ;;  %1756 = vmatprep.subr.bf16.mxu0 %v1755_v28  ;;  %v823_v60 = vld [vmem:[%s3179_s7 + $0x218] sm:$0xff]  ;;  %v1765_v62 = vpack.c.bf16 %v816_v54, %v812_v53  ;;  %v1801_v63 = vpack.c.bf16 %v818_v57, %v814_v55  ;;  %v1767_v0 = vpack.c.bf16 %v825_v59, %v821_v58  ;;  %v820_v1 = vld [vmem:[%s3179_s7 + $0x200] sm:$0xff]  ;;  %v822_v4 = vld [vmem:[%s3179_s7 + $0x210] sm:$0xff] }
 0x101   : > { %1792 = vmatprep.subr.bf16.mxu1 %v1791_v32  ;;  %v827_v61 = vld [vmem:[%s3179_s7 + $0x238] sm:$0xff]  ;;  %v824_v2 = vld [vmem:[%s3179_s7 + $0x220] sm:$0xff]  ;;  %v826_v5 = vld [vmem:[%s3179_s7 + $0x230] sm:$0xff] }
 0x102   : > { %v1803_v3 = vpack.c.bf16 %v827_v61, %v823_v60  ;;  %v1769_v6 = vpack.c.bf16 %v824_v2, %v820_v1  ;;  %v1805_v7 = vpack.c.bf16 %v826_v5, %v822_v4  ;;  %v752_v8 = vld [vmem:[%s3594_s0] sm:$0xff]  ;;  %v755_v9 = vld [vmem:[%s3594_s0 + $0x18] sm:$0xff]  ;;  %v754_v10 = vld [vmem:[%s3594_s0 + $0x10] sm:$0xff] }
 0x103   : > { %1758 = vmatpush1.bf16.msra.mxu0 %v1757_v38 }
 0x104   : > { %1794 = vmatpush1.bf16.msra.mxu1 %v1793_v39  ;;  %1760 = vmatprep.subr.bf16.mxu0 %v1759_v40 }
 0x105   : > { %1796 = vmatprep.subr.bf16.mxu1 %v1795_v44 }
 0x107   : > { %1762 = vmatpush1.bf16.msra.mxu0 %v1761_v50 }
 0x108   : > { %1798 = vmatpush1.bf16.msra.mxu1 %v1797_v51  ;;  %1764 = vmatprep.subr.bf16.mxu0 %v1763_v52 }
 0x109   : > { %1800 = vmatprep.subr.bf16.mxu1 %v1799_v56 }
 0x10b   : > { %1766 = vmatpush1.bf16.msra.mxu0 %v1765_v62 }
 0x10c   : > { %1802 = vmatpush1.bf16.msra.mxu1 %v1801_v63  ;;  %1768 = vmatprep.subr.bf16.mxu0 %v1767_v0 }
 0x10d   : > { %1804 = vmatprep.subr.bf16.mxu1 %v1803_v3 }
 0x10f   : > { %1770 = vmatpush1.bf16.msra.mxu0 %v1769_v6 }
 0x110   : > { %1806 = vmatpush1.bf16.msra.mxu1 %v1805_v7 }
 0x112   : > { %912 = vmatmul.mubr.f32.vlgmr.msra.gmra.mrb[0].mxu0 %v752_v8 }
 0x113   : > { %989 = vmatmul.mubr.f32.vlgmr.msra.gmra.mrb[0].mxu1 %v752_v8  ;;  %1693 = vmatprep.mubr.msk.f32.mxu0 %vm840_vm0, %v755_v9 }
 0x114   : > { %1695 = vmatprep.mubr.msk.f32.mxu1 %vm840_vm0, %v755_v9 }
 0x116   : > { %918 = vmatmul.mubr.f32.gmra.mrb[2].mxu0 %v754_v10 }
 0x117   : > { %995 = vmatmul.mubr.f32.gmra.mrb[2].mxu1 %v754_v10 }
 0x167   : > { %v833_v11 = vpop.permute.xlu0 %832 }
 0x16b   : > { %v838_v22 = vpop.permute.xlu0 %837 }
 0x1e5   : > { %v913_v12 = vpop.f32.mrb[0].mxu0 }
 0x1e6   : > { %v914_v13 = vadd.f32 %v913_v12, %v833_v11  ;;  %v990_v14 = vpop.f32.mrb[0].mxu1  ;;  %v915_v15 = vpop.f32.mrb[1].mxu0 }
 0x1e7   : > { %v991_v16 = vadd.f32 %v990_v14, %v833_v11  ;;  %v916_v17 = vadd.f32 %v915_v15, %v833_v11  ;;  %v992_v18 = vpop.f32.mrb[1].mxu1 }
 0x1e8   : > { %v1001_v19 = vmax.f32 %v914_v13, 0.0  ;;  %v993_v20 = vadd.f32 %v992_v18, %v833_v11 }
 0x1e9   : > { %v1003_v21 = vmax.f32 %v991_v16, 0.0  ;;  %v1002_v23 = vmax.f32 %v916_v17, 0.0  ;;  %v919_v24 = vpop.f32.mrb[2].mxu0 }
 0x1ea   : > { %1009 = vst [vmem:[%s3266_s22] sm:$0xff] %v1001_v19  ;;  %v1004_v25 = vmax.f32 %v993_v20, 0.0  ;;  %v920_v26 = vadd.f32 %v919_v24, %v838_v22  ;;  %v996_v27 = vpop.f32.mrb[2].mxu1  ;;  %v921_v28 = vpop.f32.mrb[3].mxu0  ;;  %1023 = sbr.rel (!%p2431_p5) target bundleno = 639 (0x27f), region = 102 }
 0x1eb   : > { %1011 = vst [vmem:[%s3266_s22 + $0x10] sm:$0xff] %v1003_v21  ;;  %1010 = vst [vmem:[%s3266_s22 + $0x8] sm:$0xff] %v1002_v23  ;;  %v997_v29 = vadd.f32 %v996_v27, %v838_v22  ;;  %v922_v30 = vadd.f32 %v921_v28, %v838_v22  ;;  %v998_v31 = vpop.f32.mrb[3].mxu1 }
 0x1ec   : > { %1012 = vst [vmem:[%s3266_s22 + $0x18] sm:$0xff] %v1004_v25  ;;  %v1005_v32 = vmax.f32 %v920_v26, 0.0  ;;  %v999_v33 = vadd.f32 %v998_v31, %v838_v22 }
 0x1ed   : > { %v1007_v34 = vmax.f32 %v997_v29, 0.0  ;;  %v1006_v35 = vmax.f32 %v922_v30, 0.0 }
 0x1ee   : > { %1013 = vst [vmem:[%s3266_s22 + $0x20] sm:$0xff] %v1005_v32  ;;  %v1008_v36 = vmax.f32 %v999_v33, 0.0 }
 0x1ef   : > { %1015 = vst [vmem:[%s3266_s22 + $0x30] sm:$0xff] %v1007_v34  ;;  %1014 = vst [vmem:[%s3266_s22 + $0x28] sm:$0xff] %v1006_v35 }
 0x1f0   : > { %1016 = vst [vmem:[%s3266_s22 + $0x38] sm:$0xff] %v1008_v36 }
 0x1f1   : > { %s3639_s8 = smov (!%p1026_p1, %s1025_s8), 4 }
 0x1f2   : > { %s1698_s21 = sshll.u32 %s3639_s8, 8  ;;  %s3285_s9 = sshll.u32 %s3639_s8, 3 }
 0x1f3   : > { %p1702_p2 = scmp.eq.s32.totalorder %s1698_s21, 0 }
 0x1f4   : > { %p1036_p3 = scmp.lt.u32.totalorder (!%p1702_p2), %s3285_s9, 8 }
 0x1f5   : > { %1035 = sbr.rel (%p1702_p2) target bundleno = 639 (0x27f), region = 106 }
 0x1fc   : > { %1039 = sbr.rel (%p1036_p3) target bundleno = 630 (0x276), region = 110  ;;  %s3289_s20 = sand.u32 (!%p1036_p3), 7, %s3285_s9  }
 0x1fd   : > { %p1057_p5 = scmp.eq.s32.totalorder (!%p1036_p3), %s3289_s20, 0  ;;  %p1703_p4 = scmp.ne.s32.totalorder (!%p1036_p3), %s3289_s20, 0 }
 0x203   : > { %1060 = sbr.rel (%p1703_p4) target bundleno = 570 (0x23a), region = 125  ;;  %s1061_s15 = sshrl.u32 (!%p1703_p4), %s3285_s9, 3 }
 0x204   : > { %s3296_s28 = sshrl.u32 (!%p1703_p4), %s1061_s15, 5 }
 0x205   : > { %p1704_p6 = scmp.le.s32.totalorder (!%p1703_p4), %s3296_s28, 0 }
 0x20a   : > { %1590 = sbr.rel (%p1704_p6) target bundleno = 550 (0x226), region = 273  ;;  %s3615_s4 = smov (!%p1704_p6), %s3283_s30 }
 0x20b   : > { %s3616_s10 = smov (!%p1704_p6), %s3266_s22  ;;  %s3305_s14 = smov (!%p1704_p6), 0  }
 0x20c   : > { %s3307_s6 = smov (!%p1704_p6), 0  }
 0x211 LB: >> { %v1074_v37 = vld [vmem:[%s2317_s10] sm:$0xff]  ;;  %v1076_v38 = vld [vmem:[%s2317_s10 + $0x8] sm:$0xff]  ;;  %v1078_v39 = vld [vmem:[%s2317_s10 + $0x10] sm:$0xff]  ;;  %s1202_s7 = sadd.s32 1, %s2321_s14  ;;  %s1068_s6 = sadd.s32 1, %s2325_s6   ;;  %s2325_s6 = sphi %s3307_s6, %s1068_s6   ;;  %s2321_s14 = sphi %s3305_s14, %s3619_s14   ;;  %s2317_s10 = sphi %s3616_s10, %s3618_s10   ;;  %s2313_s4 = sphi %s3615_s4, %s3617_s4  }
 0x212   : >> { %1075 = vst [vmem:[%s2313_s4] sm:$0xff] %v1074_v37  ;;  %1077 = vst [vmem:[%s2313_s4 + $0x8] sm:$0xff] %v1076_v38  ;;  %v1080_v40 = vld [vmem:[%s2317_s10 + $0x18] sm:$0xff]  ;;  %v1082_v41 = vld [vmem:[%s2317_s10 + $0x20] sm:$0xff]  ;;  %p1203_p7 = scmp.ge.s32.totalorder %s1202_s7, %s3296_s28  ;;  %p1067_p8 = scmp.ge.s32.totalorder %s1068_s6, %s3296_s28 }
 0x213   : >> { %1079 = vst [vmem:[%s2313_s4 + $0x10] sm:$0xff] %v1078_v39  ;;  %v1084_v42 = vld [vmem:[%s2317_s10 + $0x28] sm:$0xff]  ;;  %1081 = vst [vmem:[%s2313_s4 + $0x18] sm:$0xff] %v1080_v40  ;;  %v1086_v43 = vld [vmem:[%s2317_s10 + $0x30] sm:$0xff] }
 0x214   : >> { %1083 = vst [vmem:[%s2313_s4 + $0x20] sm:$0xff] %v1082_v41  ;;  %1085 = vst [vmem:[%s2313_s4 + $0x28] sm:$0xff] %v1084_v42  ;;  %v1144_v44 = vld [vmem:[%s2317_s10 + $0x38] sm:$0xff]  ;;  %v1146_v45 = vld [vmem:[%s2317_s10 + $0x40] sm:$0xff]  ;;  %s3641_s7 = smov (%p1203_p7, %s1202_s7), 0 }
 0x215   : >> { %1139 = vst [vmem:[%s2313_s4 + $0x38] sm:$0xff] %v1082_v41  ;;  %1141 = vst [vmem:[%s2313_s4 + $0x40] sm:$0xff] %v1084_v42  ;;  %v1148_v46 = vld [vmem:[%s2317_s10 + $0x48] sm:$0xff]  ;;  %v1150_v47 = vld [vmem:[%s2317_s10 + $0x50] sm:$0xff]  ;;  %s1705_s11 = sshll.u32 %s3641_s7, 8  ;;  %s3619_s14 = smov %s3641_s7 }
 0x216   : >> { %1087 = vst [vmem:[%s2313_s4 + $0x30] sm:$0xff] %v1086_v43  ;;  %1143 = vst [vmem:[%s2313_s4 + $0x48] sm:$0xff] %v1086_v43  ;;  %v1152_v48 = vld [vmem:[%s2317_s10 + $0x58] sm:$0xff]  ;;  %v1154_v49 = vld [vmem:[%s2317_s10 + $0x60] sm:$0xff]  ;;  %s1207_s29 = scalar_lea.vmem %s3266_s22, %s1705_s11 [#allocation3]   ;;  %s1208_s23 = scalar_lea.vmem %s3283_s30, %s1705_s11  }
 0x217   : >> { %1145 = vst [vmem:[%s2313_s4 + $0x50] sm:$0xff] %v1144_v44  ;;  %1147 = vst [vmem:[%s2313_s4 + $0x58] sm:$0xff] %v1146_v45  ;;  %v1156_v50 = vld [vmem:[%s2317_s10 + $0x68] sm:$0xff]  ;;  %v1158_v51 = vld [vmem:[%s2317_s10 + $0x70] sm:$0xff] }
 0x218   : >> { %1149 = vst [vmem:[%s2313_s4 + $0x60] sm:$0xff] %v1148_v46  ;;  %1151 = vst [vmem:[%s2313_s4 + $0x68] sm:$0xff] %v1150_v47  ;;  %v1160_v52 = vld [vmem:[%s2317_s10 + $0x78] sm:$0xff]  ;;  %v1162_v53 = vld [vmem:[%s2317_s10 + $0x80] sm:$0xff] }
 0x219   : >> { %1153 = vst [vmem:[%s2313_s4 + $0x70] sm:$0xff] %v1152_v48  ;;  %1155 = vst [vmem:[%s2313_s4 + $0x78] sm:$0xff] %v1154_v49  ;;  %v1164_v54 = vld [vmem:[%s2317_s10 + $0x88] sm:$0xff]  ;;  %v1166_v55 = vld [vmem:[%s2317_s10 + $0x90] sm:$0xff] }
 0x21a   : >> { %1157 = vst [vmem:[%s2313_s4 + $0x80] sm:$0xff] %v1156_v50  ;;  %1159 = vst [vmem:[%s2313_s4 + $0x88] sm:$0xff] %v1158_v51  ;;  %v1168_v56 = vld [vmem:[%s2317_s10 + $0x98] sm:$0xff]  ;;  %v1170_v57 = vld [vmem:[%s2317_s10 + $0xa0] sm:$0xff] }
 0x21b   : >> { %1161 = vst [vmem:[%s2313_s4 + $0x90] sm:$0xff] %v1160_v52  ;;  %1163 = vst [vmem:[%s2313_s4 + $0x98] sm:$0xff] %v1162_v53  ;;  %v1172_v58 = vld [vmem:[%s2317_s10 + $0xa8] sm:$0xff]  ;;  %v1174_v59 = vld [vmem:[%s2317_s10 + $0xb0] sm:$0xff] }
 0x21c   : >> { %1165 = vst [vmem:[%s2313_s4 + $0xa0] sm:$0xff] %v1164_v54  ;;  %1167 = vst [vmem:[%s2313_s4 + $0xa8] sm:$0xff] %v1166_v55  ;;  %v1176_v60 = vld [vmem:[%s2317_s10 + $0xb8] sm:$0xff]  ;;  %v1178_v61 = vld [vmem:[%s2317_s10 + $0xc0] sm:$0xff] }
 0x21d   : >> { %1169 = vst [vmem:[%s2313_s4 + $0xb0] sm:$0xff] %v1168_v56  ;;  %1171 = vst [vmem:[%s2313_s4 + $0xb8] sm:$0xff] %v1170_v57  ;;  %v1180_v62 = vld [vmem:[%s2317_s10 + $0xc8] sm:$0xff]  ;;  %v1182_v63 = vld [vmem:[%s2317_s10 + $0xd0] sm:$0xff] }
 0x21e   : >> { %1173 = vst [vmem:[%s2313_s4 + $0xc0] sm:$0xff] %v1172_v58  ;;  %1175 = vst [vmem:[%s2313_s4 + $0xc8] sm:$0xff] %v1174_v59  ;;  %v1184_v0 = vld [vmem:[%s2317_s10 + $0xd8] sm:$0xff]  ;;  %v1186_v1 = vld [vmem:[%s2317_s10 + $0xe0] sm:$0xff] }
 0x21f   : >> { %1177 = vst [vmem:[%s2313_s4 + $0xd0] sm:$0xff] %v1176_v60  ;;  %1179 = vst [vmem:[%s2313_s4 + $0xd8] sm:$0xff] %v1178_v61  ;;  %v1188_v2 = vld [vmem:[%s2317_s10 + $0xe8] sm:$0xff]  ;;  %v1190_v3 = vld [vmem:[%s2317_s10 + $0xf0] sm:$0xff]  ;;  %1070 = sbr.rel (!%p1067_p8) target bundleno = 529 (0x211), region = 279 }
 0x220   : >> { %1181 = vst [vmem:[%s2313_s4 + $0xe0] sm:$0xff] %v1180_v62  ;;  %1183 = vst [vmem:[%s2313_s4 + $0xe8] sm:$0xff] %v1182_v63  ;;  %v1192_v4 = vld [vmem:[%s2317_s10 + $0xf8] sm:$0xff]  ;;  %v1194_v5 = vld [vmem:[%s2317_s10 + $0x100] sm:$0xff] }
 0x221   : >> { %1185 = vst [vmem:[%s2313_s4 + $0xf0] sm:$0xff] %v1184_v0  ;;  %1187 = vst [vmem:[%s2313_s4 + $0xf8] sm:$0xff] %v1186_v1  ;;  %v1196_v6 = vld [vmem:[%s2317_s10 + $0x108] sm:$0xff]  ;;  %v1198_v7 = vld [vmem:[%s2317_s10 + $0x110] sm:$0xff] }
 0x222   : >> { %1189 = vst [vmem:[%s2313_s4 + $0x100] sm:$0xff] %v1188_v2  ;;  %1191 = vst [vmem:[%s2313_s4 + $0x108] sm:$0xff] %v1190_v3  ;;  %v1200_v8 = vld [vmem:[%s2317_s10 + $0x118] sm:$0xff]  ;;  %s3618_s10 = smov %s1207_s29 }
 0x223   : >> { %1193 = vst [vmem:[%s2313_s4 + $0x110] sm:$0xff] %v1192_v4  ;;  %1195 = vst [vmem:[%s2313_s4 + $0x118] sm:$0xff] %v1194_v5 }
 0x224   : >> { %1197 = vst [vmem:[%s2313_s4 + $0x120] sm:$0xff] %v1196_v6  ;;  %1199 = vst [vmem:[%s2313_s4 + $0x128] sm:$0xff] %v1198_v7 }
 0x225   : >> { %1201 = vst [vmem:[%s2313_s4 + $0x130] sm:$0xff] %v1200_v8  ;;  %s3617_s4 = smov %s1208_s23 }
 0x226 PF: > { %s3416_s24 = sand.u32 31, %s1061_s15   ;;  %s1731_s25 = sshll.u32 %s3296_s28, 12 }
 0x227   : > { %s1213_s26 = sshra.s32 %s1731_s25, 4  ;;  %p1710_p9 = scmp.le.s32.totalorder %s3416_s24, 0 }
 0x228   : > { %s3420_s17 = scalar_lea.vmem %s3266_s22, %s1213_s26 [#allocation3]   ;;  %s1217_s12 = scalar_lea.vmem %s3283_s30, %s1213_s26  }
 0x229   : > { %1604 = sbr.rel (%p1710_p9) target bundleno = 570 (0x23a), region = 284  ;;  %s2327_s27 = smov (!%p1710_p9), %s1217_s12  }
 0x22a   : > { %s2331_s8 = smov (!%p1710_p9), %s3420_s17   ;;  %s2335_s5 = smov (!%p1710_p9), 0  }
 0x22b   : > { %s2339_s18 = smov (!%p1710_p9), 0  }
 0x230 LB: >> { %v1229_v9 = vld [vmem:[%s2333_s8] sm:$0xff]  ;;  %s1233_s21 = sadd.s32 1, %s2337_s5  ;;  %s1223_s18 = sadd.s32 1, %s2341_s18   ;;  %s2341_s18 = sphi %s2339_s18, %s1223_s18   ;;  %s2337_s5 = sphi %s2335_s5, %s2336_s5   ;;  %s2333_s8 = sphi %s2331_s8, %s1238_s8   ;;  %s2329_s27 = sphi %s2327_s27, %s1239_s27  }
 0x231   : >> { %v1231_v10 = vld [vmem:[%s2333_s8 + $0x20] sm:$0xff]  ;;  %1230 = vst [vmem:[%s2329_s27] sm:$0xff] %v1229_v9  ;;  %p1234_p10 = scmp.ge.s32.totalorder %s1233_s21, %s3416_s24  ;;  %p1222_p11 = scmp.ge.s32.totalorder %s1223_s18, %s3416_s24 }
 0x232   : >> { %1232 = vst [vmem:[%s2329_s27 + $0x38] sm:$0xff] %v1231_v10 }
 0x233   : >> { %s3643_s21 = smov (%p1234_p10, %s1233_s21), 0  ;;  %1225 = sbr.rel (!%p1222_p11) target bundleno = 560 (0x230), region = 290 }
 0x234   : >> { %s1711_s15 = sshll.u32 %s3643_s21, 3  ;;  %s2336_s5 = smov %s3643_s21  }
 0x235   : >> { %s1238_s8 = scalar_lea.vmem %s3420_s17, %s1711_s15 [#allocation3]   ;;  %s1239_s27 = scalar_lea.vmem %s1217_s12, %s1711_s15  }
 0x23a PF: > { %1242 = sbr.rel (%p1057_p5) target bundleno = 630 (0x276), region = 143  ;;  %s1244_s28 = ssub.s32 (!%p1057_p5), %s3285_s9, %s3289_s20 }
 0x23b   : > { %s1248_s4 = sshrl.u32 (!%p1057_p5), %s3285_s9, 3  ;;  %s3434_s10 = scalar_lea.vmem (!%p1057_p5), %s3266_s22, %s1244_s28 [#allocation3] }
 0x23c   : > { %s3437_s14 = scalar_lea.vmem (!%p1057_p5), %s3283_s30, %s1244_s28  ;;  %s3441_s6 = sshrl.u32 (!%p1057_p5), %s1248_s4, 5 }
 0x23d   : > { %p1713_p12 = scmp.le.s32.totalorder (!%p1057_p5), %s3441_s6, 0 }
 0x241   : > { %1618 = sbr.rel (%p1713_p12) target bundleno = 605 (0x25d), region = 295  ;;  %s3620_s7 = smov (!%p1713_p12), %s3283_s30 }
 0x242   : > { %s3621_s11 = smov (!%p1713_p12), %s3266_s22  ;;  %s3450_s29 = smov (!%p1713_p12), 0  }
 0x243   : > { %s3452_s23 = smov (!%p1713_p12), 0  }
 0x248 LB: >> { %v1261_v11 = vld [vmem:[%s2349_s11] sm:$0xff]  ;;  %v1263_v12 = vld [vmem:[%s2349_s11 + $0x8] sm:$0xff]  ;;  %v1265_v13 = vld [vmem:[%s2349_s11 + $0x10] sm:$0xff]  ;;  %s1389_s24 = sadd.s32 1, %s2353_s29  ;;  %s1255_s23 = sadd.s32 1, %s2357_s23   ;;  %s2357_s23 = sphi %s3452_s23, %s1255_s23   ;;  %s2353_s29 = sphi %s3450_s29, %s3624_s29   ;;  %s2349_s11 = sphi %s3621_s11, %s3623_s11   ;;  %s2345_s7 = sphi %s3620_s7, %s3622_s7  }
 0x249   : >> { %1262 = vst [vmem:[%s2345_s7] sm:$0xff] %v1261_v11  ;;  %1264 = vst [vmem:[%s2345_s7 + $0x8] sm:$0xff] %v1263_v12  ;;  %v1267_v14 = vld [vmem:[%s2349_s11 + $0x18] sm:$0xff]  ;;  %v1269_v15 = vld [vmem:[%s2349_s11 + $0x20] sm:$0xff]  ;;  %p1390_p13 = scmp.ge.s32.totalorder %s1389_s24, %s3441_s6  ;;  %p1254_p0 = scmp.ge.s32.totalorder %s1255_s23, %s3441_s6 }
 0x24a   : >> { %1266 = vst [vmem:[%s2345_s7 + $0x10] sm:$0xff] %v1265_v13  ;;  %v1271_v16 = vld [vmem:[%s2349_s11 + $0x28] sm:$0xff]  ;;  %1268 = vst [vmem:[%s2345_s7 + $0x18] sm:$0xff] %v1267_v14  ;;  %v1273_v17 = vld [vmem:[%s2349_s11 + $0x30] sm:$0xff] }
 0x24b   : >> { %1270 = vst [vmem:[%s2345_s7 + $0x20] sm:$0xff] %v1269_v15  ;;  %1272 = vst [vmem:[%s2345_s7 + $0x28] sm:$0xff] %v1271_v16  ;;  %v1331_v18 = vld [vmem:[%s2349_s11 + $0x38] sm:$0xff]  ;;  %v1333_v19 = vld [vmem:[%s2349_s11 + $0x40] sm:$0xff]  ;;  %s3645_s24 = smov (%p1390_p13, %s1389_s24), 0 }
 0x24c   : >> { %1326 = vst [vmem:[%s2345_s7 + $0x38] sm:$0xff] %v1269_v15  ;;  %1328 = vst [vmem:[%s2345_s7 + $0x40] sm:$0xff] %v1271_v16  ;;  %v1335_v20 = vld [vmem:[%s2349_s11 + $0x48] sm:$0xff]  ;;  %v1337_v21 = vld [vmem:[%s2349_s11 + $0x50] sm:$0xff]  ;;  %s1714_s25 = sshll.u32 %s3645_s24, 8  ;;  %s3624_s29 = smov %s3645_s24 }
 0x24d   : >> { %1274 = vst [vmem:[%s2345_s7 + $0x30] sm:$0xff] %v1273_v17  ;;  %1330 = vst [vmem:[%s2345_s7 + $0x48] sm:$0xff] %v1273_v17  ;;  %v1339_v22 = vld [vmem:[%s2349_s11 + $0x58] sm:$0xff]  ;;  %v1341_v23 = vld [vmem:[%s2349_s11 + $0x60] sm:$0xff]  ;;  %s1394_s26 = scalar_lea.vmem %s3266_s22, %s1714_s25 [#allocation3]   ;;  %s1395_s17 = scalar_lea.vmem %s3283_s30, %s1714_s25  }
 0x24e   : >> { %1332 = vst [vmem:[%s2345_s7 + $0x50] sm:$0xff] %v1331_v18  ;;  %1334 = vst [vmem:[%s2345_s7 + $0x58] sm:$0xff] %v1333_v19  ;;  %v1343_v24 = vld [vmem:[%s2349_s11 + $0x68] sm:$0xff]  ;;  %v1345_v25 = vld [vmem:[%s2349_s11 + $0x70] sm:$0xff] }
 0x24f   : >> { %1336 = vst [vmem:[%s2345_s7 + $0x60] sm:$0xff] %v1335_v20  ;;  %1338 = vst [vmem:[%s2345_s7 + $0x68] sm:$0xff] %v1337_v21  ;;  %v1347_v26 = vld [vmem:[%s2349_s11 + $0x78] sm:$0xff]  ;;  %v1349_v27 = vld [vmem:[%s2349_s11 + $0x80] sm:$0xff] }
 0x250   : >> { %1340 = vst [vmem:[%s2345_s7 + $0x70] sm:$0xff] %v1339_v22  ;;  %1342 = vst [vmem:[%s2345_s7 + $0x78] sm:$0xff] %v1341_v23  ;;  %v1351_v28 = vld [vmem:[%s2349_s11 + $0x88] sm:$0xff]  ;;  %v1353_v29 = vld [vmem:[%s2349_s11 + $0x90] sm:$0xff] }
 0x251   : >> { %1344 = vst [vmem:[%s2345_s7 + $0x80] sm:$0xff] %v1343_v24  ;;  %1346 = vst [vmem:[%s2345_s7 + $0x88] sm:$0xff] %v1345_v25  ;;  %v1355_v30 = vld [vmem:[%s2349_s11 + $0x98] sm:$0xff]  ;;  %v1357_v31 = vld [vmem:[%s2349_s11 + $0xa0] sm:$0xff] }
 0x252   : >> { %1348 = vst [vmem:[%s2345_s7 + $0x90] sm:$0xff] %v1347_v26  ;;  %1350 = vst [vmem:[%s2345_s7 + $0x98] sm:$0xff] %v1349_v27  ;;  %v1359_v32 = vld [vmem:[%s2349_s11 + $0xa8] sm:$0xff]  ;;  %v1361_v33 = vld [vmem:[%s2349_s11 + $0xb0] sm:$0xff] }
 0x253   : >> { %1352 = vst [vmem:[%s2345_s7 + $0xa0] sm:$0xff] %v1351_v28  ;;  %1354 = vst [vmem:[%s2345_s7 + $0xa8] sm:$0xff] %v1353_v29  ;;  %v1363_v34 = vld [vmem:[%s2349_s11 + $0xb8] sm:$0xff]  ;;  %v1365_v35 = vld [vmem:[%s2349_s11 + $0xc0] sm:$0xff] }
 0x254   : >> { %1356 = vst [vmem:[%s2345_s7 + $0xb0] sm:$0xff] %v1355_v30  ;;  %1358 = vst [vmem:[%s2345_s7 + $0xb8] sm:$0xff] %v1357_v31  ;;  %v1367_v36 = vld [vmem:[%s2349_s11 + $0xc8] sm:$0xff]  ;;  %v1369_v37 = vld [vmem:[%s2349_s11 + $0xd0] sm:$0xff] }
 0x255   : >> { %1360 = vst [vmem:[%s2345_s7 + $0xc0] sm:$0xff] %v1359_v32  ;;  %1362 = vst [vmem:[%s2345_s7 + $0xc8] sm:$0xff] %v1361_v33  ;;  %v1371_v38 = vld [vmem:[%s2349_s11 + $0xd8] sm:$0xff]  ;;  %v1373_v39 = vld [vmem:[%s2349_s11 + $0xe0] sm:$0xff] }
 0x256   : >> { %1364 = vst [vmem:[%s2345_s7 + $0xd0] sm:$0xff] %v1363_v34  ;;  %1366 = vst [vmem:[%s2345_s7 + $0xd8] sm:$0xff] %v1365_v35  ;;  %v1375_v40 = vld [vmem:[%s2349_s11 + $0xe8] sm:$0xff]  ;;  %v1377_v41 = vld [vmem:[%s2349_s11 + $0xf0] sm:$0xff]  ;;  %1257 = sbr.rel (!%p1254_p0) target bundleno = 584 (0x248), region = 301 }
 0x257   : >> { %1368 = vst [vmem:[%s2345_s7 + $0xe0] sm:$0xff] %v1367_v36  ;;  %1370 = vst [vmem:[%s2345_s7 + $0xe8] sm:$0xff] %v1369_v37  ;;  %v1379_v42 = vld [vmem:[%s2349_s11 + $0xf8] sm:$0xff]  ;;  %v1381_v43 = vld [vmem:[%s2349_s11 + $0x100] sm:$0xff] }
 0x258   : >> { %1372 = vst [vmem:[%s2345_s7 + $0xf0] sm:$0xff] %v1371_v38  ;;  %1374 = vst [vmem:[%s2345_s7 + $0xf8] sm:$0xff] %v1373_v39  ;;  %v1383_v44 = vld [vmem:[%s2349_s11 + $0x108] sm:$0xff]  ;;  %v1385_v45 = vld [vmem:[%s2349_s11 + $0x110] sm:$0xff] }
 0x259   : >> { %1376 = vst [vmem:[%s2345_s7 + $0x100] sm:$0xff] %v1375_v40  ;;  %1378 = vst [vmem:[%s2345_s7 + $0x108] sm:$0xff] %v1377_v41  ;;  %v1387_v46 = vld [vmem:[%s2349_s11 + $0x118] sm:$0xff]  ;;  %s3623_s11 = smov %s1394_s26 }
 0x25a   : >> { %1380 = vst [vmem:[%s2345_s7 + $0x110] sm:$0xff] %v1379_v42  ;;  %1382 = vst [vmem:[%s2345_s7 + $0x118] sm:$0xff] %v1381_v43 }
 0x25b   : >> { %1384 = vst [vmem:[%s2345_s7 + $0x120] sm:$0xff] %v1383_v44  ;;  %1386 = vst [vmem:[%s2345_s7 + $0x128] sm:$0xff] %v1385_v45 }
 0x25c   : >> { %1388 = vst [vmem:[%s2345_s7 + $0x130] sm:$0xff] %v1387_v46  ;;  %s3622_s7 = smov %s1395_s17 }
 0x25d PF: > { %s3561_s12 = sand.u32 31, %s1248_s4   ;;  %s1733_s27 = sshll.u32 %s3441_s6, 12 }
 0x25e   : > { %s1400_s8 = sshra.s32 %s1733_s27, 4  ;;  %p1719_p1 = scmp.le.s32.totalorder %s3561_s12, 0 }
 0x25f   : > { %s3565_s5 = scalar_lea.vmem %s3266_s22, %s1400_s8 [#allocation3]   ;;  %s1404_s18 = scalar_lea.vmem %s3283_s30, %s1400_s8  }
 0x260   : > { %1632 = sbr.rel (%p1719_p1) target bundleno = 625 (0x271), region = 306  ;;  %s2359_s21 = smov (!%p1719_p1), %s1404_s18  }
 0x261   : > { %s2363_s15 = smov (!%p1719_p1), %s3565_s5   ;;  %s2367_s28 = smov (!%p1719_p1), 0  }
 0x262   : > { %s2371_s7 = smov (!%p1719_p1), 0  }
 0x267 LB: >> { %v1416_v47 = vld [vmem:[%s2365_s15] sm:$0xff]  ;;  %s1420_s4 = sadd.s32 1, %s2369_s28  ;;  %s1410_s7 = sadd.s32 1, %s2373_s7   ;;  %s2373_s7 = sphi %s2371_s7, %s1410_s7   ;;  %s2369_s28 = sphi %s2367_s28, %s2368_s28   ;;  %s2365_s15 = sphi %s2363_s15, %s1425_s15   ;;  %s2361_s21 = sphi %s2359_s21, %s1426_s21  }
 0x268   : >> { %v1418_v48 = vld [vmem:[%s2365_s15 + $0x20] sm:$0xff]  ;;  %1417 = vst [vmem:[%s2361_s21] sm:$0xff] %v1416_v47  ;;  %p1421_p2 = scmp.ge.s32.totalorder %s1420_s4, %s3561_s12  ;;  %p1409_p3 = scmp.ge.s32.totalorder %s1410_s7, %s3561_s12 }
 0x269   : >> { %1419 = vst [vmem:[%s2361_s21 + $0x38] sm:$0xff] %v1418_v48 }
 0x26a   : >> { %s3647_s4 = smov (%p1421_p2, %s1420_s4), 0  ;;  %1412 = sbr.rel (!%p1409_p3) target bundleno = 615 (0x267), region = 312 }
 0x26b   : >> { %s1720_s6 = sshll.u32 %s3647_s4, 3  ;;  %s2368_s28 = smov %s3647_s4  }
 0x26c   : >> { %s1425_s15 = scalar_lea.vmem %s3565_s5, %s1720_s6 [#allocation3]   ;;  %s1426_s21 = scalar_lea.vmem %s1404_s18, %s1720_s6  }
 0x271 PF: > { %s2378_s11 = smov 0  }
 0x272   : > { %s1427_s29 = sshllo.u32 %s2378_s11, %s3289_s20 }
 0x273   : > { %v1436_v49 = vld [vmem:[%s3434_s10] sm:%s1427_s29] }
 0x274   : > { %v1438_v50 = vld [vmem:[%s3434_s10 + $0x20] sm:%s1427_s29]  ;;  %1437 = vst [vmem:[%s3437_s14] sm:%s1427_s29] %v1436_v49 }
 0x275   : > { %1439 = vst [vmem:[%s3437_s14 + $0x38] sm:%s1427_s29] %v1438_v50 }
 0x276 PF: > { %p1722_p5 = scmp.ge.u32.totalorder %s3285_s9, 8 }
 0x277   : > { %s2379_s23 = smov (!%p1722_p5), 0  }
 0x278   : > { %1042 = sbr.rel (%p1722_p5) target bundleno = 639 (0x27f), region = 114  ;;  %s1043_s24 = sshllo.u32 (!%p1722_p5), %s2379_s23, %s3285_s9 }
 0x279   : > { %v1052_v51 = vld [vmem:[%s3266_s22] sm:%s1043_s24] (!%p1722_p5) }
 0x27a   : > { %v1054_v52 = vld [vmem:[%s3266_s22 + $0x20] sm:%s1043_s24] (!%p1722_p5)  ;;  %1053 = vst [vmem:[%s3283_s30] sm:%s1043_s24] (!%p1722_p5), %v1052_v51 }
 0x27b   : > { %1055 = vst [vmem:[%s3283_s30 + $0x38] sm:%s1043_s24] (!%p1722_p5), %v1054_v52 }
 0x27f PF: > { %p10_p4 = scmp.ge.s32.totalorder %s2419_s16, 4   ;;  %s3625_s12 = smov %s2241_s13 }
 0x280   : > { %s3626_s13 = smov %s2429_s19  ;;  %s3627_s14 = smov %s2419_s16 }
 0x281   :  { %12 = sbr.rel (!%p10_p4) target bundleno = 2 (0x2), region = 323 }

// kernel: i2a_forward.8
= control target key start
LH: loop header
LB: loop body
LE: loop exit
PB: predicated region body
PF: predicated region fallthrough
CT: control target
= control target key end

     0   :  { %v1020_v7 = vmov 0   ;;  %vm1022_vm0 = vmmov 0   ;;  %vm141_vm1 = vcmask 523264   ;;  %s1024_s23 = smov 64   ;;  %vm412_vm2 = vcmask 261120   ;;  %s1412_s2 = inlined_call_operand.vmem [shape: f32[576,96], index: 2, kind: input, shape index: {}]   ;;  %s1413_s0 = inlined_call_operand.vmem [shape: f32[24,576], index: 0, kind: input, shape index: {}]   ;;  %s1414_s1 = inlined_call_operand.vmem [shape: f32[24,1], index: 1, kind: input, shape index: {}]   ;;  %s1415_s4 = inlined_call_operand.vmem [shape: f32[32,96], index: 4, kind: input, shape index: {}]   ;;  %s1416_s3 = inlined_call_operand.vmem [shape: f32[1,96], index: 3, kind: input, shape index: {}]   ;;  %s1417_s6 = inlined_call_operand.vmem [shape: f32[1,96], index: 6, kind: input, shape index: {}]   ;;  %s1418_s5 = inlined_call_operand.vmem [shape: f32[1,96], index: 5, kind: input, shape index: {}]   ;;  %s1419_s7 = inlined_call_operand.vmem [shape: f32[8,32], index: 7, kind: output, shape index: {}]  }
   0x1   :  { %v57_v0 = vld [vmem:[%s1412_s2 + $0x80] sm:$0xff]  ;;  %v58_v1 = vld [vmem:[%s1412_s2 + $0x88] sm:$0xff]  ;;  %1000 = vset.pattern.permute.xlu0 %v1020_v7  ;;  %1001 = vset.pattern.permute.xlu1 %v1020_v7  ;;  %v59_v12 = vld [vmem:[%s1412_s2 + $0x90] sm:$0xff] }
   0x2   :  { %v89_v2 = vld [vmem:[%s1412_s2 + $0x180] sm:$0xff]  ;;  %v900_v3 = vpack.c.bf16 %v58_v1, %v57_v0  ;;  %v90_v4 = vld [vmem:[%s1412_s2 + $0x188] sm:$0xff]  ;;  %v60_v14 = vld [vmem:[%s1412_s2 + $0x98] sm:$0xff] }
   0x3   :  { %v41_v5 = vld [vmem:[%s1412_s2] sm:$0xff]  ;;  %v42_v6 = vld [vmem:[%s1412_s2 + $0x8] sm:$0xff]  ;;  %v932_v8 = vpack.c.bf16 %v90_v4, %v89_v2  ;;  %v91_v15 = vld [vmem:[%s1412_s2 + $0x190] sm:$0xff]  ;;  %v904_v17 = vpack.c.bf16 %v60_v14, %v59_v12 }
   0x4   :  { %v902_v9 = vpack.c.bf16 %v42_v6, %v41_v5  ;;  %v73_v10 = vld [vmem:[%s1412_s2 + $0x100] sm:$0xff]  ;;  %v74_v11 = vld [vmem:[%s1412_s2 + $0x108] sm:$0xff]  ;;  %901 = vmatprep.subr.bf16.mxu0 %v900_v3  ;;  %v92_v16 = vld [vmem:[%s1412_s2 + $0x198] sm:$0xff] }
   0x5   :  { %v934_v13 = vpack.c.bf16 %v74_v11, %v73_v10  ;;  %933 = vmatprep.subr.bf16.mxu1 %v932_v8  ;;  %v936_v18 = vpack.c.bf16 %v92_v16, %v91_v15  ;;  %v43_v19 = vld [vmem:[%s1412_s2 + $0x10] sm:$0xff]  ;;  %v44_v20 = vld [vmem:[%s1412_s2 + $0x18] sm:$0xff]  ;;  %v61_v24 = vld [vmem:[%s1412_s2 + $0xa0] sm:$0xff] }
   0x6   :  { %903 = vmatpush3.bf16.msra.mxu0 %v902_v9  ;;  %v75_v21 = vld [vmem:[%s1412_s2 + $0x110] sm:$0xff]  ;;  %v906_v22 = vpack.c.bf16 %v44_v20, %v43_v19  ;;  %v76_v23 = vld [vmem:[%s1412_s2 + $0x118] sm:$0xff]  ;;  %v62_v25 = vld [vmem:[%s1412_s2 + $0xa8] sm:$0xff] }
   0x7   :  { %935 = vmatpush3.bf16.msra.mxu1 %v934_v13  ;;  %905 = vmatprep.subr.bf16.mxu0 %v904_v17  ;;  %v938_v26 = vpack.c.bf16 %v76_v23, %v75_v21  ;;  %v908_v27 = vpack.c.bf16 %v62_v25, %v61_v24  ;;  %v93_v28 = vld [vmem:[%s1412_s2 + $0x1a0] sm:$0xff]  ;;  %v94_v29 = vld [vmem:[%s1412_s2 + $0x1a8] sm:$0xff]  ;;  %v63_v36 = vld [vmem:[%s1412_s2 + $0xb0] sm:$0xff] }
   0x8   :  { %937 = vmatprep.subr.bf16.mxu1 %v936_v18  ;;  %v45_v30 = vld [vmem:[%s1412_s2 + $0x20] sm:$0xff]  ;;  %v940_v31 = vpack.c.bf16 %v94_v29, %v93_v28  ;;  %v46_v32 = vld [vmem:[%s1412_s2 + $0x28] sm:$0xff]  ;;  %v64_v37 = vld [vmem:[%s1412_s2 + $0xb8] sm:$0xff] }
   0x9   :  { %v77_v33 = vld [vmem:[%s1412_s2 + $0x120] sm:$0xff]  ;;  %v78_v34 = vld [vmem:[%s1412_s2 + $0x128] sm:$0xff]  ;;  %v910_v35 = vpack.c.bf16 %v46_v32, %v45_v30  ;;  %v95_v38 = vld [vmem:[%s1412_s2 + $0x1b0] sm:$0xff]  ;;  %v912_v40 = vpack.c.bf16 %v64_v37, %v63_v36 }
   0xa   :  { %907 = vmatpush3.bf16.msra.mxu0 %v906_v22  ;;  %v942_v39 = vpack.c.bf16 %v78_v34, %v77_v33  ;;  %v96_v41 = vld [vmem:[%s1412_s2 + $0x1b8] sm:$0xff]  ;;  %v47_v42 = vld [vmem:[%s1412_s2 + $0x30] sm:$0xff]  ;;  %v65_v47 = vld [vmem:[%s1412_s2 + $0xc0] sm:$0xff] }
   0xb   :  { %939 = vmatpush3.bf16.msra.mxu1 %v938_v26  ;;  %909 = vmatprep.subr.bf16.mxu0 %v908_v27  ;;  %v48_v43 = vld [vmem:[%s1412_s2 + $0x38] sm:$0xff]  ;;  %v944_v44 = vpack.c.bf16 %v96_v41, %v95_v38  ;;  %v79_v45 = vld [vmem:[%s1412_s2 + $0x130] sm:$0xff]  ;;  %v66_v48 = vld [vmem:[%s1412_s2 + $0xc8] sm:$0xff] }
   0xc   :  { %941 = vmatprep.subr.bf16.mxu1 %v940_v31  ;;  %v80_v46 = vld [vmem:[%s1412_s2 + $0x138] sm:$0xff]  ;;  %v97_v49 = vld [vmem:[%s1412_s2 + $0x1c0] sm:$0xff]  ;;  %v98_v50 = vld [vmem:[%s1412_s2 + $0x1c8] sm:$0xff]  ;;  %v914_v51 = vpack.c.bf16 %v48_v43, %v47_v42  ;;  %v916_v53 = vpack.c.bf16 %v66_v48, %v65_v47  ;;  %v1021_v43 = vmov 0.0|0.0  }
   0xd   :  { %v946_v52 = vpack.c.bf16 %v80_v46, %v79_v45  ;;  %v49_v54 = vld [vmem:[%s1412_s2 + $0x40] sm:$0xff]  ;;  %v50_v55 = vld [vmem:[%s1412_s2 + $0x48] sm:$0xff]  ;;  %v948_v57 = vpack.c.bf16 %v98_v50, %v97_v49  ;;  %v67_v59 = vld [vmem:[%s1412_s2 + $0xd0] sm:$0xff] }
   0xe   :  { %911 = vmatpush3.bf16.msra.mxu0 %v910_v35  ;;  %v81_v56 = vld [vmem:[%s1412_s2 + $0x140] sm:$0xff]  ;;  %v82_v58 = vld [vmem:[%s1412_s2 + $0x148] sm:$0xff]  ;;  %v68_v60 = vld [vmem:[%s1412_s2 + $0xd8] sm:$0xff]  ;;  %v918_v63 = vpack.c.bf16 %v50_v55, %v49_v54 }
   0xf   :  { %943 = vmatpush3.bf16.msra.mxu1 %v942_v39  ;;  %913 = vmatprep.subr.bf16.mxu0 %v912_v40  ;;  %v99_v61 = vld [vmem:[%s1412_s2 + $0x1d0] sm:$0xff]  ;;  %v100_v62 = vld [vmem:[%s1412_s2 + $0x1d8] sm:$0xff]  ;;  %v950_v0 = vpack.c.bf16 %v82_v58, %v81_v56  ;;  %v920_v1 = vpack.c.bf16 %v68_v60, %v67_v59  ;;  %v69_v7 = vld [vmem:[%s1412_s2 + $0xe0] sm:$0xff] }
  0x10   :  { %945 = vmatprep.subr.bf16.mxu1 %v944_v44  ;;  %v51_v2 = vld [vmem:[%s1412_s2 + $0x50] sm:$0xff]  ;;  %v52_v3 = vld [vmem:[%s1412_s2 + $0x58] sm:$0xff]  ;;  %v952_v5 = vpack.c.bf16 %v100_v62, %v99_v61  ;;  %v70_v8 = vld [vmem:[%s1412_s2 + $0xe8] sm:$0xff] }
  0x11   :  { %v83_v4 = vld [vmem:[%s1412_s2 + $0x150] sm:$0xff]  ;;  %v84_v6 = vld [vmem:[%s1412_s2 + $0x158] sm:$0xff]  ;;  %v101_v9 = vld [vmem:[%s1412_s2 + $0x1e0] sm:$0xff]  ;;  %v922_v11 = vpack.c.bf16 %v52_v3, %v51_v2  ;;  %v924_v15 = vpack.c.bf16 %v70_v8, %v69_v7 }
  0x12   :  { %915 = vmatpush3.bf16.msra.mxu0 %v914_v51  ;;  %v102_v10 = vld [vmem:[%s1412_s2 + $0x1e8] sm:$0xff]  ;;  %v53_v12 = vld [vmem:[%s1412_s2 + $0x60] sm:$0xff]  ;;  %v954_v14 = vpack.c.bf16 %v84_v6, %v83_v4  ;;  %v29_v18 = vld [vmem:[%s1413_s0 + $0x18] sm:$0xff] }
  0x13   :  { %947 = vmatpush3.bf16.msra.mxu1 %v946_v52  ;;  %917 = vmatprep.subr.bf16.mxu0 %v916_v53  ;;  %v54_v13 = vld [vmem:[%s1412_s2 + $0x68] sm:$0xff]  ;;  %v85_v16 = vld [vmem:[%s1412_s2 + $0x160] sm:$0xff]  ;;  %v956_v19 = vpack.c.bf16 %v102_v10, %v101_v9  ;;  %v71_v21 = vld [vmem:[%s1412_s2 + $0xf0] sm:$0xff] }
  0x14   :  { %949 = vmatprep.subr.bf16.mxu1 %v948_v57  ;;  %v27_v17 = vld [vmem:[%s1413_s0 + $0x8] sm:$0xff]  ;;  %v72_v22 = vld [vmem:[%s1412_s2 + $0xf8] sm:$0xff]  ;;  %v103_v23 = vld [vmem:[%s1412_s2 + $0x1f0] sm:$0xff]  ;;  %295 = vmatprep.mubr.f32.mxu1 %v29_v18  ;;  %v926_v25 = vpack.c.bf16 %v54_v13, %v53_v12 }
  0x15   :  { %v86_v20 = vld [vmem:[%s1412_s2 + $0x168] sm:$0xff]  ;;  %215 = vmatprep.mubr.f32.mxu0 %v27_v17  ;;  %v104_v24 = vld [vmem:[%s1412_s2 + $0x1f8] sm:$0xff]  ;;  %v928_v27 = vpack.c.bf16 %v72_v22, %v71_v21  ;;  %v55_v28 = vld [vmem:[%s1412_s2 + $0x70] sm:$0xff] }
  0x16   :  { %919 = vmatpush3.bf16.msra.mxu0 %v918_v63  ;;  %v958_v26 = vpack.c.bf16 %v86_v20, %v85_v16  ;;  %v56_v29 = vld [vmem:[%s1412_s2 + $0x78] sm:$0xff]  ;;  %v960_v30 = vpack.c.bf16 %v104_v24, %v103_v23  ;;  %v87_v31 = vld [vmem:[%s1412_s2 + $0x170] sm:$0xff]  ;;  %v105_v35 = vld [vmem:[%s1412_s2 + $0x200] sm:$0xff] }
  0x17   :  { %951 = vmatpush3.bf16.msra.mxu1 %v950_v0  ;;  %921 = vmatprep.subr.bf16.mxu0 %v920_v1  ;;  %v88_v32 = vld [vmem:[%s1412_s2 + $0x178] sm:$0xff]  ;;  %v930_v33 = vpack.c.bf16 %v56_v29, %v55_v28  ;;  %v106_v36 = vld [vmem:[%s1412_s2 + $0x208] sm:$0xff]  ;;  %v113_v37 = vld [vmem:[%s1414_s1] sm:$0xff]  ;;  %v1023_v1 = vmov 0.0  }
  0x18   :  { %953 = vmatprep.subr.bf16.mxu1 %v952_v5  ;;  %v962_v34 = vpack.c.bf16 %v88_v32, %v87_v31  ;;  %v401_v38 = vld [vmem:[%s1415_s4] sm:$0xff]  ;;  %v402_v39 = vld [vmem:[%s1415_s4 + $0x8] sm:$0xff]  ;;  %119 = vperm.xlu0 %1000, %v113_v37   ;;  %v965_v41 = vpack.c.bf16 %v106_v36, %v105_v35  ;;  %v28_v42 = vld [vmem:[%s1413_s0 + $0x10] sm:$0xff] }
  0x19   :  { %v26_v40 = vld [vmem:[%s1413_s0] sm:$0xff]  ;;  %v977_v44 = vpack.c.bf16 %v402_v39, %v401_v38  ;;  %v107_v45 = vld [vmem:[%s1412_s2 + $0x210] sm:$0xff]  ;;  %v108_v46 = vld [vmem:[%s1412_s2 + $0x218] sm:$0xff] }
  0x1a   :  { %923 = vmatpush3.bf16.msra.mxu0 %v922_v11  ;;  %v34_v47 = vld [vmem:[%s1413_s0 + $0x40] sm:$0xff]  ;;  %v403_v48 = vld [vmem:[%s1415_s4 + $0x10] sm:$0xff]  ;;  %v404_v49 = vld [vmem:[%s1415_s4 + $0x18] sm:$0xff]  ;;  %v968_v50 = vpack.c.bf16 %v108_v46, %v107_v45 }
  0x1b   :  { %955 = vmatpush3.bf16.msra.mxu1 %v954_v14  ;;  %925 = vmatprep.subr.bf16.mxu0 %v924_v15  ;;  %v32_v51 = vld [vmem:[%s1413_s0 + $0x30] sm:$0xff]  ;;  %v33_v52 = vld [vmem:[%s1413_s0 + $0x38] sm:$0xff]  ;;  %v980_v53 = vpack.c.bf16 %v404_v49, %v403_v48  ;;  %v109_v54 = vld [vmem:[%s1412_s2 + $0x220] sm:$0xff] }
  0x1c   :  { %957 = vmatprep.subr.bf16.mxu1 %v956_v19  ;;  %v110_v55 = vld [vmem:[%s1412_s2 + $0x228] sm:$0xff]  ;;  %v37_v59 = vld [vmem:[%s1413_s0 + $0x58] sm:$0xff]  ;;  %v38_v60 = vld [vmem:[%s1413_s0 + $0x60] sm:$0xff] }
  0x1d   :  { %v39_v56 = vld [vmem:[%s1413_s0 + $0x68] sm:$0xff]  ;;  %v971_v58 = vpack.c.bf16 %v110_v55, %v109_v54  ;;  %v111_v61 = vld [vmem:[%s1412_s2 + $0x230] sm:$0xff]  ;;  %v112_v62 = vld [vmem:[%s1412_s2 + $0x238] sm:$0xff] }
  0x1e   :  { %927 = vmatpush3.bf16.msra.mxu0 %v926_v25  ;;  %v31_v57 = vld [vmem:[%s1413_s0 + $0x28] sm:$0xff]  ;;  %v36_v63 = vld [vmem:[%s1413_s0 + $0x50] sm:$0xff]  ;;  %v974_v0 = vpack.c.bf16 %v112_v62, %v111_v61  ;;  %v30_v2 = vld [vmem:[%s1413_s0 + $0x20] sm:$0xff] }
  0x1f   :  { %959 = vmatpush3.bf16.msra.mxu1 %v958_v26  ;;  %929 = vmatprep.subr.bf16.mxu0 %v928_v27  ;;  %v1349_v3 = vld [vmem:[%s1416_s3] ss:$0 sm:$0xff]  ;;  %v35_v14 = vld [vmem:[%s1413_s0 + $0x48] sm:$0xff] }
  0x20   :  { %961 = vmatprep.subr.bf16.mxu1 %v960_v30  ;;  %v1363_v24 = vld [vmem:[%s1417_s6] ss:$0 sm:$0xff]  ;;  %s1025_s6 = smov 96   ;;  %v114_v46 = vld [vmem:[%s1414_s1 + $0x8] sm:$0xff] }
  0x22   :  { %931 = vmatpush3.bf16.msra.mxu0 %v930_v33 }
  0x23   :  { %963 = vmatpush3.bf16.msra.mxu1 %v962_v34  ;;  %964 = vmatprep.subr.bf16.mxu0 %v1021_v43  ;;  %v1372_v34 = vld [vmem:[%s1418_s5] ss:$0 sm:$0xff] }
  0x24   :  { %976 = vmatprep.subr.bf16.mxu1 %v1021_v43 }
  0x25   :  { %216 = vmatmul.mubr.f32.vlgmr.msra.gmra.mrb[0].mxu0 %v26_v40 }
  0x26   :  { %296 = vmatmul.mubr.f32.vlgmr.msra.gmra.mrb[0].mxu1 %v28_v42  ;;  %966 = vmatpush3.bf16.msra.mxu0 %v965_v41 }
  0x27   :  { %978 = vmatpush3.bf16.msra.mxu1 %v977_v44  ;;  %300 = vmatprep.mubr.f32.mxu1 %v34_v47 }
  0x28   :  { %967 = vmatprep.subr.bf16.mxu0 %v1021_v43  ;;  %979 = vmatprep.subr.bf16.mxu1 %v1021_v43 }
  0x29   :  { %220 = vmatprep.mubr.f32.mxu0 %v32_v51 }
  0x2a   :  { %301 = vmatmul.mubr.f32.gmra.mrb[2].mxu1 %v33_v52  ;;  %969 = vmatpush3.bf16.msra.mxu0 %v968_v50 }
  0x2b   :  { %305 = vmatprep.mubr.f32.mxu1 %v39_v56  ;;  %981 = vmatpush3.bf16.msra.mxu1 %v980_v53 }
  0x2c   :  { %221 = vmatmul.mubr.f32.gmra.mrb[2].mxu0 %v31_v57  ;;  %970 = vmatprep.subr.bf16.mxu0 %v1021_v43 }
  0x2d   :  { %225 = vmatprep.mubr.f32.mxu0 %v37_v59  ;;  %982 = vmatprep.subr.bf16.mxu1 %v1021_v43 }
  0x2e   :  { %306 = vmatmul.mubr.f32.gmra.mrb[4].mxu1 %v38_v60  ;;  %972 = vmatpush3.bf16.msra.mxu0 %v971_v58  ;;  %v40_v60 = vld [vmem:[%s1413_s0 + $0x70] sm:$0xff] }
  0x2f   :  { %875 = vmatprep.mubr.msk.f32.mxu1 %vm1022_vm0, %v1023_v1  ;;  %973 = vmatprep.subr.bf16.mxu0 %v1021_v43 }
  0x30   :  { %226 = vmatmul.mubr.f32.gmra.mrb[4].mxu0 %v36_v63 }
  0x31   :  { %858 = vmatprep.mubr.msk.f32.mxu0 %vm1022_vm0, %v1023_v1 }
  0x32   :  { %876 = vmatmul.mubr.f32.vlgmr.msra.gmra.mrb[6].mxu1 %v1023_v1  ;;  %975 = vmatpush3.bf16.msra.mxu0 %v974_v0 }
  0x33   :  { %984 = vmatpush3.bf16.msra.mxu1 %v977_v44  ;;  %886 = vmatprep.mubr.msk.f32.mxu1 %vm1022_vm0, %v1023_v1 }
  0x34   :  { %985 = vmatprep.subr.bf16.mxu1 %v1021_v43  ;;  %988 = vmatprep.subr.bf16.mxu0 %v1021_v43 }
  0x35   :  { %859 = vmatmul.mubr.msk.f32.vlgmr.msra.gmra.mrb[6].mxu0 %vm141_vm1, %v30_v2 }
  0x36   :  { %861 = vmatprep.mubr.msk.f32.mxu0 %vm1022_vm0, %v1023_v1  ;;  %990 = vmatpush3.bf16.msra.mxu0 %v977_v44 }
  0x37   :  { %987 = vmatpush3.bf16.msra.mxu1 %v980_v53  ;;  %991 = vmatprep.subr.bf16.mxu0 %v1021_v43 }
  0x39   :  { %862 = vmatmul.mubr.msk.f32.gmra.mrb[8].mxu0 %vm141_vm1, %v35_v14 }
  0x3a   :  { %993 = vmatpush3.bf16.msra.mxu0 %v980_v53  ;;  %864 = vmatprep.mubr.msk.f32.mxu0 %vm1022_vm0, %v1023_v1 }
  0x3d   :  { %865 = vmatmul.mubr.msk.f32.gmra.mrb[10].mxu0 %vm141_vm1, %v40_v60 }
  0x3e   :  { %897 = vmatprep.mubr.msk.f32.mxu0 %vm1022_vm0, %v1023_v1 }
  0x97   :  { %v120_v4 = vpop.permute.xlu0 %119 }
  0x98   :  { %v138_v6 = vmul.f32 %v1349_v3, %v120_v4 }
  0xf8   :  { %v766_v5 = vpop.f32.mrb[0].mxu0 }
  0xf9   :  { %v807_v7 = vpop.f32.mrb[0].mxu1  ;;  %v767_v8 = vpop.f32.mrb[1].mxu0 }
  0xfa   :  { %v768_v9 = vadd.f32 %v767_v8, %v766_v5  ;;  %v808_v10 = vpop.f32.mrb[1].mxu1 }
  0xfb   :  { %v809_v11 = vadd.f32 %v808_v10, %v807_v7 }
  0xfc   :  { %v218_v12 = vadd.f32 %v768_v9, %v138_v6 }
  0xfd   :  { %v810_v13 = vpop.f32.mrb[2].mxu1 }
  0xfe   :  { %v811_v15 = vpop.f32.mrb[3].mxu1  ;;  %v298_v16 = vadd.f32 %v809_v11, %v218_v12  ;;  %v115_v12 = vld [vmem:[%s1414_s1 + $0x10] sm:$0xff] }
  0xff   :  { %v812_v17 = vadd.f32 %v811_v15, %v810_v13  ;;  %v769_v18 = vpop.f32.mrb[2].mxu0 }
 0x100   :  { %v770_v19 = vpop.f32.mrb[3].mxu0 }
 0x101   :  { %v813_v20 = vpop.f32.mrb[4].mxu1  ;;  %v771_v21 = vadd.f32 %v770_v19, %v769_v18 }
 0x102   :  { %v814_v22 = vpop.f32.mrb[5].mxu1 }
 0x103   :  { %v1358_v23 = vadd.f32 %v814_v22, %v813_v20  ;;  %v772_v25 = vpop.f32.mrb[4].mxu0 }
 0x104   :  { %v773_v26 = vpop.f32.mrb[5].mxu0 }
 0x105   :  { %v482_v27 = vpop.f32.mrb[6].mxu1  ;;  %v1365_v28 = vadd.f32 %v773_v26, %v772_v25 }
 0x106   :  { %v483_v29 = vadd.f32 %v1363_v24, %v482_v27  ;;  %v877_v30 = vpop.f32.mrb[7].mxu1 }
 0x108   :  { %494 = vrot.lane.b32.xlu0 %v483_v29, %s1024_s23  ;;  %v377_v31 = vpop.f32.mrb[6].mxu0 }
 0x109   :  { %v378_v32 = vadd.f32 %v377_v31, %v298_v16  ;;  %v860_v33 = vpop.f32.mrb[7].mxu0 }
 0x10b   :  { %v398_v35 = vadd.f32 %v1372_v34, %v378_v32 }
 0x10c   :  { %v382_v47 = vpop.f32.mrb[8].mxu0 }
 0x10d   :  { %v486_v36 = vadd.f32 %v483_v29, %v398_v35  ;;  %v863_v48 = vpop.f32.mrb[9].mxu0 }
 0x10f   :  { %v729_v37 = vmul.f32 -1.442695, %v486_v36 }
 0x110   :  { %v387_v13 = vpop.f32.mrb[10].mxu0 }
 0x111   :  { %1002 = vpow2.f32 %v729_v37  ;;  %v866_v14 = vpop.f32.mrb[11].mxu0 }
 0x11b   :  { %v1003_v38 = vpop.eup %1002 }
 0x11c   :  { %v490_v39 = vadd.f32 1.0, %v1003_v38 }
 0x11e   :  { %1004 = vrcp.f32 %v490_v39 }
 0x128   :  { %v1005_v40 = vpop.eup %1004 }
 0x129   :  { %v504_v49 = vsub.f32 1.0, %v1005_v40  ;;  %v510_v51 = vmul.f32 0.0, %v1005_v40 }
 0x17a   :  { %v495_v41 = vpop.permute.xlu0 %494 }
 0x17b   :  { %v497_v42 = vmul.f32 %v1005_v40, %v495_v41 }
 0x17d   :  { %499 = vrot.lane.b32.xlu1 %v497_v42, %s1024_s23 }
 0x1ef   :  { %v500_v43 = vpop.permute.xlu1 %499 }
 0x1f0   :  { %v502_v44 = vadd.f32 %v500_v43, %v398_v35 }
 0x1f2   :  { %1006 = vtanh.f32 %v502_v44 }
 0x1fc   :  { %v1007_v45 = vpop.eup %1006 }
 0x1fd   :  { %506 = vrot.lane.b32.xlu1 %v1007_v45, %s1025_s6 }
 0x201   :  { %124 = vperm.xlu1 %1001, %v114_v46  }
 0x26f   :  { %v507_v50 = vpop.permute.xlu1 %506 }
 0x270   :  { %v509_v52 = vmul.f32 %v507_v50, %v504_v49 }
 0x272   :  { %v511_v53 = vadd.f32 %v510_v51, %v509_v52 }
 0x274   :  { %513 = vrot.lane.b32.xlu0 %v511_v53, %s1025_s6 }
 0x280   :  { %v125_v54 = vpop.permute.xlu1 %124 }
 0x281   :  { %v139_v55 = vmul.f32 %v1349_v3, %v125_v54 }
 0x283   :  { %v223_v56 = vadd.f32 %v771_v21, %v139_v55 }
 0x285   :  { %v303_v57 = vadd.f32 %v812_v17, %v223_v56 }
 0x287   :  { %v383_v58 = vadd.f32 %v382_v47, %v303_v57 }
 0x289   :  { %v399_v0 = vadd.f32 %v1372_v34, %v383_v58 }
 0x2e6   :  { %v514_v59 = vpop.permute.xlu0 %513 }
 0x2e7   :  { %887 = vmatmul.mubr.msk.f32.vlgmr.msra.gmra.mrb[8].mxu1 %vm412_vm2, %v514_v59 }
 0x3ba   :  { %v583_v61 = vpop.f32.mrb[8].mxu1 }
 0x3bb   :  { %v584_v62 = vadd.f32 %v1363_v24, %v583_v61  ;;  %v888_v63 = vpop.f32.mrb[9].mxu1 }
 0x3bd   :  { %595 = vrot.lane.b32.xlu0 %v584_v62, %s1024_s23  ;;  %v587_v2 = vadd.f32 %v584_v62, %v399_v0 }
 0x3bf   :  { %v731_v4 = vmul.f32 -1.442695, %v587_v2 }
 0x3c1   :  { %1008 = vpow2.f32 %v731_v4 }
 0x3cb   :  { %v1009_v5 = vpop.eup %1008 }
 0x3cc   :  { %v591_v6 = vadd.f32 1.0, %v1009_v5 }
 0x3ce   :  { %1010 = vrcp.f32 %v591_v6 }
 0x3d8   :  { %v1011_v7 = vpop.eup %1010 }
 0x3d9   :  { %v605_v15 = vsub.f32 1.0, %v1011_v7  ;;  %v611_v17 = vmul.f32 %v1011_v7, %v511_v53 }
 0x42f   :  { %v596_v8 = vpop.permute.xlu0 %595 }
 0x430   :  { %v598_v9 = vmul.f32 %v1011_v7, %v596_v8 }
 0x432   :  { %600 = vrot.lane.b32.xlu1 %v598_v9, %s1024_s23 }
 0x4a4   :  { %v601_v1 = vpop.permute.xlu1 %600 }
 0x4a5   :  { %v603_v10 = vadd.f32 %v601_v1, %v399_v0 }
 0x4a7   :  { %1012 = vtanh.f32 %v603_v10 }
 0x4b1   :  { %v1013_v11 = vpop.eup %1012 }
 0x4b2   :  { %607 = vrot.lane.b32.xlu0 %v1013_v11, %s1025_s6 }
 0x4b6   :  { %129 = vperm.xlu0 %1000, %v115_v12  }
 0x524   :  { %v608_v16 = vpop.permute.xlu0 %607 }
 0x525   :  { %v610_v18 = vmul.f32 %v608_v16, %v605_v15 }
 0x527   :  { %v612_v19 = vadd.f32 %v611_v17, %v610_v18 }
 0x529   :  { %614 = vrot.lane.b32.xlu1 %v612_v19, %s1025_s6 }
 0x535   :  { %v130_v20 = vpop.permute.xlu0 %129 }
 0x536   :  { %v140_v21 = vmul.f32 %v1349_v3, %v130_v20 }
 0x538   :  { %v228_v22 = vadd.f32 %v1365_v28, %v140_v21 }
 0x53a   :  { %v308_v25 = vadd.f32 %v1358_v23, %v228_v22 }
 0x53c   :  { %v388_v26 = vadd.f32 %v387_v13, %v308_v25 }
 0x53e   :  { %v400_v32 = vadd.f32 %v1372_v34, %v388_v26 }
 0x59b   :  { %v615_v27 = vpop.permute.xlu1 %614 }
 0x59c   :  { %898 = vmatmul.mubr.msk.f32.vlgmr.msra.gmra.mrb[12].mxu0 %vm412_vm2, %v615_v27 }
 0x66f   :  { %v684_v29 = vpop.f32.mrb[12].mxu0 }
 0x670   :  { %v685_v30 = vadd.f32 %v1363_v24, %v684_v29  ;;  %v899_v31 = vpop.f32.mrb[13].mxu0 }
 0x672   :  { %696 = vrot.lane.b32.xlu1 %v685_v30, %s1024_s23  ;;  %v688_v33 = vadd.f32 %v685_v30, %v400_v32 }
 0x674   :  { %v733_v35 = vmul.f32 -1.442695, %v688_v33 }
 0x676   :  { %1014 = vpow2.f32 %v733_v35 }
 0x680   :  { %v1015_v3 = vpop.eup %1014 }
 0x681   :  { %v692_v36 = vadd.f32 1.0, %v1015_v3 }
 0x683   :  { %1016 = vrcp.f32 %v692_v36 }
 0x68d   :  { %v1017_v28 = vpop.eup %1016 }
 0x68e   :  { %v706_v40 = vsub.f32 1.0, %v1017_v28  ;;  %v712_v34 = vmul.f32 %v1017_v28, %v612_v19 }
 0x6e4   :  { %v697_v23 = vpop.permute.xlu1 %696 }
 0x6e5   :  { %v699_v37 = vmul.f32 %v1017_v28, %v697_v23 }
 0x6e7   :  { %701 = vrot.lane.b32.xlu0 %v699_v37, %s1024_s23 }
 0x759   :  { %v702_v38 = vpop.permute.xlu0 %701 }
 0x75a   :  { %v704_v39 = vadd.f32 %v702_v38, %v400_v32 }
 0x75c   :  { %1018 = vtanh.f32 %v704_v39 }
 0x766   :  { %v1019_v24 = vpop.eup %1018 }
 0x767   :  { %708 = vrot.lane.b32.xlu1 %v1019_v24, %s1025_s6 }
 0x7d9   :  { %v709_v41 = vpop.permute.xlu1 %708 }
 0x7da   :  { %v711_v42 = vmul.f32 %v709_v41, %v706_v40 }
 0x7dc   :  { %v713_v43 = vadd.f32 %v712_v34, %v711_v42 }
 0x7de   :  { %715 = vrot.lane.b32.xlu0 %v713_v43, %s1025_s6 }
 0x850   :  { %v716_v44 = vpop.permute.xlu0 %715 }
 0x851   :  { %718 = vst.msk [vmem:[%s1419_s7] sm:$0xff] %vm412_vm2, %v716_v44 }

// kernel: i2a_forward.9
= control target key start
LH: loop header
LB: loop body
LE: loop exit
PB: predicated region body
PF: predicated region fallthrough
CT: control target
= control target key end

     0   :  { %v270_v3 = vmov 0.0   ;;  %v271_v8 = vmov 0   ;;  %vm55_vm0 = vcmask 1043456   ;;  %vm48_vm1 = vcmask 293888   ;;  %s394_s1 = inlined_call_operand.vmem [shape: f32[36,392], index: 1, kind: input, shape index: {}]   ;;  %s395_s2 = inlined_call_operand.vmem [shape: f32[16,1], index: 2, kind: input, shape index: {}]   ;;  %s396_s0 = inlined_call_operand.vmem [shape: f32[16,36], index: 0, kind: input, shape index: {}]   ;;  %s397_s3 = inlined_call_operand.vmem [shape: f32[16,392], index: 3, kind: output, shape index: {}]  }
   0x1   :  { %v17_v0 = vld [vmem:[%s394_s1 + $0x8] sm:$0xff]  ;;  %v19_v2 = vld [vmem:[%s394_s1 + $0x18] sm:$0xff]  ;;  %132 = vmatprep.mubr.f32.mxu0 %v270_v3  ;;  %209 = vmatprep.mubr.f32.mxu1 %v270_v3  ;;  %v16_v6 = vld [vmem:[%s394_s1] sm:$0xff]  ;;  %vm233_vm2 = vcmask 64512  }
   0x2   :  { %v21_v1 = vld [vmem:[%s394_s1 + $0x28] sm:$0xff]  ;;  %v23_v5 = vld [vmem:[%s394_s1 + $0x38] sm:$0xff]  ;;  %v20_v7 = vld [vmem:[%s394_s1 + $0x20] sm:$0xff]  ;;  %269 = vset.pattern.permute.xlu0 %v271_v8 }
   0x3   :  { %v251_v4 = vpack.c.bf16 %v21_v1, %v17_v0  ;;  %v259_v9 = vpack.c.bf16 %v23_v5, %v19_v2  ;;  %v253_v10 = vpack.c.bf16 %v20_v7, %v16_v6  ;;  %v18_v11 = vld [vmem:[%s394_s1 + $0x10] sm:$0xff]  ;;  %v25_v13 = vld [vmem:[%s394_s1 + $0x48] sm:$0xff]  ;;  %v27_v16 = vld [vmem:[%s394_s1 + $0x58] sm:$0xff] }
   0x4   :  { %v22_v12 = vld [vmem:[%s394_s1 + $0x30] sm:$0xff]  ;;  %v29_v15 = vld [vmem:[%s394_s1 + $0x68] sm:$0xff]  ;;  %v31_v17 = vld [vmem:[%s394_s1 + $0x78] sm:$0xff] }
   0x5   :  { %252 = vmatprep.subr.bf16.mxu0 %v251_v4  ;;  %v261_v14 = vpack.c.bf16 %v22_v12, %v18_v11  ;;  %260 = vmatprep.subr.bf16.mxu1 %v259_v9  ;;  %v255_v18 = vpack.c.bf16 %v29_v15, %v25_v13  ;;  %v263_v19 = vpack.c.bf16 %v31_v17, %v27_v16  ;;  %v24_v20 = vld [vmem:[%s394_s1 + $0x40] sm:$0xff]  ;;  %v26_v22 = vld [vmem:[%s394_s1 + $0x50] sm:$0xff]  ;;  %v33_v26 = vld [vmem:[%s394_s1 + $0x88] sm:$0xf] }
   0x6   :  { %254 = vmatpush1.bf16.msra.mxu0 %v253_v10  ;;  %v28_v21 = vld [vmem:[%s394_s1 + $0x60] sm:$0xff]  ;;  %v30_v24 = vld [vmem:[%s394_s1 + $0x70] sm:$0xff]  ;;  %v35_v27 = vld [vmem:[%s394_s1 + $0x98] sm:$0xf] }
   0x7   :  { %262 = vmatpush1.bf16.msra.mxu1 %v261_v14  ;;  %v257_v23 = vpack.c.bf16 %v28_v21, %v24_v20  ;;  %256 = vmatprep.subr.bf16.mxu0 %v255_v18  ;;  %v265_v25 = vpack.c.bf16 %v30_v24, %v26_v22  ;;  %v36_v28 = vld [vmem:[%s395_s2] sm:$0xff]  ;;  %v37_v30 = vld [vmem:[%s395_s2 + $0x8] sm:$0xff]  ;;  %v34_v31 = vld [vmem:[%s394_s1 + $0x90] sm:$0xf] }
   0x8   :  { %264 = vmatprep.subr.bf16.mxu1 %v263_v19  ;;  %40 = vperm.xlu0 %269, %v36_v28   ;;  %v32_v29 = vld [vmem:[%s394_s1 + $0x80] sm:$0xf]  ;;  %v15_v33 = vld [vmem:[%s396_s0 + $0x8] sm:$0xff] }
   0x9   :  { %v14_v32 = vld [vmem:[%s396_s0] sm:$0xff] }
   0xa   :  { %258 = vmatpush1.bf16.msra.mxu0 %v257_v23 }
   0xb   :  { %266 = vmatpush1.bf16.msra.mxu1 %v265_v25  ;;  %243 = vmatprep.subr.msk.mxu0 %vm55_vm0, %v33_v26 }
   0xc   :  { %247 = vmatprep.subr.msk.mxu1 %vm55_vm0, %v35_v27  ;;  %45 = vperm.xlu0 %269, %v37_v30  }
   0xe   :  { %244 = vmatpush1.msk.msra.mxu0 %vm55_vm0, %v32_v29 }
   0xf   :  { %248 = vmatpush1.msk.msra.mxu1 %vm55_vm0, %v34_v31  ;;  %245 = vmatmul.mubr.msk.f32.vlgmr.msra.gmra.mrb[0].mxu0 %vm48_vm1, %v14_v32 }
  0x10   :  { %249 = vmatmul.mubr.msk.f32.vlgmr.msra.gmra.mrb[0].mxu1 %vm48_vm1, %v14_v32  ;;  %138 = vmatprep.mubr.f32.mxu0 %v270_v3 }
  0x11   :  { %215 = vmatprep.mubr.f32.mxu1 %v270_v3 }
  0x13   :  { %246 = vmatmul.mubr.msk.f32.gmra.mrb[2].mxu0 %vm48_vm1, %v15_v33 }
  0x14   :  { %250 = vmatmul.mubr.msk.f32.gmra.mrb[2].mxu1 %vm48_vm1, %v15_v33 }
  0x87   :  { %v41_v34 = vpop.permute.xlu0 %40 }
  0x8b   :  { %v46_v45 = vpop.permute.xlu0 %45 }
  0xe2   :  { %v134_v35 = vpop.f32.mrb[0].mxu0 }
  0xe3   :  { %v135_v36 = vadd.f32 %v134_v35, %v41_v34  ;;  %v211_v37 = vpop.f32.mrb[0].mxu1  ;;  %v136_v38 = vpop.f32.mrb[1].mxu0 }
  0xe4   :  { %v212_v39 = vadd.f32 %v211_v37, %v41_v34  ;;  %v137_v40 = vadd.f32 %v136_v38, %v41_v34  ;;  %v213_v41 = vpop.f32.mrb[1].mxu1 }
  0xe5   :  { %v222_v42 = vmax.f32 %v135_v36, 0.0  ;;  %v214_v43 = vadd.f32 %v213_v41, %v41_v34 }
  0xe6   :  { %v224_v44 = vmax.f32 %v212_v39, 0.0  ;;  %v223_v46 = vmax.f32 %v137_v40, 0.0  ;;  %v140_v47 = vpop.f32.mrb[2].mxu0 }
  0xe7   :  { %230 = vst [vmem:[%s397_s3] sm:$0xff] %v222_v42  ;;  %v225_v48 = vmax.f32 %v214_v43, 0.0  ;;  %v141_v49 = vadd.f32 %v140_v47, %v46_v45  ;;  %v217_v50 = vpop.f32.mrb[2].mxu1  ;;  %v142_v51 = vpop.f32.mrb[3].mxu0 }
  0xe8   :  { %232 = vst [vmem:[%s397_s3 + $0x10] sm:$0xff] %v224_v44  ;;  %231 = vst [vmem:[%s397_s3 + $0x8] sm:$0xff] %v223_v46  ;;  %v218_v52 = vadd.f32 %v217_v50, %v46_v45  ;;  %v143_v53 = vadd.f32 %v142_v51, %v46_v45  ;;  %v219_v54 = vpop.f32.mrb[3].mxu1 }
  0xe9   :  { %234 = vst.msk [vmem:[%s397_s3 + $0x18] sm:$0xff] %vm233_vm2, %v225_v48  ;;  %v226_v55 = vmax.f32 %v141_v49, 0.0  ;;  %v220_v56 = vadd.f32 %v219_v54, %v46_v45 }
  0xea   :  { %v228_v57 = vmax.f32 %v218_v52, 0.0  ;;  %v227_v58 = vmax.f32 %v143_v53, 0.0 }
  0xeb   :  { %235 = vst [vmem:[%s397_s3 + $0x20] sm:$0xff] %v226_v55  ;;  %v229_v59 = vmax.f32 %v220_v56, 0.0 }
  0xec   :  { %237 = vst [vmem:[%s397_s3 + $0x30] sm:$0xff] %v228_v57  ;;  %236 = vst [vmem:[%s397_s3 + $0x28] sm:$0xff] %v227_v58 }
  0xed   :  { %238 = vst.msk [vmem:[%s397_s3 + $0x38] sm:$0xff] %vm233_vm2, %v229_v59 }

// kernel: i2a_forward.10
= control target key start
LH: loop header
LB: loop body
LE: loop exit
PB: predicated region body
PF: predicated region fallthrough
CT: control target
= control target key end

     0   :  { %v189_v0 = vmov 0.0|0.0   ;;  %v190_v6 = vmov 0   ;;  %vm48_vm0 = vcmask 130048   ;;  %vm132_vm1 = vcmask 588800   ;;  %s307_s1 = inlined_call_operand.vmem [shape: f32[144,72], index: 1, kind: input, shape index: {}]   ;;  %s308_s0 = inlined_call_operand.vmem [shape: f32[16,144], index: 0, kind: input, shape index: {}]   ;;  %s309_s2 = inlined_call_operand.vmem [shape: f32[16,1], index: 2, kind: input, shape index: {}]   ;;  %s310_s3 = inlined_call_operand.vmem [shape: f32[16,72], index: 3, kind: output, shape index: {}]  }
   0x1   :  { %141 = vmatprep.subr.bf16.mxu0 %v189_v0  ;;  %168 = vmatprep.subr.bf16.mxu1 %v189_v0  ;;  %v18_v1 = vld [vmem:[%s307_s1] sm:$0xff]  ;;  %v19_v2 = vld [vmem:[%s307_s1 + $0x8] sm:$0xff]  ;;  %v20_v3 = vld [vmem:[%s307_s1 + $0x10] sm:$0xff] }
   0x2   :  { %v142_v4 = vpack.c.bf16 %v19_v2, %v18_v1  ;;  %v21_v5 = vld [vmem:[%s307_s1 + $0x18] sm:$0xff]  ;;  %188 = vset.pattern.permute.xlu0 %v190_v6  ;;  %v22_v8 = vld [vmem:[%s307_s1 + $0x20] sm:$0xff]  ;;  %v23_v9 = vld [vmem:[%s307_s1 + $0x28] sm:$0xff] }
   0x3   :  { %v145_v7 = vpack.c.bf16 %v21_v5, %v20_v3  ;;  %v15_v10 = vld [vmem:[%s308_s0 + $0x8] sm:$0xff]  ;;  %v17_v11 = vld [vmem:[%s308_s0 + $0x18] sm:$0xff]  ;;  %v148_v12 = vpack.c.bf16 %v23_v9, %v22_v8  ;;  %v36_v13 = vld [vmem:[%s309_s2] sm:$0xff] }
   0x4   :  { %143 = vmatpush1.bf16.msra.mxu0 %v142_v4  ;;  %177 = vmatpush1.bf16.msra.mxu1 %v142_v4  ;;  %v24_v14 = vld [vmem:[%s307_s1 + $0x30] sm:$0xff]  ;;  %v25_v15 = vld [vmem:[%s307_s1 + $0x38] sm:$0xff]  ;;  %v37_v17 = vld [vmem:[%s309_s2 + $0x8] sm:$0xff] }
   0x5   :  { %144 = vmatprep.subr.bf16.mxu0 %v189_v0  ;;  %169 = vmatprep.subr.bf16.mxu1 %v189_v0  ;;  %v151_v16 = vpack.c.bf16 %v25_v15, %v24_v14  ;;  %v26_v18 = vld [vmem:[%s307_s1 + $0x40] sm:$0xff]  ;;  %v27_v19 = vld [vmem:[%s307_s1 + $0x48] sm:$0xff]  ;;  %v28_v21 = vld [vmem:[%s307_s1 + $0x50] sm:$0xff] }
   0x6   :  { %139 = vmatprep.mubr.msk.f32.mxu0 %vm48_vm0, %v15_v10  ;;  %140 = vmatprep.mubr.msk.f32.mxu1 %vm48_vm0, %v17_v11  ;;  %v154_v20 = vpack.c.bf16 %v27_v19, %v26_v18  ;;  %v29_v22 = vld [vmem:[%s307_s1 + $0x58] sm:$0xff]  ;;  %v30_v24 = vld [vmem:[%s307_s1 + $0x60] sm:$0xff]  ;;  %v31_v25 = vld [vmem:[%s307_s1 + $0x68] sm:$0xff] }
   0x7   :  { %40 = vperm.xlu0 %188, %v36_v13   ;;  %v157_v23 = vpack.c.bf16 %v29_v22, %v28_v21  ;;  %v160_v26 = vpack.c.bf16 %v31_v25, %v30_v24  ;;  %v32_v27 = vld [vmem:[%s307_s1 + $0x70] sm:$0xff]  ;;  %v33_v28 = vld [vmem:[%s307_s1 + $0x78] sm:$0xff]  ;;  %v34_v30 = vld [vmem:[%s307_s1 + $0x80] sm:$0xff] }
   0x8   :  { %146 = vmatpush1.bf16.msra.mxu0 %v145_v7  ;;  %178 = vmatpush1.bf16.msra.mxu1 %v145_v7  ;;  %v163_v29 = vpack.c.bf16 %v33_v28, %v32_v27  ;;  %v35_v31 = vld [vmem:[%s307_s1 + $0x88] sm:$0xff]  ;;  %v14_v33 = vld [vmem:[%s308_s0] sm:$0xff]  ;;  %v16_v34 = vld [vmem:[%s308_s0 + $0x10] sm:$0xff] }
   0x9   :  { %147 = vmatprep.subr.bf16.mxu0 %v189_v0  ;;  %170 = vmatprep.subr.bf16.mxu1 %v189_v0  ;;  %v166_v32 = vpack.c.bf16 %v35_v31, %v34_v30 }
   0xb   :  { %45 = vperm.xlu0 %188, %v37_v17  }
   0xc   :  { %149 = vmatpush1.bf16.msra.mxu0 %v148_v12  ;;  %179 = vmatpush1.bf16.msra.mxu1 %v148_v12 }
   0xd   :  { %150 = vmatprep.subr.bf16.mxu0 %v189_v0  ;;  %171 = vmatprep.subr.bf16.mxu1 %v189_v0 }
  0x10   :  { %152 = vmatpush1.bf16.msra.mxu0 %v151_v16  ;;  %180 = vmatpush1.bf16.msra.mxu1 %v151_v16 }
  0x11   :  { %153 = vmatprep.subr.bf16.mxu0 %v189_v0  ;;  %172 = vmatprep.subr.bf16.mxu1 %v189_v0 }
  0x14   :  { %155 = vmatpush1.bf16.msra.mxu0 %v154_v20  ;;  %181 = vmatpush1.bf16.msra.mxu1 %v154_v20 }
  0x15   :  { %156 = vmatprep.subr.bf16.mxu0 %v189_v0  ;;  %173 = vmatprep.subr.bf16.mxu1 %v189_v0 }
  0x18   :  { %158 = vmatpush1.bf16.msra.mxu0 %v157_v23  ;;  %182 = vmatpush1.bf16.msra.mxu1 %v157_v23 }
  0x19   :  { %159 = vmatprep.subr.bf16.mxu0 %v189_v0  ;;  %174 = vmatprep.subr.bf16.mxu1 %v189_v0 }
  0x1c   :  { %161 = vmatpush1.bf16.msra.mxu0 %v160_v26  ;;  %183 = vmatpush1.bf16.msra.mxu1 %v160_v26 }
  0x1d   :  { %162 = vmatprep.subr.bf16.mxu0 %v189_v0  ;;  %175 = vmatprep.subr.bf16.mxu1 %v189_v0 }
  0x20   :  { %164 = vmatpush1.bf16.msra.mxu0 %v163_v29  ;;  %184 = vmatpush1.bf16.msra.mxu1 %v163_v29 }
  0x21   :  { %165 = vmatprep.subr.bf16.mxu0 %v189_v0  ;;  %176 = vmatprep.subr.bf16.mxu1 %v189_v0 }
  0x24   :  { %167 = vmatpush1.bf16.msra.mxu0 %v166_v32  ;;  %185 = vmatpush1.bf16.msra.mxu1 %v166_v32 }
  0x27   :  { %120 = vmatmul.mubr.f32.vlgmr.msra.gmra.mrb[0].mxu0 %v14_v33  ;;  %125 = vmatmul.mubr.f32.vlgmr.msra.gmra.mrb[0].mxu1 %v16_v34 }
  0x86   :  { %v41_v35 = vpop.permute.xlu0 %40 }
  0x8a   :  { %v46_v36 = vpop.permute.xlu0 %45 }
  0xfa   :  { %v121_v37 = vpop.f32.mrb[0].mxu0  ;;  %v126_v38 = vpop.f32.mrb[0].mxu1 }
  0xfb   :  { %v122_v39 = vadd.f32 %v121_v37, %v41_v35  ;;  %v127_v40 = vadd.f32 %v126_v38, %v46_v36  ;;  %v123_v41 = vpop.f32.mrb[1].mxu0  ;;  %v128_v42 = vpop.f32.mrb[1].mxu1 }
  0xfd   :  { %v130_v43 = vmax.f32 %v122_v39, 0.0  ;;  %v131_v44 = vmax.f32 %v127_v40, 0.0 }
  0xff   :  { %133 = vst.msk [vmem:[%s310_s3] sm:$0xff] %vm132_vm1, %v130_v43  ;;  %134 = vst.msk [vmem:[%s310_s3 + $0x8] sm:$0xff] %vm132_vm1, %v131_v44 }

// kernel: i2a_forward.11
= control target key start
LH: loop header
LB: loop body
LE: loop exit
PB: predicated region body
PF: predicated region fallthrough
CT: control target
= control target key end

     0   :  { %v957_v7 = vmov 0.0   ;;  %s1677_s0 = inlined_call_operand.vmem [shape: f32[2,576], index: 0, kind: input, shape index: {}]   ;;  %s1678_s1 = inlined_call_operand.vmem [shape: f32[2,128], index: 1, kind: input, shape index: {}]   ;;  %s1679_s2 = inlined_call_operand.vmem [shape: f32[576,256], index: 2, kind: input, shape index: {}]   ;;  %s1680_s3 = inlined_call_operand.vmem [shape: f32[128,256], index: 3, kind: input, shape index: {}]   ;;  %s1681_s4 = inlined_call_operand.vmem [shape: f32[1,256], index: 4, kind: input, shape index: {}]   ;;  %s1682_s5 = inlined_call_operand.vmem [shape: f32[256,5], index: 5, kind: input, shape index: {}]   ;;  %s1683_s6 = inlined_call_operand.vmem [shape: f32[1,5], index: 6, kind: input, shape index: {}]   ;;  %s1684_s7 = inlined_call_operand.hbm [shape: f32[2,4], index: 7, kind: output, shape index: {0}]   ;;  %s1685_s8 = inlined_call_operand.vmem [shape: f32[2,1], index: 8, kind: output, shape index: {1}]  }
   0x1   :  { %v177_v0 = vld [vmem:[%s1680_s3 + $0x8] sm:$0xff]  ;;  %v179_v1 = vld [vmem:[%s1680_s3 + $0x18] sm:$0xff]  ;;  %v176_v5 = vld [vmem:[%s1680_s3] sm:$0xff]  ;;  %272 = vmatprep.mubr.f32.mxu0 %v957_v7 }
   0x2   :  { %v32_v2 = vld [vmem:[%s1679_s2 + $0x8] sm:$0xff]  ;;  %v714_v3 = vpack.c.bf16 %v179_v1, %v177_v0  ;;  %v34_v4 = vld [vmem:[%s1679_s2 + $0x18] sm:$0xff]  ;;  %v178_v6 = vld [vmem:[%s1680_s3 + $0x10] sm:$0xff] }
   0x3   :  { %v746_v8 = vpack.c.bf16 %v34_v4, %v32_v2  ;;  %v716_v9 = vpack.c.bf16 %v178_v6, %v176_v5  ;;  %v31_v10 = vld [vmem:[%s1679_s2] sm:$0xff]  ;;  %v33_v11 = vld [vmem:[%s1679_s2 + $0x10] sm:$0xff]  ;;  %v181_v12 = vld [vmem:[%s1680_s3 + $0x28] sm:$0xff] }
   0x4   :  { %715 = vmatprep.subr.bf16.mxu0 %v714_v3  ;;  %v748_v13 = vpack.c.bf16 %v33_v11, %v31_v10  ;;  %v183_v14 = vld [vmem:[%s1680_s3 + $0x38] sm:$0xff]  ;;  %v36_v15 = vld [vmem:[%s1679_s2 + $0x28] sm:$0xff]  ;;  %v180_v19 = vld [vmem:[%s1680_s3 + $0x20] sm:$0xff] }
   0x5   :  { %v38_v16 = vld [vmem:[%s1679_s2 + $0x38] sm:$0xff]  ;;  %747 = vmatprep.subr.bf16.mxu1 %v746_v8  ;;  %717 = vmatpush1.bf16.msra.mxu0 %v716_v9  ;;  %v718_v17 = vpack.c.bf16 %v183_v14, %v181_v12  ;;  %v182_v20 = vld [vmem:[%s1680_s3 + $0x30] sm:$0xff]  ;;  %v35_v21 = vld [vmem:[%s1679_s2 + $0x20] sm:$0xff] }
   0x6   :  { %v750_v18 = vpack.c.bf16 %v38_v16, %v36_v15  ;;  %749 = vmatpush1.bf16.msra.mxu1 %v748_v13  ;;  %v720_v22 = vpack.c.bf16 %v182_v20, %v180_v19  ;;  %v37_v23 = vld [vmem:[%s1679_s2 + $0x30] sm:$0xff]  ;;  %v185_v24 = vld [vmem:[%s1680_s3 + $0x48] sm:$0xff]  ;;  %v187_v25 = vld [vmem:[%s1680_s3 + $0x58] sm:$0xff] }
   0x7   :  { %719 = vmatprep.subr.bf16.mxu0 %v718_v17  ;;  %v752_v26 = vpack.c.bf16 %v37_v23, %v35_v21  ;;  %v722_v27 = vpack.c.bf16 %v187_v25, %v185_v24  ;;  %v40_v28 = vld [vmem:[%s1679_s2 + $0x48] sm:$0xff]  ;;  %v42_v29 = vld [vmem:[%s1679_s2 + $0x58] sm:$0xff]  ;;  %v184_v30 = vld [vmem:[%s1680_s3 + $0x40] sm:$0xff] }
   0x8   :  { %751 = vmatprep.subr.bf16.mxu1 %v750_v18  ;;  %v754_v31 = vpack.c.bf16 %v42_v29, %v40_v28  ;;  %v186_v32 = vld [vmem:[%s1680_s3 + $0x50] sm:$0xff]  ;;  %v39_v33 = vld [vmem:[%s1679_s2 + $0x40] sm:$0xff]  ;;  %v189_v36 = vld [vmem:[%s1680_s3 + $0x68] sm:$0xff] }
   0x9   :  { %v41_v34 = vld [vmem:[%s1679_s2 + $0x50] sm:$0xff]  ;;  %721 = vmatpush1.bf16.msra.mxu0 %v720_v22  ;;  %v724_v35 = vpack.c.bf16 %v186_v32, %v184_v30  ;;  %v191_v37 = vld [vmem:[%s1680_s3 + $0x78] sm:$0xff]  ;;  %v44_v38 = vld [vmem:[%s1679_s2 + $0x68] sm:$0xff] }
   0xa   :  { %753 = vmatpush1.bf16.msra.mxu1 %v752_v26  ;;  %723 = vmatprep.subr.bf16.mxu0 %v722_v27  ;;  %v756_v39 = vpack.c.bf16 %v41_v34, %v39_v33  ;;  %v726_v40 = vpack.c.bf16 %v191_v37, %v189_v36  ;;  %v46_v41 = vld [vmem:[%s1679_s2 + $0x78] sm:$0xff]  ;;  %v188_v42 = vld [vmem:[%s1680_s3 + $0x60] sm:$0xff]  ;;  %v190_v43 = vld [vmem:[%s1680_s3 + $0x70] sm:$0xff] }
   0xb   :  { %755 = vmatprep.subr.bf16.mxu1 %v754_v31  ;;  %v758_v44 = vpack.c.bf16 %v46_v41, %v44_v38  ;;  %v43_v45 = vld [vmem:[%s1679_s2 + $0x60] sm:$0xff]  ;;  %v45_v46 = vld [vmem:[%s1679_s2 + $0x70] sm:$0xff]  ;;  %v193_v47 = vld [vmem:[%s1680_s3 + $0x88] sm:$0xff]  ;;  %v728_v51 = vpack.c.bf16 %v190_v43, %v188_v42 }
   0xc   :  { %v195_v48 = vld [vmem:[%s1680_s3 + $0x98] sm:$0xff]  ;;  %v48_v49 = vld [vmem:[%s1679_s2 + $0x88] sm:$0xff]  ;;  %v760_v52 = vpack.c.bf16 %v45_v46, %v43_v45  ;;  %v192_v54 = vld [vmem:[%s1680_s3 + $0x80] sm:$0xff] }
   0xd   :  { %v50_v50 = vld [vmem:[%s1679_s2 + $0x98] sm:$0xff]  ;;  %725 = vmatpush1.bf16.msra.mxu0 %v724_v35  ;;  %v730_v53 = vpack.c.bf16 %v195_v48, %v193_v47  ;;  %v194_v55 = vld [vmem:[%s1680_s3 + $0x90] sm:$0xff]  ;;  %v47_v56 = vld [vmem:[%s1679_s2 + $0x80] sm:$0xff] }
   0xe   :  { %757 = vmatpush1.bf16.msra.mxu1 %v756_v39  ;;  %727 = vmatprep.subr.bf16.mxu0 %v726_v40  ;;  %v762_v57 = vpack.c.bf16 %v50_v50, %v48_v49  ;;  %v49_v58 = vld [vmem:[%s1679_s2 + $0x90] sm:$0xff]  ;;  %v197_v59 = vld [vmem:[%s1680_s3 + $0xa8] sm:$0xff]  ;;  %v199_v60 = vld [vmem:[%s1680_s3 + $0xb8] sm:$0xff]  ;;  %v732_v63 = vpack.c.bf16 %v194_v55, %v192_v54  ;;  %v958_v50 = vmov 1983009808  }
   0xf   :  { %759 = vmatprep.subr.bf16.mxu1 %v758_v44  ;;  %v52_v61 = vld [vmem:[%s1679_s2 + $0xa8] sm:$0xff]  ;;  %v54_v62 = vld [vmem:[%s1679_s2 + $0xb8] sm:$0xff]  ;;  %v764_v0 = vpack.c.bf16 %v49_v58, %v47_v56  ;;  %v734_v1 = vpack.c.bf16 %v199_v60, %v197_v59  ;;  %v196_v2 = vld [vmem:[%s1680_s3 + $0xa0] sm:$0xff] }
  0x10   :  { %v198_v3 = vld [vmem:[%s1680_s3 + $0xb0] sm:$0xff]  ;;  %v51_v4 = vld [vmem:[%s1679_s2 + $0xa0] sm:$0xff]  ;;  %v766_v5 = vpack.c.bf16 %v54_v62, %v52_v61  ;;  %v201_v8 = vld [vmem:[%s1680_s3 + $0xc8] sm:$0xff] }
  0x11   :  { %729 = vmatpush1.bf16.msra.mxu0 %v728_v51  ;;  %v53_v6 = vld [vmem:[%s1679_s2 + $0xb0] sm:$0xff]  ;;  %v203_v9 = vld [vmem:[%s1680_s3 + $0xd8] sm:$0xff]  ;;  %v56_v10 = vld [vmem:[%s1679_s2 + $0xc8] sm:$0xff]  ;;  %v736_v12 = vpack.c.bf16 %v198_v3, %v196_v2  ;;  %v283_v51 = vunpack.c.l.s4 %v958_v50 }
  0x12   :  { %761 = vmatpush1.bf16.msra.mxu1 %v760_v52  ;;  %731 = vmatprep.subr.bf16.mxu0 %v730_v53  ;;  %v58_v11 = vld [vmem:[%s1679_s2 + $0xd8] sm:$0xff]  ;;  %v768_v13 = vpack.c.bf16 %v53_v6, %v51_v4  ;;  %v738_v14 = vpack.c.bf16 %v203_v9, %v201_v8  ;;  %v200_v15 = vld [vmem:[%s1680_s3 + $0xc0] sm:$0xff]  ;;  %v202_v16 = vld [vmem:[%s1680_s3 + $0xd0] sm:$0xff]  ;;  %v285_v52 = vlaneseq }
  0x13   :  { %763 = vmatprep.subr.bf16.mxu1 %v762_v57  ;;  %v55_v17 = vld [vmem:[%s1679_s2 + $0xc0] sm:$0xff]  ;;  %v770_v18 = vpack.c.bf16 %v58_v11, %v56_v10  ;;  %v57_v19 = vld [vmem:[%s1679_s2 + $0xd0] sm:$0xff]  ;;  %v205_v20 = vld [vmem:[%s1680_s3 + $0xe8] sm:$0xff]  ;;  %v740_v24 = vpack.c.bf16 %v202_v16, %v200_v15 }
  0x14   :  { %v207_v21 = vld [vmem:[%s1680_s3 + $0xf8] sm:$0xff]  ;;  %v60_v22 = vld [vmem:[%s1679_s2 + $0xe8] sm:$0xff]  ;;  %v772_v25 = vpack.c.bf16 %v57_v19, %v55_v17  ;;  %v204_v27 = vld [vmem:[%s1680_s3 + $0xe0] sm:$0xff]  ;;  %v1262_v2 = vshrl.u32 %v285_v52, 7 }
  0x15   :  { %733 = vmatpush1.bf16.msra.mxu0 %v732_v63  ;;  %v62_v23 = vld [vmem:[%s1679_s2 + $0xf8] sm:$0xff]  ;;  %v742_v26 = vpack.c.bf16 %v207_v21, %v205_v20  ;;  %v206_v28 = vld [vmem:[%s1680_s3 + $0xf0] sm:$0xff]  ;;  %v59_v29 = vld [vmem:[%s1679_s2 + $0xe0] sm:$0xff] }
  0x16   :  { %765 = vmatpush1.bf16.msra.mxu1 %v764_v0  ;;  %735 = vmatprep.subr.bf16.mxu0 %v734_v1  ;;  %v774_v30 = vpack.c.bf16 %v62_v23, %v60_v22  ;;  %v61_v31 = vld [vmem:[%s1679_s2 + $0xf0] sm:$0xff]  ;;  %v96_v32 = vld [vmem:[%s1679_s2 + $0x208] sm:$0xff]  ;;  %v98_v33 = vld [vmem:[%s1679_s2 + $0x218] sm:$0xff]  ;;  %v744_v36 = vpack.c.bf16 %v206_v28, %v204_v27  ;;  %v284_v1 = vunpack.c.0.s8 %v283_v51 }
  0x17   :  { %767 = vmatprep.subr.bf16.mxu1 %v766_v5  ;;  %v64_v34 = vld [vmem:[%s1679_s2 + $0x108] sm:$0xff]  ;;  %v66_v35 = vld [vmem:[%s1679_s2 + $0x118] sm:$0xff]  ;;  %v776_v37 = vpack.c.bf16 %v61_v31, %v59_v29  ;;  %v810_v38 = vpack.c.bf16 %v98_v33, %v96_v32  ;;  %v63_v39 = vld [vmem:[%s1679_s2 + $0x100] sm:$0xff] }
  0x18   :  { %v95_v40 = vld [vmem:[%s1679_s2 + $0x200] sm:$0xff]  ;;  %v97_v41 = vld [vmem:[%s1679_s2 + $0x210] sm:$0xff]  ;;  %v778_v42 = vpack.c.bf16 %v66_v35, %v64_v34  ;;  %v100_v44 = vld [vmem:[%s1679_s2 + $0x228] sm:$0xff]  ;;  %v287_v16 = vsub.s32 %v284_v1, %v1262_v2 }
  0x19   :  { %737 = vmatpush1.bf16.msra.mxu0 %v736_v12  ;;  %v65_v43 = vld [vmem:[%s1679_s2 + $0x110] sm:$0xff]  ;;  %v102_v45 = vld [vmem:[%s1679_s2 + $0x238] sm:$0xff]  ;;  %v68_v46 = vld [vmem:[%s1679_s2 + $0x128] sm:$0xff]  ;;  %v812_v49 = vpack.c.bf16 %v97_v41, %v95_v40 }
  0x1a   :  { %769 = vmatpush1.bf16.msra.mxu1 %v768_v13  ;;  %739 = vmatprep.subr.bf16.mxu0 %v738_v14  ;;  %v70_v47 = vld [vmem:[%s1679_s2 + $0x138] sm:$0xff]  ;;  %v175_v48 = vld [vmem:[%s1678_s1] sm:$0x3]  ;;  %v780_v53 = vpack.c.bf16 %v65_v43, %v63_v39  ;;  %v814_v54 = vpack.c.bf16 %v102_v45, %v100_v44  ;;  %v101_v57 = vld [vmem:[%s1679_s2 + $0x230] sm:$0xff] }
  0x1b   :  { %771 = vmatprep.subr.bf16.mxu1 %v770_v18  ;;  %v67_v55 = vld [vmem:[%s1679_s2 + $0x120] sm:$0xff]  ;;  %v782_v58 = vpack.c.bf16 %v70_v47, %v68_v46  ;;  %v69_v59 = vld [vmem:[%s1679_s2 + $0x130] sm:$0xff]  ;;  %v104_v60 = vld [vmem:[%s1679_s2 + $0x248] sm:$0xff] }
  0x1c   :  { %v99_v56 = vld [vmem:[%s1679_s2 + $0x220] sm:$0xff]  ;;  %v106_v61 = vld [vmem:[%s1679_s2 + $0x258] sm:$0xff]  ;;  %v72_v62 = vld [vmem:[%s1679_s2 + $0x148] sm:$0xff]  ;;  %v784_v3 = vpack.c.bf16 %v69_v59, %v67_v55 }
  0x1d   :  { %741 = vmatpush1.bf16.msra.mxu0 %v740_v24  ;;  %v74_v63 = vld [vmem:[%s1679_s2 + $0x158] sm:$0xff]  ;;  %v816_v0 = vpack.c.bf16 %v101_v57, %v99_v56  ;;  %v818_v4 = vpack.c.bf16 %v106_v61, %v104_v60  ;;  %v71_v5 = vld [vmem:[%s1679_s2 + $0x140] sm:$0xff]  ;;  %v105_v8 = vld [vmem:[%s1679_s2 + $0x250] sm:$0xff] }
  0x1e   :  { %773 = vmatpush1.bf16.msra.mxu1 %v772_v25  ;;  %743 = vmatprep.subr.bf16.mxu0 %v742_v26  ;;  %v103_v6 = vld [vmem:[%s1679_s2 + $0x240] sm:$0xff]  ;;  %v786_v9 = vpack.c.bf16 %v74_v63, %v72_v62  ;;  %v73_v10 = vld [vmem:[%s1679_s2 + $0x150] sm:$0xff]  ;;  %v108_v11 = vld [vmem:[%s1679_s2 + $0x268] sm:$0xff] }
  0x1f   :  { %775 = vmatprep.subr.bf16.mxu1 %v774_v30  ;;  %v110_v12 = vld [vmem:[%s1679_s2 + $0x278] sm:$0xff]  ;;  %v76_v13 = vld [vmem:[%s1679_s2 + $0x168] sm:$0xff]  ;;  %v820_v15 = vpack.c.bf16 %v105_v8, %v103_v6  ;;  %v788_v17 = vpack.c.bf16 %v73_v10, %v71_v5  ;;  %v75_v19 = vld [vmem:[%s1679_s2 + $0x160] sm:$0xff] }
  0x20   :  { %v78_v14 = vld [vmem:[%s1679_s2 + $0x178] sm:$0xff]  ;;  %v822_v18 = vpack.c.bf16 %v110_v12, %v108_v11  ;;  %v107_v20 = vld [vmem:[%s1679_s2 + $0x260] sm:$0xff]  ;;  %v109_v21 = vld [vmem:[%s1679_s2 + $0x270] sm:$0xff] }
  0x21   :  { %745 = vmatpush1.bf16.msra.mxu0 %v744_v36  ;;  %v790_v22 = vpack.c.bf16 %v78_v14, %v76_v13  ;;  %v77_v23 = vld [vmem:[%s1679_s2 + $0x170] sm:$0xff]  ;;  %v112_v24 = vld [vmem:[%s1679_s2 + $0x288] sm:$0xff]  ;;  %v114_v25 = vld [vmem:[%s1679_s2 + $0x298] sm:$0xff]  ;;  %v824_v29 = vpack.c.bf16 %v109_v21, %v107_v20 }
  0x22   :  { %777 = vmatpush1.bf16.msra.mxu1 %v776_v37  ;;  %811 = vmatprep.subr.bf16.mxu0 %v810_v38  ;;  %v80_v26 = vld [vmem:[%s1679_s2 + $0x188] sm:$0xff]  ;;  %v82_v27 = vld [vmem:[%s1679_s2 + $0x198] sm:$0xff]  ;;  %v29_v28 = vld [vmem:[%s1677_s0] sm:$0xff]  ;;  %v792_v32 = vpack.c.bf16 %v77_v23, %v75_v19  ;;  %v826_v33 = vpack.c.bf16 %v114_v25, %v112_v24 }
  0x23   :  { %779 = vmatprep.subr.bf16.mxu1 %v778_v42  ;;  %v281_v30 = vcombine.high %v29_v28, %v29_v28  ;;  %v1316_v31 = vrot.slane %v29_v28, %v287_v16  ;;  %v79_v34 = vld [vmem:[%s1679_s2 + $0x180] sm:$0xff]  ;;  %v113_v36 = vld [vmem:[%s1679_s2 + $0x290] sm:$0xff]  ;;  %v794_v37 = vpack.c.bf16 %v82_v27, %v80_v26  ;;  %v116_v39 = vld [vmem:[%s1679_s2 + $0x2a8] sm:$0xff] }
  0x24   :  { %273 = vmatmul.mubr.f32.vlgmr.msra.gmra.mrb[0].mxu0 %v175_v48  ;;  %v111_v35 = vld [vmem:[%s1679_s2 + $0x280] sm:$0xff]  ;;  %v81_v38 = vld [vmem:[%s1679_s2 + $0x190] sm:$0xff]  ;;  %v118_v40 = vld [vmem:[%s1679_s2 + $0x2b8] sm:$0xff] }
  0x25   :  { %813 = vmatpush1.bf16.msra.mxu0 %v812_v49  ;;  %v296_v41 = vcombine.high %v1316_v31, %v1316_v31  ;;  %v1338_v42 = vrot.slane %v281_v30, %v287_v16  ;;  %v84_v43 = vld [vmem:[%s1679_s2 + $0x1a8] sm:$0xff]  ;;  %v86_v44 = vld [vmem:[%s1679_s2 + $0x1b8] sm:$0xff]  ;;  %v828_v45 = vpack.c.bf16 %v113_v36, %v111_v35  ;;  %v796_v47 = vpack.c.bf16 %v81_v38, %v79_v34  ;;  %v83_v49 = vld [vmem:[%s1679_s2 + $0x1a0] sm:$0xff] }
  0x26   :  { %781 = vmatpush1.bf16.msra.mxu1 %v780_v53  ;;  %815 = vmatprep.subr.bf16.mxu0 %v814_v54  ;;  %v830_v48 = vpack.c.bf16 %v118_v40, %v116_v39  ;;  %v115_v50 = vld [vmem:[%s1679_s2 + $0x2a0] sm:$0xff]  ;;  %v117_v51 = vld [vmem:[%s1679_s2 + $0x2b0] sm:$0xff]  ;;  %v798_v52 = vpack.c.bf16 %v86_v44, %v84_v43  ;;  %v120_v54 = vld [vmem:[%s1679_s2 + $0x2c8] sm:$0xff] }
  0x27   :  { %783 = vmatprep.subr.bf16.mxu1 %v782_v58  ;;  %376 = vmatprep.mubr.f32.mxu1 %v296_v41  ;;  %v297_v46 = vcombine.high %v1338_v42, %v1338_v42  ;;  %v85_v53 = vld [vmem:[%s1679_s2 + $0x1b0] sm:$0xff]  ;;  %v122_v55 = vld [vmem:[%s1679_s2 + $0x2d8] sm:$0xff]  ;;  %v88_v56 = vld [vmem:[%s1679_s2 + $0x1c8] sm:$0xff]  ;;  %v832_v58 = vpack.c.bf16 %v117_v51, %v115_v50 }
  0x28   :  { %v90_v57 = vld [vmem:[%s1679_s2 + $0x1d8] sm:$0xff]  ;;  %v800_v59 = vpack.c.bf16 %v85_v53, %v83_v49  ;;  %v834_v60 = vpack.c.bf16 %v122_v55, %v120_v54  ;;  %v87_v61 = vld [vmem:[%s1679_s2 + $0x1c0] sm:$0xff]  ;;  %v121_v63 = vld [vmem:[%s1679_s2 + $0x2d0] sm:$0xff] }
  0x29   :  { %817 = vmatpush1.bf16.msra.mxu0 %v816_v0  ;;  %447 = vmatprep.mubr.f32.mxu0 %v297_v46  ;;  %v119_v62 = vld [vmem:[%s1679_s2 + $0x2c0] sm:$0xff]  ;;  %v802_v0 = vpack.c.bf16 %v90_v57, %v88_v56  ;;  %v89_v1 = vld [vmem:[%s1679_s2 + $0x1d0] sm:$0xff]  ;;  %v92_v5 = vld [vmem:[%s1679_s2 + $0x1e8] sm:$0xff] }
  0x2a   :  { %785 = vmatpush1.bf16.msra.mxu1 %v784_v3  ;;  %819 = vmatprep.subr.bf16.mxu0 %v818_v4  ;;  %v124_v3 = vld [vmem:[%s1679_s2 + $0x2e8] sm:$0xff]  ;;  %v126_v4 = vld [vmem:[%s1679_s2 + $0x2f8] sm:$0xff]  ;;  %v836_v8 = vpack.c.bf16 %v121_v63, %v119_v62  ;;  %v91_v11 = vld [vmem:[%s1679_s2 + $0x1e0] sm:$0xff] }
  0x2b   :  { %787 = vmatprep.subr.bf16.mxu1 %v786_v9  ;;  %v94_v6 = vld [vmem:[%s1679_s2 + $0x1f8] sm:$0xff]  ;;  %v804_v9 = vpack.c.bf16 %v89_v1, %v87_v61  ;;  %v838_v10 = vpack.c.bf16 %v126_v4, %v124_v3  ;;  %v123_v12 = vld [vmem:[%s1679_s2 + $0x2e0] sm:$0xff]  ;;  %v125_v13 = vld [vmem:[%s1679_s2 + $0x2f0] sm:$0xff] }
  0x2c   :  { %v806_v14 = vpack.c.bf16 %v94_v6, %v92_v5  ;;  %v128_v16 = vld [vmem:[%s1679_s2 + $0x308] sm:$0xff] }
  0x2d   :  { %821 = vmatpush1.bf16.msra.mxu0 %v820_v15  ;;  %v93_v15 = vld [vmem:[%s1679_s2 + $0x1f0] sm:$0xff] }
  0x2e   :  { %789 = vmatpush1.bf16.msra.mxu1 %v788_v17  ;;  %823 = vmatprep.subr.bf16.mxu0 %v822_v18  ;;  %v130_v17 = vld [vmem:[%s1679_s2 + $0x318] sm:$0xff]  ;;  %v840_v18 = vpack.c.bf16 %v125_v13, %v123_v12 }
  0x2f   :  { %791 = vmatprep.subr.bf16.mxu1 %v790_v22 }
  0x31   :  { %825 = vmatpush1.bf16.msra.mxu0 %v824_v29 }
  0x32   :  { %793 = vmatpush1.bf16.msra.mxu1 %v792_v32  ;;  %827 = vmatprep.subr.bf16.mxu0 %v826_v33 }
  0x33   :  { %795 = vmatprep.subr.bf16.mxu1 %v794_v37 }
  0x35   :  { %829 = vmatpush1.bf16.msra.mxu0 %v828_v45 }
  0x36   :  { %797 = vmatpush1.bf16.msra.mxu1 %v796_v47  ;;  %831 = vmatprep.subr.bf16.mxu0 %v830_v48 }
  0x37   :  { %799 = vmatprep.subr.bf16.mxu1 %v798_v52 }
  0x39   :  { %833 = vmatpush1.bf16.msra.mxu0 %v832_v58 }
  0x3a   :  { %801 = vmatpush1.bf16.msra.mxu1 %v800_v59  ;;  %835 = vmatprep.subr.bf16.mxu0 %v834_v60 }
  0x3b   :  { %803 = vmatprep.subr.bf16.mxu1 %v802_v0 }
  0x3d   :  { %837 = vmatpush1.bf16.msra.mxu0 %v836_v8 }
  0x3e   :  { %14 = vsyncpa [#allocation3], 0  ;;  %805 = vmatpush1.bf16.msra.mxu1 %v804_v9  ;;  %839 = vmatprep.subr.bf16.mxu0 %v838_v10  ;;  %v808_v19 = vpack.c.bf16 %v93_v15, %v91_v11  ;;  %v842_v20 = vpack.c.bf16 %v130_v17, %v128_v16  ;;  %v127_v21 = vld [vmem:[%s1679_s2 + $0x300] sm:$0xff]  ;;  %v129_v22 = vld [vmem:[%s1679_s2 + $0x310] sm:$0xff]  ;;  %vm309_vm0 = vcmask 523264   ;;  %vm650_vm1 = vcmask 25600  }
  0x3f   :  { %807 = vmatprep.subr.bf16.mxu1 %v806_v14  ;;  %v132_v23 = vld [vmem:[%s1679_s2 + $0x328] sm:$0xff]  ;;  %v134_v24 = vld [vmem:[%s1679_s2 + $0x338] sm:$0xff]  ;;  %v844_v25 = vpack.c.bf16 %v129_v22, %v127_v21  ;;  %v131_v27 = vld [vmem:[%s1679_s2 + $0x320] sm:$0xff]  ;;  %s960_s3 = smov 124  }
  0x40   :  { %v846_v26 = vpack.c.bf16 %v134_v24, %v132_v23  ;;  %v133_v28 = vld [vmem:[%s1679_s2 + $0x330] sm:$0xff]  ;;  %v136_v29 = vld [vmem:[%s1679_s2 + $0x348] sm:$0xff]  ;;  %v138_v30 = vld [vmem:[%s1679_s2 + $0x358] sm:$0xff] }
  0x41   :  { %841 = vmatpush1.bf16.msra.mxu0 %v840_v18  ;;  %v848_v32 = vpack.c.bf16 %v133_v28, %v131_v27  ;;  %v850_v33 = vpack.c.bf16 %v138_v30, %v136_v29  ;;  %v135_v34 = vld [vmem:[%s1679_s2 + $0x340] sm:$0xff]  ;;  %v137_v35 = vld [vmem:[%s1679_s2 + $0x350] sm:$0xff]  ;;  %v140_v36 = vld [vmem:[%s1679_s2 + $0x368] sm:$0xff] }
  0x42   :  { %809 = vmatpush1.bf16.msra.mxu1 %v808_v19  ;;  %843 = vmatprep.subr.bf16.mxu0 %v842_v20  ;;  %v852_v37 = vpack.c.bf16 %v137_v35, %v135_v34  ;;  %v139_v39 = vld [vmem:[%s1679_s2 + $0x360] sm:$0xff]  ;;  %v141_v40 = vld [vmem:[%s1679_s2 + $0x370] sm:$0xff]  ;;  %v144_v41 = vld [vmem:[%s1679_s2 + $0x388] sm:$0xff] }
  0x43   :  { %v146_v43 = vld [vmem:[%s1679_s2 + $0x398] sm:$0xff]  ;;  %v856_v44 = vpack.c.bf16 %v141_v40, %v139_v39  ;;  %v143_v46 = vld [vmem:[%s1679_s2 + $0x380] sm:$0xff]  ;;  %v145_v47 = vld [vmem:[%s1679_s2 + $0x390] sm:$0xff] }
  0x44   :  { %v858_v45 = vpack.c.bf16 %v146_v43, %v144_v41  ;;  %v148_v48 = vld [vmem:[%s1679_s2 + $0x3a8] sm:$0xff]  ;;  %v150_v49 = vld [vmem:[%s1679_s2 + $0x3b8] sm:$0xff]  ;;  %v860_v50 = vpack.c.bf16 %v145_v47, %v143_v46  ;;  %v147_v52 = vld [vmem:[%s1679_s2 + $0x3a0] sm:$0xff] }
  0x45   :  { %377 = vmatmul.mubr.f32.vlgmr.msra.gmra.mrb[0].mxu1 %v1316_v31  ;;  %845 = vmatpush1.bf16.msra.mxu0 %v844_v25  ;;  %v142_v31 = vld [vmem:[%s1679_s2 + $0x378] sm:$0xff]  ;;  %v862_v51 = vpack.c.bf16 %v150_v49, %v148_v48  ;;  %v149_v53 = vld [vmem:[%s1679_s2 + $0x3b0] sm:$0xff]  ;;  %v152_v54 = vld [vmem:[%s1679_s2 + $0x3c8] sm:$0xff] }
  0x46   :  { %847 = vmatprep.subr.bf16.mxu0 %v846_v26  ;;  %v854_v38 = vpack.c.bf16 %v142_v31, %v140_v36  ;;  %v154_v55 = vld [vmem:[%s1679_s2 + $0x3d8] sm:$0xff]  ;;  %v864_v56 = vpack.c.bf16 %v149_v53, %v147_v52  ;;  %v151_v58 = vld [vmem:[%s1679_s2 + $0x3c0] sm:$0xff]  ;;  %v153_v59 = vld [vmem:[%s1679_s2 + $0x3d0] sm:$0xff] }
  0x47   :  { %v866_v57 = vpack.c.bf16 %v154_v55, %v152_v54  ;;  %v156_v60 = vld [vmem:[%s1679_s2 + $0x3e8] sm:$0xff]  ;;  %v158_v61 = vld [vmem:[%s1679_s2 + $0x3f8] sm:$0xff]  ;;  %v868_v62 = vpack.c.bf16 %v153_v59, %v151_v58  ;;  %v155_v0 = vld [vmem:[%s1679_s2 + $0x3e0] sm:$0xff] }
  0x48   :  { %v870_v63 = vpack.c.bf16 %v158_v61, %v156_v60  ;;  %v157_v1 = vld [vmem:[%s1679_s2 + $0x3f0] sm:$0xff]  ;;  %v160_v3 = vld [vmem:[%s1679_s2 + $0x408] sm:$0xff]  ;;  %v162_v4 = vld [vmem:[%s1679_s2 + $0x418] sm:$0xff] }
  0x49   :  { %849 = vmatpush1.bf16.msra.mxu0 %v848_v32  ;;  %v872_v5 = vpack.c.bf16 %v157_v1, %v155_v0  ;;  %v874_v6 = vpack.c.bf16 %v162_v4, %v160_v3  ;;  %v159_v8 = vld [vmem:[%s1679_s2 + $0x400] sm:$0xff]  ;;  %v161_v9 = vld [vmem:[%s1679_s2 + $0x410] sm:$0xff]  ;;  %v164_v10 = vld [vmem:[%s1679_s2 + $0x428] sm:$0xff] }
  0x4a   :  { %851 = vmatprep.subr.bf16.mxu0 %v850_v33  ;;  %v166_v11 = vld [vmem:[%s1679_s2 + $0x438] sm:$0xff]  ;;  %v876_v12 = vpack.c.bf16 %v161_v9, %v159_v8  ;;  %v163_v14 = vld [vmem:[%s1679_s2 + $0x420] sm:$0xff]  ;;  %v165_v15 = vld [vmem:[%s1679_s2 + $0x430] sm:$0xff] }
  0x4b   :  { %v878_v13 = vpack.c.bf16 %v166_v11, %v164_v10  ;;  %v168_v16 = vld [vmem:[%s1679_s2 + $0x448] sm:$0xff]  ;;  %v170_v17 = vld [vmem:[%s1679_s2 + $0x458] sm:$0xff]  ;;  %v880_v18 = vpack.c.bf16 %v165_v15, %v163_v14  ;;  %v167_v20 = vld [vmem:[%s1679_s2 + $0x440] sm:$0xff] }
  0x4c   :  { %v882_v19 = vpack.c.bf16 %v170_v17, %v168_v16  ;;  %v169_v21 = vld [vmem:[%s1679_s2 + $0x450] sm:$0xff]  ;;  %v172_v22 = vld [vmem:[%s1679_s2 + $0x468] sm:$0xff]  ;;  %v171_v24 = vld [vmem:[%s1679_s2 + $0x460] sm:$0xff] }
  0x4d   :  { %853 = vmatpush1.bf16.msra.mxu0 %v852_v37  ;;  %v173_v25 = vld [vmem:[%s1679_s2 + $0x470] sm:$0xff]  ;;  %v676_v27 = vld.sshfl [vmem:[%s1677_s0 + $0x8] sm:$0x3 pattern:$0x76325410]  ;;  %v557_v28 = vld [vmem:[%s1682_s5 + $0x80] sm:$0xff] }
  0x4e   :  { %855 = vmatprep.subr.bf16.mxu0 %v854_v38  ;;  %v888_v26 = vpack.c.bf16 %v173_v25, %v171_v24  ;;  %v558_v29 = vld [vmem:[%s1682_s5 + $0x88] sm:$0xff]  ;;  %v541_v30 = vld [vmem:[%s1682_s5] sm:$0xff]  ;;  %v559_v34 = vld [vmem:[%s1682_s5 + $0x90] sm:$0xff] }
  0x4f   :  { %v890_v32 = vpack.c.bf16 %v558_v29, %v557_v28  ;;  %v542_v33 = vld [vmem:[%s1682_s5 + $0x8] sm:$0xff]  ;;  %v560_v35 = vld [vmem:[%s1682_s5 + $0x98] sm:$0xff]  ;;  %v543_v37 = vld [vmem:[%s1682_s5 + $0x10] sm:$0xff] }
  0x50   :  { %v892_v36 = vpack.c.bf16 %v542_v33, %v541_v30  ;;  %v894_v31 = vpack.c.bf16 %v560_v35, %v559_v34  ;;  %v544_v38 = vld [vmem:[%s1682_s5 + $0x18] sm:$0xff]  ;;  %v561_v39 = vld [vmem:[%s1682_s5 + $0xa0] sm:$0xff]  ;;  %v562_v40 = vld [vmem:[%s1682_s5 + $0xa8] sm:$0xff] }
  0x51   :  { %857 = vmatpush1.bf16.msra.mxu0 %v856_v44  ;;  %891 = vmatprep.subr.bf16.mxu1 %v890_v32  ;;  %v896_v41 = vpack.c.bf16 %v544_v38, %v543_v37  ;;  %v898_v43 = vpack.c.bf16 %v562_v40, %v561_v39  ;;  %v545_v44 = vld [vmem:[%s1682_s5 + $0x20] sm:$0xff]  ;;  %v563_v46 = vld [vmem:[%s1682_s5 + $0xb0] sm:$0xff]  ;;  %v564_v47 = vld [vmem:[%s1682_s5 + $0xb8] sm:$0xff] }
  0x52   :  { %859 = vmatprep.subr.bf16.mxu0 %v858_v45  ;;  %893 = vmatpush3.bf16.msra.mxu1 %v892_v36  ;;  %v546_v45 = vld [vmem:[%s1682_s5 + $0x28] sm:$0xff]  ;;  %v902_v49 = vpack.c.bf16 %v564_v47, %v563_v46  ;;  %v565_v52 = vld [vmem:[%s1682_s5 + $0xc0] sm:$0xff]  ;;  %v567_v58 = vld [vmem:[%s1682_s5 + $0xd0] sm:$0xff] }
  0x53   :  { %895 = vmatprep.subr.bf16.mxu1 %v894_v31  ;;  %v900_v48 = vpack.c.bf16 %v546_v45, %v545_v44  ;;  %v566_v53 = vld [vmem:[%s1682_s5 + $0xc8] sm:$0xff]  ;;  %v568_v59 = vld [vmem:[%s1682_s5 + $0xd8] sm:$0xff]  ;;  %v569_v1 = vld [vmem:[%s1682_s5 + $0xe0] sm:$0xff] }
  0x54   :  { %v906_v55 = vpack.c.bf16 %v566_v53, %v565_v52  ;;  %v910_v61 = vpack.c.bf16 %v568_v59, %v567_v58  ;;  %v570_v3 = vld [vmem:[%s1682_s5 + $0xe8] sm:$0xff]  ;;  %v571_v9 = vld [vmem:[%s1682_s5 + $0xf0] sm:$0xff]  ;;  %v572_v10 = vld [vmem:[%s1682_s5 + $0xf8] sm:$0xff] }
  0x55   :  { %861 = vmatpush1.bf16.msra.mxu0 %v860_v50  ;;  %v547_v50 = vld [vmem:[%s1682_s5 + $0x30] sm:$0xff]  ;;  %v914_v4 = vpack.c.bf16 %v570_v3, %v569_v1  ;;  %v918_v11 = vpack.c.bf16 %v572_v10, %v571_v9  ;;  %v678_v35 = vld [vmem:[%s1683_s6] ss:$0 sm:$0xff] }
  0x56   :  { %863 = vmatprep.subr.bf16.mxu0 %v862_v51  ;;  %897 = vmatpush3.bf16.msra.mxu1 %v896_v41  ;;  %v548_v51 = vld [vmem:[%s1682_s5 + $0x38] sm:$0xff] }
  0x57   :  { %899 = vmatprep.subr.bf16.mxu1 %v898_v43  ;;  %v904_v54 = vpack.c.bf16 %v548_v51, %v547_v50 }
  0x59   :  { %865 = vmatpush1.bf16.msra.mxu0 %v864_v56  ;;  %v549_v56 = vld [vmem:[%s1682_s5 + $0x40] sm:$0xff] }
  0x5a   :  { %867 = vmatprep.subr.bf16.mxu0 %v866_v57  ;;  %901 = vmatpush3.bf16.msra.mxu1 %v900_v48  ;;  %v550_v57 = vld [vmem:[%s1682_s5 + $0x48] sm:$0xff] }
  0x5b   :  { %903 = vmatprep.subr.bf16.mxu1 %v902_v49  ;;  %v908_v60 = vpack.c.bf16 %v550_v57, %v549_v56 }
  0x5d   :  { %869 = vmatpush1.bf16.msra.mxu0 %v868_v62  ;;  %v551_v62 = vld [vmem:[%s1682_s5 + $0x50] sm:$0xff] }
  0x5e   :  { %871 = vmatprep.subr.bf16.mxu0 %v870_v63  ;;  %905 = vmatpush3.bf16.msra.mxu1 %v904_v54  ;;  %v552_v63 = vld [vmem:[%s1682_s5 + $0x58] sm:$0xff] }
  0x5f   :  { %907 = vmatprep.subr.bf16.mxu1 %v906_v55  ;;  %v912_v0 = vpack.c.bf16 %v552_v63, %v551_v62 }
  0x61   :  { %873 = vmatpush1.bf16.msra.mxu0 %v872_v5  ;;  %v553_v5 = vld [vmem:[%s1682_s5 + $0x60] sm:$0xff] }
  0x62   :  { %875 = vmatprep.subr.bf16.mxu0 %v874_v6  ;;  %909 = vmatpush3.bf16.msra.mxu1 %v908_v60  ;;  %v554_v6 = vld [vmem:[%s1682_s5 + $0x68] sm:$0xff] }
  0x63   :  { %911 = vmatprep.subr.bf16.mxu1 %v910_v61  ;;  %v916_v8 = vpack.c.bf16 %v554_v6, %v553_v5 }
  0x64   :  { %448 = vmatmul.mubr.f32.vlgmr.msra.gmra.mrb[2].mxu0 %v1338_v42  ;;  %v174_v42 = vld [vmem:[%s1679_s2 + $0x478] sm:$0xff] }
  0x65   :  { %877 = vmatpush1.bf16.msra.mxu0 %v876_v12  ;;  %518 = vmatprep.mubr.f32.mxu0 %v957_v7  ;;  %v884_v7 = vpack.c.bf16 %v169_v21, %v167_v20  ;;  %v886_v23 = vpack.c.bf16 %v174_v42, %v172_v22  ;;  %v555_v12 = vld [vmem:[%s1682_s5 + $0x70] sm:$0xff]  ;;  %v529_v21 = vsub.s32 0, %v1262_v2  ;;  %v525_v22 = vld [vmem:[%s1681_s4] sm:$0x3]  ;;  %v533_v42 = vsub.s32 1, %v1262_v2  ;;  %s959_s4 = smov [#allocation2]  }
  0x66   :  { %879 = vmatprep.subr.bf16.mxu0 %v878_v13  ;;  %913 = vmatpush3.bf16.msra.mxu1 %v912_v0  ;;  %v556_v13 = vld [vmem:[%s1682_s5 + $0x78] sm:$0xff]  ;;  %s664_s27 = sshll.u32 %s959_s4, 4  ;;  %s665_s27 = int_to_ptr.vmem [resolvable:$true] %s664_s27 }
  0x67   :  { %915 = vmatprep.subr.bf16.mxu1 %v914_v4  ;;  %v920_v14 = vpack.c.bf16 %v556_v13, %v555_v12  ;;  %v534_v24 = vrot.slane %v525_v22, %v533_v42  ;;  %s933_s28 = scalar_lea.vmem %s665_s27, 32  ;;  %p938_p1 = scmp.lt.s32.totalorder %s665_s27, %s665_s27 }
  0x68   :  { %p934_p0 = scmp.ne.s32.totalorder %s665_s27, %s933_s28  ;;  %p939_p2 = scmp.lt.s32.totalorder %s933_s28, %s933_s28 }
  0x69   :  { %881 = vmatpush1.bf16.msra.mxu0 %v880_v18 }
  0x6a   :  { %883 = vmatprep.subr.bf16.mxu0 %v882_v19  ;;  %917 = vmatpush3.bf16.msra.mxu1 %v916_v8  ;;  %p940_p3 = por %p939_p2, %p938_p1 }
  0x6b   :  { %919 = vmatprep.subr.bf16.mxu1 %v918_v11 }
  0x6c   :  { %p941_p4 = pnand %p940_p3, %p934_p0 }
  0x6d   :  { %885 = vmatpush1.bf16.msra.mxu0 %v884_v7  ;;  %v530_v7 = vrot.slane %v525_v22, %v529_v21 }
  0x6e   :  { %887 = vmatprep.subr.bf16.mxu0 %v886_v23  ;;  %921 = vmatpush3.bf16.msra.mxu1 %v920_v14 }
  0x71   :  { %889 = vmatpush1.bf16.msra.mxu0 %v888_v26 }
  0x74   :  { %677 = vmatmul.mubr.msk.f32.vlgmr.msra.gmra.mrb[2].mxu0 %vm309_vm0, %v676_v27 }
  0xf7   :  { %v274_v15 = vpop.f32.mrb[0].mxu0 }
  0xf8   :  { %v276_v16 = vpop.f32.mrb[1].mxu0 }
 0x118   :  { %v378_v17 = vpop.f32.mrb[0].mxu1 }
 0x119   :  { %v379_v18 = vadd.f32 %v378_v17, %v274_v15  ;;  %v380_v19 = vpop.f32.mrb[1].mxu1 }
 0x11a   :  { %v381_v20 = vadd.f32 %v380_v19, %v276_v16 }
 0x147   :  { %v520_v23 = vpop.f32.mrb[2].mxu0 }
 0x148   :  { %v923_v25 = vadd.f32 %v520_v23, %v379_v18  ;;  %v522_v26 = vpop.f32.mrb[3].mxu0 }
 0x149   :  { %v925_v27 = vadd.f32 %v522_v26, %v381_v20 }
 0x14a   :  { %v537_v28 = vadd.f32 %v923_v25, %v530_v7 }
 0x14b   :  { %v538_v29 = vadd.f32 %v925_v27, %v534_v24 }
 0x14c   :  { %v539_v32 = vmax.f32 %v537_v28, 0.0 }
 0x14d   :  { %v540_v30 = vmax.f32 %v538_v29, 0.0 }
 0x14f   :  { %644 = vmatprep.mubr.f32.mxu1 %v540_v30 }
 0x150   :  { %645 = vmatmul.mubr.f32.vlgmr.msra.gmra.mrb[2].mxu1 %v539_v32 }
 0x223   :  { %v711_v33 = vpop.f32.mrb[2].mxu1 }
 0x224   :  { %v712_v34 = vpop.f32.mrb[3].mxu1 }
 0x225   :  { %v713_v2 = vadd.f32 %v712_v34, %v711_v33 }
 0x227   :  { %v647_v36 = vadd.f32 %v713_v2, %v678_v35 }
 0x229   :  { %653 = vrot.lane.b32.xlu0 %v647_v36, %s960_s3  ;;  %651 = vst.msk [vmem:[#allocation2] sm:$0x3] %vm650_vm1, %v647_v36 }
 0x22a   :  { %944 = shalt.err (!%p941_p4)
}
 0x22b   :  { %s945_s6 = scalar_lea.hbm %s1684_s7, 32 }
 0x22c   :  { %p946_p5 = scmp.ne.s32.totalorder %s1684_s7, %s945_s6  ;;  %p949_p6 = scmp.lt.u32.totalorder %s945_s6, %s1684_s7 }
 0x22e   :  { %p951_p7 = pnand %p949_p6, %p946_p5 }
 0x230   :  { %954 = shalt.err (!%p951_p7)
}
 0x231   :  { %667 = dma.vmem_to_hbm [thread:$0]  %s665_s27, 32, %s1684_s7, [#allocation3]   ;;  %vm656_vm2 = vcmask 1024  }
 0x29b   :  { %v654_v31 = vpop.permute.xlu0 %653 }
 0x29c   :  { %657 = vst.msk [vmem:[%s1685_s8] sm:$0x3] %vm656_vm2, %v654_v31 }
 0x29d   :  { %955 = dma.done.wait [#allocation3], 32  }
 0x29e   :  { %956 = vsyncadd [#allocation3], 4294967264 }
 0x29f   :  { %675 = vsyncpa [#allocation3], 1 }

</bundles_post_ra>
